<compile_context>
chip_gen: v7x
topology: tpu7x:2x2x1
jax: 0.10.0
libtpu: 0.0.40
codegen_flags: <defaults>
</compile_context>

<pallas_src>
import functools
import math

import jax
import jax.numpy as jnp
from jax import lax
from jax.experimental import pallas as pl
from jax.experimental.pallas import tpu as pltpu

LN_EPS = 1e-5


def _layernorm(x, w, b):
    # f32 LayerNorm on the VPU; kept f32 even when matmuls run in bf16.
    mu = jnp.mean(x, axis=-1, keepdims=True)
    var = jnp.mean((x - mu) ** 2, axis=-1, keepdims=True)
    return (x - mu) * lax.rsqrt(var + LN_EPS) * w + b


def _gelu(x, *, fast):
    if fast:
        # tanh approximation -> EUP slot; intentional ~1e-3 divergence from the
        # exact-erf PyTorch default, used only on the bf16 fast path.
        c = jnp.float32(math.sqrt(2.0 / math.pi))
        return 0.5 * x * (1.0 + jnp.tanh(c * (x + jnp.float32(0.044715) * (x * x * x))))
    # PyTorch nn.GELU default (exact, erf-based).
    return 0.5 * x * (1.0 + lax.erf(x * jnp.float32(1.0 / math.sqrt(2.0))))


def _softmax_lastdim(s, *, fast):
    m = jnp.max(s, axis=-1, keepdims=True)
    e = jnp.exp(s - m)
    d = jnp.sum(e, axis=-1, keepdims=True)
    if fast:
        # approx reciprocal runs on the EUP slot; rows sum to 1 only to ~1e-3
        # (intentional divergence, fast path only).
        return e * pl.reciprocal(d, approx=True)
    return e / d


def block_kernel(
    x_ref,
    ln1_w_ref, ln1_b_ref,
    wqkv_ref,
    proj_w_ref, proj_b_ref,
    ln2_w_ref, ln2_b_ref,
    fc1_w_ref, fc1_b_ref,
    fc2_w_ref, fc2_b_ref,
    out_ref,
    ctx_ref,
    *, num_heads, n_t, n_s, batch_tile, compute_dtype, fast_math,
):
    N = n_t + n_s
    x = x_ref[...].astype(jnp.float32)            # (bt*N, C)
    M, C = x.shape
    hd = C // num_heads
    scale = jnp.float32(hd ** -0.5)
    cdt = compute_dtype

    def mxu(a, b):                                # operands already in compute dtype
        return jnp.dot(a, b, preferred_element_type=jnp.float32)

    # ---------------- attention branch (pre-norm) ----------------
    xn = _layernorm(x, ln1_w_ref[...], ln1_b_ref[...])
    xn_c = xn.astype(cdt)                         # cast once, reused

    # Single fused qkv matmul: K = C deep, 3C wide MXU pass.  At production
    # sizes (C % 128 == 0) the q/k/v lane slices below are aligned and free.
    qkv = mxu(xn_c, wqkv_ref[...])                # (M, 3C) f32
    q = (qkv[:, 0 * C:1 * C] * scale).astype(cdt)  # softmax scale folded into q once
    v = qkv[:, 2 * C:3 * C].astype(cdt)

    # Per-head context is written head-contiguously into the ctx VMEM scratch;
    # the output projection is then ONE full-depth (M, C) @ (C, C) matmul.
    # TODO(synk): at production batch_tile*num_heads, switch these static
    # Python unrolls to lax.fori_loop(unroll=2..4) with pl.ds head offsets to
    # bound code size; the ctx_ref stores already bound vreg live ranges.
    for bi in range(batch_tile):                  # static unroll over batch tile
        r0 = bi * N
        # One K^T per batch element (single XLU transpose) instead of an
        # implicit transpose per head from an A@B^T dot_general.
        kT = qkv[r0:r0 + N, 1 * C:2 * C].T.astype(cdt)    # (C, N)
        vb = v[r0:r0 + N]
        for h in range(num_heads):                # static unroll over heads
            c0 = h * hd
            kT_h = kT[c0:c0 + hd]                 # (hd, N)
            vh = vb[:, c0:c0 + hd]                # (N, hd)

            # template tokens attend only to template tokens
            p_t = _softmax_lastdim(
                mxu(q[r0:r0 + n_t, c0:c0 + hd], kT_h[:, :n_t]), fast=fast_math)
            ctx_ref[r0:r0 + n_t, c0:c0 + hd] = (
                mxu(p_t.astype(cdt), vh[:n_t]).astype(cdt))

            # search tokens attend to all tokens
            # TODO(synk): at long sequence lengths, tile K/V and use a
            # flash-style online softmax instead of materializing (n_s, N).
            p_s = _softmax_lastdim(
                mxu(q[r0 + n_t:r0 + N, c0:c0 + hd], kT_h), fast=fast_math)
            ctx_ref[r0 + n_t:r0 + N, c0:c0 + hd] = (
                mxu(p_s.astype(cdt), vh).astype(cdt))

    # Single full-depth projection over the whole slab (K = C on the MXU).
    attn = mxu(ctx_ref[...], proj_w_ref[...])     # (M, C) f32
    x1 = x + attn + proj_b_ref[...]               # residual 1 (+ proj bias once)

    # ---------------- MLP branch (pre-norm) ----------------
    xn2 = _layernorm(x1, ln2_w_ref[...], ln2_b_ref[...])
    h1 = mxu(xn2.astype(cdt), fc1_w_ref[...]) + fc1_b_ref[...]
    h1 = _gelu(h1, fast=fast_math)
    mlp = mxu(h1.astype(cdt), fc2_w_ref[...]) + fc2_b_ref[...]

    out_ref[...] = (x1 + mlp).astype(out_ref.dtype)   # residual 2
    # TODO(synk): for C < 128 (demo only) the output store is lane-masked;
    # production C should be a multiple of 128 so stores are lane-dense vst.


def _pick_batch_tile(B, N):
    """>= 2 grid steps (DMA pipelining + v7x 2-TC sharding), ~>=512 rows/step."""
    if B <= 1:
        return 1
    divisors = [d for d in range(1, B + 1) if B % d == 0]

    def ok(d):
        return (d * N) % 8 == 0 or d == B        # keep block sublane-aligned

    for d in divisors:                           # smallest tile with >=512 rows
        if ok(d) and d * N >= 512 and B // d >= 2:
            return d
    for d in reversed(divisors):                 # else largest tile with >=2 steps
        if ok(d) and B // d >= 2:
            return d
    return B


def _supports_weight_single_buffering():
    # Capability probe only (narrow except, per review): Buffered(1) halves
    # resident weight VMEM (matters on v7x: 64 MiB physical VMEM).
    try:
        pl.BlockSpec((8, 128), lambda *_: (0, 0), pipeline_mode=pl.Buffered(1))
        return True
    except (AttributeError, TypeError, ValueError):
        return False


def block_forward(x, params, *, t_h, t_w, s_h, s_w, num_heads,
                  batch_tile=None, compute_dtype=jnp.bfloat16,
                  vmem_limit_bytes=48 * 1024 * 1024):
    B, N, C = x.shape
    n_t, n_s = t_h * t_w, s_h * s_w
    assert N == n_t + n_s
    assert C % num_heads == 0
    hidden = params['fc1_w'].shape[1]

    bt = _pick_batch_tile(B, N) if batch_tile is None else batch_tile
    assert B % bt == 0
    assert (bt * N) % 8 == 0 or bt == B
    grid = (B // bt,)

    wdt = compute_dtype
    f32 = jnp.float32

    # Weights in compute dtype (bf16 fast path), biases / LN params in f32 as
    # (1, D) rows (single sublane-broadcast load, added once on the full slab).
    wqkv = params['qkv_w'].astype(wdt)                 # (C, 3C) fused
    proj_w = params['proj_w'].astype(wdt)              # (C, C)
    fc1_w = params['fc1_w'].astype(wdt)                # (C, hidden)
    fc2_w = params['fc2_w'].astype(wdt)                # (hidden, C)

    ln1_w = params['ln1_w'].reshape(1, C).astype(f32)
    ln1_b = params['ln1_b'].reshape(1, C).astype(f32)
    ln2_w = params['ln2_w'].reshape(1, C).astype(f32)
    ln2_b = params['ln2_b'].reshape(1, C).astype(f32)
    proj_b = params['proj_b'].reshape(1, C).astype(f32)
    fc1_b = params['fc1_b'].reshape(1, hidden).astype(f32)
    fc2_b = params['fc2_b'].reshape(1, C).astype(f32)

    kernel = functools.partial(
        block_kernel, num_heads=num_heads, n_t=n_t, n_s=n_s,
        batch_tile=bt, compute_dtype=compute_dtype,
        fast_math=(compute_dtype != jnp.float32))

    single_buf = _supports_weight_single_buffering()

    def wspec(shape):
        nd = len(shape)
        if single_buf:
            return pl.BlockSpec(shape, lambda *_: (0,) * nd,
                                pipeline_mode=pl.Buffered(1))
        return pl.BlockSpec(shape, lambda *_: (0,) * nd)

    in_specs = [
        pl.BlockSpec((bt * N, C), lambda g: (g, 0)),     # x slab
        wspec((1, C)), wspec((1, C)),                    # ln1 w, b
        wspec((C, 3 * C)),                               # fused qkv weight
        wspec((C, C)), wspec((1, C)),                    # proj w, b
        wspec((1, C)), wspec((1, C)),                    # ln2 w, b
        wspec((C, hidden)), wspec((1, hidden)),          # fc1 w, b
        wspec((hidden, C)), wspec((1, C)),               # fc2 w, b
    ]

    out2d = pl.pallas_call(
        kernel,
        out_shape=jax.ShapeDtypeStruct((B * N, C), x.dtype),
        grid_spec=pltpu.PrefetchScalarGridSpec(
            num_scalar_prefetch=0,
            grid=grid,
            in_specs=in_specs,
            out_specs=pl.BlockSpec((bt * N, C), lambda g: (g, 0)),
            scratch_shapes=[pltpu.VMEM((bt * N, C), compute_dtype)],  # ctx buffer
        ),
        compiler_params=pltpu.CompilerParams(
            # batch-tile axis is fully independent -> shard across v7x's 2 TCs
            dimension_semantics=("parallel",),
            vmem_limit_bytes=vmem_limit_bytes,
        ),
    )(x.reshape(B * N, C), ln1_w, ln1_b, wqkv, proj_w, proj_b,
      ln2_w, ln2_b, fc1_w, fc1_b, fc2_w, fc2_b)

    return out2d.reshape(B, N, C)


def init_params(key, dim, num_heads, mlp_ratio=4.0):
    hidden = int(dim * mlp_ratio)
    keys = jax.random.split(key, 8)

    def lin(k, fan_in, fan_out):
        # stored as (in, out) so the kernel does x @ W
        return (jax.random.normal(k, (fan_in, fan_out), jnp.float32)
                * (1.0 / math.sqrt(fan_in)))

    return {
        'ln1_w': jnp.ones((dim,), jnp.float32),
        'ln1_b': jnp.zeros((dim,), jnp.float32),
        'qkv_w': lin(keys[0], dim, 3 * dim),            # qkv_bias=False
        'proj_w': lin(keys[1], dim, dim),
        'proj_b': jax.random.normal(keys[2], (dim,), jnp.float32) * 0.02,
        'ln2_w': jnp.ones((dim,), jnp.float32),
        'ln2_b': jnp.zeros((dim,), jnp.float32),
        'fc1_w': lin(keys[3], dim, hidden),
        'fc1_b': jax.random.normal(keys[4], (hidden,), jnp.float32) * 0.02,
        'fc2_w': lin(keys[5], hidden, dim),
        'fc2_b': jax.random.normal(keys[6], (dim,), jnp.float32) * 0.02,
    }


def block_forward_ref(x, p, *, t_h, t_w, s_h, s_w, num_heads):
    """Pure-JAX reference mirroring the PyTorch Block.forward."""
    B, N, C = x.shape
    hd = C // num_heads
    n_t, n_s = t_h * t_w, s_h * s_w
    scale = hd ** (-0.5)

    def ln(y, w, b):
        mu = y.mean(-1, keepdims=True)
        var = ((y - mu) ** 2).mean(-1, keepdims=True)
        return (y - mu) / jnp.sqrt(var + LN_EPS) * w + b

    xn = ln(x, p['ln1_w'], p['ln1_b'])
    qkv = xn @ p['qkv_w']
    qkv = qkv.reshape(B, N, 3, num_heads, hd).transpose(2, 0, 3, 1, 4)
    q, k, v = qkv[0], qkv[1], qkv[2]                       # (B, H, N, hd)
    q_mt, q_s = q[:, :, :n_t], q[:, :, n_t:]
    k_mt, v_mt = k[:, :, :n_t], v[:, :, :n_t]

    a = jax.nn.softmax(q_mt @ k_mt.swapaxes(-2, -1) * scale, axis=-1)
    x_mt = (a @ v_mt).transpose(0, 2, 1, 3).reshape(B, n_t, C)
    a = jax.nn.softmax(q_s @ k.swapaxes(-2, -1) * scale, axis=-1)
    x_s = (a @ v).transpose(0, 2, 1, 3).reshape(B, n_s, C)
    attn_out = jnp.concatenate([x_mt, x_s], axis=1) @ p['proj_w'] + p['proj_b']

    x1 = x + attn_out
    xn2 = ln(x1, p['ln2_w'], p['ln2_b'])
    h = jax.nn.gelu(xn2 @ p['fc1_w'] + p['fc1_b'], approximate=False)
    return x1 + (h @ p['fc2_w'] + p['fc2_b'])


if __name__ == "__main__":
    B, C, num_heads = 2, 32, 8
    t_h = t_w = 4
    s_h = s_w = 8
    N = t_h * t_w + s_h * s_w     # 80 tokens = 16 template + 64 search

    key = jax.random.PRNGKey(0)
    kx, kp = jax.random.split(key)
    x = jax.random.normal(kx, (B, N, C), jnp.float32)
    params = init_params(kp, C, num_heads, mlp_ratio=4.0)

    with jax.default_matmul_precision("highest"):
        ref = block_forward_ref(x, params, t_h=t_h, t_w=t_w, s_h=s_h, s_w=s_w,
                                num_heads=num_heads)
    ref = jax.block_until_ready(ref)

    # 1) exact-math f32 path, default batch_tile heuristic (bt=1 -> 2 grid steps).
    out_f32 = block_forward(x, params, t_h=t_h, t_w=t_w, s_h=s_h, s_w=s_w,
                            num_heads=num_heads, compute_dtype=jnp.float32)
    out_f32 = jax.block_until_ready(out_f32)
    assert out_f32.shape == (B, N, C)
    err = float(jnp.max(jnp.abs(out_f32 - ref)))
    assert jnp.allclose(out_f32, ref, atol=5e-4, rtol=5e-4), err

    # 2) exact-math f32 path with the whole batch fused in one tile
    #    (exercises the multi-batch-per-tile row offsets).
    out_f32b = block_forward(x, params, t_h=t_h, t_w=t_w, s_h=s_h, s_w=s_w,
                             num_heads=num_heads, compute_dtype=jnp.float32,
                             batch_tile=B)
    out_f32b = jax.block_until_ready(out_f32b)
    err_b = float(jnp.max(jnp.abs(out_f32b - ref)))
    assert jnp.allclose(out_f32b, ref, atol=5e-4, rtol=5e-4), err_b

    # 3) fast path: bf16 MXU operands / f32 accumulation, approx softmax
    #    reciprocal + tanh GELU.  Loose tolerance is a wiring sanity check;
    #    exactness is covered by the f32 runs.
    out_bf16 = block_forward(x, params, t_h=t_h, t_w=t_w, s_h=s_h, s_w=s_w,
                             num_heads=num_heads, compute_dtype=jnp.bfloat16)
    out_bf16 = jax.block_until_ready(out_bf16)
    err_bf16 = float(jnp.max(jnp.abs(out_bf16 - ref)))
    assert jnp.allclose(out_bf16, ref, atol=1.5e-1, rtol=1.5e-1), err_bf16

    print("KERNEL_OK")
</pallas_src>

<mosaic_0001>
module attributes {stable_mosaic.version = 11 : i64} {
  func.func @block_kernel(%arg0: i32, %arg1: memref<80x32xf32, #tpu.memory_space<vmem>>, %arg2: memref<1x32xf32, #tpu.memory_space<vmem>>, %arg3: memref<1x32xf32, #tpu.memory_space<vmem>>, %arg4: memref<32x96xf32, #tpu.memory_space<vmem>>, %arg5: memref<32x32xf32, #tpu.memory_space<vmem>>, %arg6: memref<1x32xf32, #tpu.memory_space<vmem>>, %arg7: memref<1x32xf32, #tpu.memory_space<vmem>>, %arg8: memref<1x32xf32, #tpu.memory_space<vmem>>, %arg9: memref<32x128xf32, #tpu.memory_space<vmem>>, %arg10: memref<1x128xf32, #tpu.memory_space<vmem>>, %arg11: memref<128x32xf32, #tpu.memory_space<vmem>>, %arg12: memref<1x32xf32, #tpu.memory_space<vmem>>, %arg13: memref<80x32xf32, #tpu.memory_space<vmem>>, %arg14: memref<80x32xf32, #tpu.memory_space<vmem>>) attributes {dimension_semantics = [#tpu.dimension_semantics<parallel>], iteration_bounds = array<i64: 2>, scalar_prefetch = 0 : i64, scratch_operands = 1 : i64, tpu.core_type = #tpu.core_type<tc>, window_params = [{transform_indices = @transform_0, window_bounds = array<i64: 80, 32>}, {pipeline_mode = #tpu.pipeline_mode<synchronous>, transform_indices = @transform_1, window_bounds = array<i64: 1, 32>}, {pipeline_mode = #tpu.pipeline_mode<synchronous>, transform_indices = @transform_2, window_bounds = array<i64: 1, 32>}, {pipeline_mode = #tpu.pipeline_mode<synchronous>, transform_indices = @transform_3, window_bounds = array<i64: 32, 96>}, {pipeline_mode = #tpu.pipeline_mode<synchronous>, transform_indices = @transform_4, window_bounds = array<i64: 32, 32>}, {pipeline_mode = #tpu.pipeline_mode<synchronous>, transform_indices = @transform_5, window_bounds = array<i64: 1, 32>}, {pipeline_mode = #tpu.pipeline_mode<synchronous>, transform_indices = @transform_6, window_bounds = array<i64: 1, 32>}, {pipeline_mode = #tpu.pipeline_mode<synchronous>, transform_indices = @transform_7, window_bounds = array<i64: 1, 32>}, {pipeline_mode = #tpu.pipeline_mode<synchronous>, transform_indices = @transform_8, window_bounds = array<i64: 32, 128>}, {pipeline_mode = #tpu.pipeline_mode<synchronous>, transform_indices = @transform_9, window_bounds = array<i64: 1, 128>}, {pipeline_mode = #tpu.pipeline_mode<synchronous>, transform_indices = @transform_10, window_bounds = array<i64: 128, 32>}, {pipeline_mode = #tpu.pipeline_mode<synchronous>, transform_indices = @transform_11, window_bounds = array<i64: 1, 32>}, {transform_indices = @transform_12, window_bounds = array<i64: 80, 32>}]} {
    %c0 = arith.constant 0 : index
    %c0_0 = arith.constant 0 : index
    %0 = vector.load %arg1[%c0, %c0_0] : memref<80x32xf32, #tpu.memory_space<vmem>>, vector<80x32xf32>
    %c0_1 = arith.constant 0 : index
    %c0_2 = arith.constant 0 : index
    %1 = vector.load %arg2[%c0_1, %c0_2] : memref<1x32xf32, #tpu.memory_space<vmem>>, vector<1x32xf32>
    %c0_3 = arith.constant 0 : index
    %c0_4 = arith.constant 0 : index
    %2 = vector.load %arg3[%c0_3, %c0_4] : memref<1x32xf32, #tpu.memory_space<vmem>>, vector<1x32xf32>
    %cst = arith.constant dense<0.000000e+00> : vector<80xf32>
    %3 = vector.multi_reduction <add>, %0, %cst [1] : vector<80x32xf32> to vector<80xf32>
    %4 = vector.shape_cast %3 : vector<80xf32> to vector<80x1xf32>
    %cst_5 = arith.constant 3.200000e+01 : f32
    %5 = vector.broadcast %cst_5 : f32 to vector<80x1xf32>
    %6 = arith.divf %4, %5 : vector<80x1xf32>
    %7 = vector.broadcast %6 : vector<80x1xf32> to vector<80x32xf32>
    %8 = arith.subf %0, %7 : vector<80x32xf32>
    %9 = arith.mulf %8, %8 : vector<80x32xf32>
    %cst_6 = arith.constant dense<0.000000e+00> : vector<80xf32>
    %10 = vector.multi_reduction <add>, %9, %cst_6 [1] : vector<80x32xf32> to vector<80xf32>
    %11 = vector.shape_cast %10 : vector<80xf32> to vector<80x1xf32>
    %cst_7 = arith.constant 3.200000e+01 : f32
    %12 = vector.broadcast %cst_7 : f32 to vector<80x1xf32>
    %13 = arith.divf %11, %12 : vector<80x1xf32>
    %14 = vector.broadcast %6 : vector<80x1xf32> to vector<80x32xf32>
    %15 = arith.subf %0, %14 : vector<80x32xf32>
    %cst_8 = arith.constant 9.99999974E-6 : f32
    %16 = vector.broadcast %cst_8 : f32 to vector<80x1xf32>
    %17 = arith.addf %13, %16 : vector<80x1xf32>
    %18 = math.rsqrt %17 : vector<80x1xf32>
    %19 = vector.broadcast %18 : vector<80x1xf32> to vector<80x32xf32>
    %20 = arith.mulf %15, %19 : vector<80x32xf32>
    %21 = vector.broadcast %1 : vector<1x32xf32> to vector<80x32xf32>
    %22 = arith.mulf %20, %21 : vector<80x32xf32>
    %23 = vector.broadcast %2 : vector<1x32xf32> to vector<80x32xf32>
    %24 = arith.addf %22, %23 : vector<80x32xf32>
    %c0_9 = arith.constant 0 : index
    %c0_10 = arith.constant 0 : index
    %25 = vector.load %arg4[%c0_9, %c0_10] : memref<32x96xf32, #tpu.memory_space<vmem>>, vector<32x96xf32>
    %cst_11 = arith.constant dense<0.000000e+00> : vector<80x96xf32>
    %26 = tpu.matmul %24, %25, %cst_11 {dimension_numbers = #tpu.dot_dimension_numbers<[1], [0], [0], [1], [0, 0, 1, 1], [], []>} : vector<80x32xf32>, vector<32x96xf32>, vector<80x96xf32> -> vector<80x96xf32>
    %27 = vector.extract_strided_slice %26 {offsets = [0, 0], sizes = [80, 32], strides = [1, 1]} : vector<80x96xf32> to vector<80x32xf32>
    %cst_12 = arith.constant 5.000000e-01 : f32
    %28 = vector.broadcast %cst_12 : f32 to vector<80x32xf32>
    %29 = arith.mulf %27, %28 : vector<80x32xf32>
    %30 = vector.extract_strided_slice %26 {offsets = [0, 64], sizes = [80, 32], strides = [1, 1]} : vector<80x96xf32> to vector<80x32xf32>
    %31 = vector.extract_strided_slice %26 {offsets = [0, 32], sizes = [80, 32], strides = [1, 1]} : vector<80x96xf32> to vector<80x32xf32>
    %32 = tpu.transpose %31, [1, 0] : vector<80x32xf32> -> vector<32x80xf32>
    %33 = vector.extract_strided_slice %32 {offsets = [0, 0], sizes = [4, 80], strides = [1, 1]} : vector<32x80xf32> to vector<4x80xf32>
    %34 = vector.extract_strided_slice %30 {offsets = [0, 0], sizes = [80, 4], strides = [1, 1]} : vector<80x32xf32> to vector<80x4xf32>
    %35 = vector.extract_strided_slice %29 {offsets = [0, 0], sizes = [16, 4], strides = [1, 1]} : vector<80x32xf32> to vector<16x4xf32>
    %36 = vector.extract_strided_slice %33 {offsets = [0, 0], sizes = [4, 16], strides = [1, 1]} : vector<4x80xf32> to vector<4x16xf32>
    %cst_13 = arith.constant dense<0.000000e+00> : vector<16x16xf32>
    %37 = tpu.matmul %35, %36, %cst_13 {dimension_numbers = #tpu.dot_dimension_numbers<[1], [0], [0], [1], [0, 0, 1, 1], [], []>} : vector<16x4xf32>, vector<4x16xf32>, vector<16x16xf32> -> vector<16x16xf32>
    %cst_14 = arith.constant dense<0xFF800000> : vector<16xf32>
    %38 = vector.multi_reduction <maximumf>, %37, %cst_14 [1] : vector<16x16xf32> to vector<16xf32>
    %39 = vector.shape_cast %38 : vector<16xf32> to vector<16x1xf32>
    %40 = vector.broadcast %39 : vector<16x1xf32> to vector<16x16xf32>
    %41 = arith.subf %37, %40 : vector<16x16xf32>
    %42 = math.exp %41 : vector<16x16xf32>
    %cst_15 = arith.constant dense<0.000000e+00> : vector<16xf32>
    %43 = vector.multi_reduction <add>, %42, %cst_15 [1] : vector<16x16xf32> to vector<16xf32>
    %44 = vector.shape_cast %43 : vector<16xf32> to vector<16x1xf32>
    %45 = vector.broadcast %44 : vector<16x1xf32> to vector<16x16xf32>
    %46 = arith.divf %42, %45 : vector<16x16xf32>
    %47 = vector.extract_strided_slice %34 {offsets = [0, 0], sizes = [16, 4], strides = [1, 1]} : vector<80x4xf32> to vector<16x4xf32>
    %cst_16 = arith.constant dense<0.000000e+00> : vector<16x4xf32>
    %48 = tpu.matmul %46, %47, %cst_16 {dimension_numbers = #tpu.dot_dimension_numbers<[1], [0], [0], [1], [0, 0, 1, 1], [], []>} : vector<16x16xf32>, vector<16x4xf32>, vector<16x4xf32> -> vector<16x4xf32>
    %c0_17 = arith.constant 0 : index
    %c0_18 = arith.constant 0 : index
    %49 = vector.load %arg14[%c0_17, %c0_18] : memref<80x32xf32, #tpu.memory_space<vmem>>, vector<16x4xf32>
    tpu.vector_store %arg14[%c0_17, %c0_18], %48 {strides = array<i32>} : memref<80x32xf32, #tpu.memory_space<vmem>>, vector<16x4xf32>,
    %50 = vector.extract_strided_slice %29 {offsets = [16, 0], sizes = [64, 4], strides = [1, 1]} : vector<80x32xf32> to vector<64x4xf32>
    %cst_19 = arith.constant dense<0.000000e+00> : vector<64x80xf32>
    %51 = tpu.matmul %50, %33, %cst_19 {dimension_numbers = #tpu.dot_dimension_numbers<[1], [0], [0], [1], [0, 0, 1, 1], [], []>} : vector<64x4xf32>, vector<4x80xf32>, vector<64x80xf32> -> vector<64x80xf32>
    %cst_20 = arith.constant dense<0xFF800000> : vector<64xf32>
    %52 = vector.multi_reduction <maximumf>, %51, %cst_20 [1] : vector<64x80xf32> to vector<64xf32>
    %53 = vector.shape_cast %52 : vector<64xf32> to vector<64x1xf32>
    %54 = vector.broadcast %53 : vector<64x1xf32> to vector<64x80xf32>
    %55 = arith.subf %51, %54 : vector<64x80xf32>
    %56 = math.exp %55 : vector<64x80xf32>
    %cst_21 = arith.constant dense<0.000000e+00> : vector<64xf32>
    %57 = vector.multi_reduction <add>, %56, %cst_21 [1] : vector<64x80xf32> to vector<64xf32>
    %58 = vector.shape_cast %57 : vector<64xf32> to vector<64x1xf32>
    %59 = vector.broadcast %58 : vector<64x1xf32> to vector<64x80xf32>
    %60 = arith.divf %56, %59 : vector<64x80xf32>
    %cst_22 = arith.constant dense<0.000000e+00> : vector<64x4xf32>
    %61 = tpu.matmul %60, %34, %cst_22 {dimension_numbers = #tpu.dot_dimension_numbers<[1], [0], [0], [1], [0, 0, 1, 1], [], []>} : vector<64x80xf32>, vector<80x4xf32>, vector<64x4xf32> -> vector<64x4xf32>
    %c16 = arith.constant 16 : index
    %c0_23 = arith.constant 0 : index
    %62 = vector.load %arg14[%c16, %c0_23] : memref<80x32xf32, #tpu.memory_space<vmem>>, vector<64x4xf32>
    tpu.vector_store %arg14[%c16, %c0_23], %61 {strides = array<i32>} : memref<80x32xf32, #tpu.memory_space<vmem>>, vector<64x4xf32>,
    %63 = vector.extract_strided_slice %32 {offsets = [4, 0], sizes = [4, 80], strides = [1, 1]} : vector<32x80xf32> to vector<4x80xf32>
    %64 = vector.extract_strided_slice %30 {offsets = [0, 4], sizes = [80, 4], strides = [1, 1]} : vector<80x32xf32> to vector<80x4xf32>
    %65 = vector.extract_strided_slice %29 {offsets = [0, 4], sizes = [16, 4], strides = [1, 1]} : vector<80x32xf32> to vector<16x4xf32>
    %66 = vector.extract_strided_slice %63 {offsets = [0, 0], sizes = [4, 16], strides = [1, 1]} : vector<4x80xf32> to vector<4x16xf32>
    %cst_24 = arith.constant dense<0.000000e+00> : vector<16x16xf32>
    %67 = tpu.matmul %65, %66, %cst_24 {dimension_numbers = #tpu.dot_dimension_numbers<[1], [0], [0], [1], [0, 0, 1, 1], [], []>} : vector<16x4xf32>, vector<4x16xf32>, vector<16x16xf32> -> vector<16x16xf32>
    %cst_25 = arith.constant dense<0xFF800000> : vector<16xf32>
    %68 = vector.multi_reduction <maximumf>, %67, %cst_25 [1] : vector<16x16xf32> to vector<16xf32>
    %69 = vector.shape_cast %68 : vector<16xf32> to vector<16x1xf32>
    %70 = vector.broadcast %69 : vector<16x1xf32> to vector<16x16xf32>
    %71 = arith.subf %67, %70 : vector<16x16xf32>
    %72 = math.exp %71 : vector<16x16xf32>
    %cst_26 = arith.constant dense<0.000000e+00> : vector<16xf32>
    %73 = vector.multi_reduction <add>, %72, %cst_26 [1] : vector<16x16xf32> to vector<16xf32>
    %74 = vector.shape_cast %73 : vector<16xf32> to vector<16x1xf32>
    %75 = vector.broadcast %74 : vector<16x1xf32> to vector<16x16xf32>
    %76 = arith.divf %72, %75 : vector<16x16xf32>
    %77 = vector.extract_strided_slice %64 {offsets = [0, 0], sizes = [16, 4], strides = [1, 1]} : vector<80x4xf32> to vector<16x4xf32>
    %cst_27 = arith.constant dense<0.000000e+00> : vector<16x4xf32>
    %78 = tpu.matmul %76, %77, %cst_27 {dimension_numbers = #tpu.dot_dimension_numbers<[1], [0], [0], [1], [0, 0, 1, 1], [], []>} : vector<16x16xf32>, vector<16x4xf32>, vector<16x4xf32> -> vector<16x4xf32>
    %c0_28 = arith.constant 0 : index
    %c4 = arith.constant 4 : index
    %79 = vector.load %arg14[%c0_28, %c4] : memref<80x32xf32, #tpu.memory_space<vmem>>, vector<16x4xf32>
    tpu.vector_store %arg14[%c0_28, %c4], %78 {strides = array<i32>} : memref<80x32xf32, #tpu.memory_space<vmem>>, vector<16x4xf32>,
    %80 = vector.extract_strided_slice %29 {offsets = [16, 4], sizes = [64, 4], strides = [1, 1]} : vector<80x32xf32> to vector<64x4xf32>
    %cst_29 = arith.constant dense<0.000000e+00> : vector<64x80xf32>
    %81 = tpu.matmul %80, %63, %cst_29 {dimension_numbers = #tpu.dot_dimension_numbers<[1], [0], [0], [1], [0, 0, 1, 1], [], []>} : vector<64x4xf32>, vector<4x80xf32>, vector<64x80xf32> -> vector<64x80xf32>
    %cst_30 = arith.constant dense<0xFF800000> : vector<64xf32>
    %82 = vector.multi_reduction <maximumf>, %81, %cst_30 [1] : vector<64x80xf32> to vector<64xf32>
    %83 = vector.shape_cast %82 : vector<64xf32> to vector<64x1xf32>
    %84 = vector.broadcast %83 : vector<64x1xf32> to vector<64x80xf32>
    %85 = arith.subf %81, %84 : vector<64x80xf32>
    %86 = math.exp %85 : vector<64x80xf32>
    %cst_31 = arith.constant dense<0.000000e+00> : vector<64xf32>
    %87 = vector.multi_reduction <add>, %86, %cst_31 [1] : vector<64x80xf32> to vector<64xf32>
    %88 = vector.shape_cast %87 : vector<64xf32> to vector<64x1xf32>
    %89 = vector.broadcast %88 : vector<64x1xf32> to vector<64x80xf32>
    %90 = arith.divf %86, %89 : vector<64x80xf32>
    %cst_32 = arith.constant dense<0.000000e+00> : vector<64x4xf32>
    %91 = tpu.matmul %90, %64, %cst_32 {dimension_numbers = #tpu.dot_dimension_numbers<[1], [0], [0], [1], [0, 0, 1, 1], [], []>} : vector<64x80xf32>, vector<80x4xf32>, vector<64x4xf32> -> vector<64x4xf32>
    %c16_33 = arith.constant 16 : index
    %c4_34 = arith.constant 4 : index
    %92 = vector.load %arg14[%c16_33, %c4_34] : memref<80x32xf32, #tpu.memory_space<vmem>>, vector<64x4xf32>
    tpu.vector_store %arg14[%c16_33, %c4_34], %91 {strides = array<i32>} : memref<80x32xf32, #tpu.memory_space<vmem>>, vector<64x4xf32>,
    %93 = vector.extract_strided_slice %32 {offsets = [8, 0], sizes = [4, 80], strides = [1, 1]} : vector<32x80xf32> to vector<4x80xf32>
    %94 = vector.extract_strided_slice %30 {offsets = [0, 8], sizes = [80, 4], strides = [1, 1]} : vector<80x32xf32> to vector<80x4xf32>
    %95 = vector.extract_strided_slice %29 {offsets = [0, 8], sizes = [16, 4], strides = [1, 1]} : vector<80x32xf32> to vector<16x4xf32>
    %96 = vector.extract_strided_slice %93 {offsets = [0, 0], sizes = [4, 16], strides = [1, 1]} : vector<4x80xf32> to vector<4x16xf32>
    %cst_35 = arith.constant dense<0.000000e+00> : vector<16x16xf32>
    %97 = tpu.matmul %95, %96, %cst_35 {dimension_numbers = #tpu.dot_dimension_numbers<[1], [0], [0], [1], [0, 0, 1, 1], [], []>} : vector<16x4xf32>, vector<4x16xf32>, vector<16x16xf32> -> vector<16x16xf32>
    %cst_36 = arith.constant dense<0xFF800000> : vector<16xf32>
    %98 = vector.multi_reduction <maximumf>, %97, %cst_36 [1] : vector<16x16xf32> to vector<16xf32>
    %99 = vector.shape_cast %98 : vector<16xf32> to vector<16x1xf32>
    %100 = vector.broadcast %99 : vector<16x1xf32> to vector<16x16xf32>
    %101 = arith.subf %97, %100 : vector<16x16xf32>
    %102 = math.exp %101 : vector<16x16xf32>
    %cst_37 = arith.constant dense<0.000000e+00> : vector<16xf32>
    %103 = vector.multi_reduction <add>, %102, %cst_37 [1] : vector<16x16xf32> to vector<16xf32>
    %104 = vector.shape_cast %103 : vector<16xf32> to vector<16x1xf32>
    %105 = vector.broadcast %104 : vector<16x1xf32> to vector<16x16xf32>
    %106 = arith.divf %102, %105 : vector<16x16xf32>
    %107 = vector.extract_strided_slice %94 {offsets = [0, 0], sizes = [16, 4], strides = [1, 1]} : vector<80x4xf32> to vector<16x4xf32>
    %cst_38 = arith.constant dense<0.000000e+00> : vector<16x4xf32>
    %108 = tpu.matmul %106, %107, %cst_38 {dimension_numbers = #tpu.dot_dimension_numbers<[1], [0], [0], [1], [0, 0, 1, 1], [], []>} : vector<16x16xf32>, vector<16x4xf32>, vector<16x4xf32> -> vector<16x4xf32>
    %c0_39 = arith.constant 0 : index
    %c8 = arith.constant 8 : index
    %109 = vector.load %arg14[%c0_39, %c8] : memref<80x32xf32, #tpu.memory_space<vmem>>, vector<16x4xf32>
    tpu.vector_store %arg14[%c0_39, %c8], %108 {strides = array<i32>} : memref<80x32xf32, #tpu.memory_space<vmem>>, vector<16x4xf32>,
    %110 = vector.extract_strided_slice %29 {offsets = [16, 8], sizes = [64, 4], strides = [1, 1]} : vector<80x32xf32> to vector<64x4xf32>
    %cst_40 = arith.constant dense<0.000000e+00> : vector<64x80xf32>
    %111 = tpu.matmul %110, %93, %cst_40 {dimension_numbers = #tpu.dot_dimension_numbers<[1], [0], [0], [1], [0, 0, 1, 1], [], []>} : vector<64x4xf32>, vector<4x80xf32>, vector<64x80xf32> -> vector<64x80xf32>
    %cst_41 = arith.constant dense<0xFF800000> : vector<64xf32>
    %112 = vector.multi_reduction <maximumf>, %111, %cst_41 [1] : vector<64x80xf32> to vector<64xf32>
    %113 = vector.shape_cast %112 : vector<64xf32> to vector<64x1xf32>
    %114 = vector.broadcast %113 : vector<64x1xf32> to vector<64x80xf32>
    %115 = arith.subf %111, %114 : vector<64x80xf32>
    %116 = math.exp %115 : vector<64x80xf32>
    %cst_42 = arith.constant dense<0.000000e+00> : vector<64xf32>
    %117 = vector.multi_reduction <add>, %116, %cst_42 [1] : vector<64x80xf32> to vector<64xf32>
    %118 = vector.shape_cast %117 : vector<64xf32> to vector<64x1xf32>
    %119 = vector.broadcast %118 : vector<64x1xf32> to vector<64x80xf32>
    %120 = arith.divf %116, %119 : vector<64x80xf32>
    %cst_43 = arith.constant dense<0.000000e+00> : vector<64x4xf32>
    %121 = tpu.matmul %120, %94, %cst_43 {dimension_numbers = #tpu.dot_dimension_numbers<[1], [0], [0], [1], [0, 0, 1, 1], [], []>} : vector<64x80xf32>, vector<80x4xf32>, vector<64x4xf32> -> vector<64x4xf32>
    %c16_44 = arith.constant 16 : index
    %c8_45 = arith.constant 8 : index
    %122 = vector.load %arg14[%c16_44, %c8_45] : memref<80x32xf32, #tpu.memory_space<vmem>>, vector<64x4xf32>
    tpu.vector_store %arg14[%c16_44, %c8_45], %121 {strides = array<i32>} : memref<80x32xf32, #tpu.memory_space<vmem>>, vector<64x4xf32>,
    %123 = vector.extract_strided_slice %32 {offsets = [12, 0], sizes = [4, 80], strides = [1, 1]} : vector<32x80xf32> to vector<4x80xf32>
    %124 = vector.extract_strided_slice %30 {offsets = [0, 12], sizes = [80, 4], strides = [1, 1]} : vector<80x32xf32> to vector<80x4xf32>
    %125 = vector.extract_strided_slice %29 {offsets = [0, 12], sizes = [16, 4], strides = [1, 1]} : vector<80x32xf32> to vector<16x4xf32>
    %126 = vector.extract_strided_slice %123 {offsets = [0, 0], sizes = [4, 16], strides = [1, 1]} : vector<4x80xf32> to vector<4x16xf32>
    %cst_46 = arith.constant dense<0.000000e+00> : vector<16x16xf32>
    %127 = tpu.matmul %125, %126, %cst_46 {dimension_numbers = #tpu.dot_dimension_numbers<[1], [0], [0], [1], [0, 0, 1, 1], [], []>} : vector<16x4xf32>, vector<4x16xf32>, vector<16x16xf32> -> vector<16x16xf32>
    %cst_47 = arith.constant dense<0xFF800000> : vector<16xf32>
    %128 = vector.multi_reduction <maximumf>, %127, %cst_47 [1] : vector<16x16xf32> to vector<16xf32>
    %129 = vector.shape_cast %128 : vector<16xf32> to vector<16x1xf32>
    %130 = vector.broadcast %129 : vector<16x1xf32> to vector<16x16xf32>
    %131 = arith.subf %127, %130 : vector<16x16xf32>
    %132 = math.exp %131 : vector<16x16xf32>
    %cst_48 = arith.constant dense<0.000000e+00> : vector<16xf32>
    %133 = vector.multi_reduction <add>, %132, %cst_48 [1] : vector<16x16xf32> to vector<16xf32>
    %134 = vector.shape_cast %133 : vector<16xf32> to vector<16x1xf32>
    %135 = vector.broadcast %134 : vector<16x1xf32> to vector<16x16xf32>
    %136 = arith.divf %132, %135 : vector<16x16xf32>
    %137 = vector.extract_strided_slice %124 {offsets = [0, 0], sizes = [16, 4], strides = [1, 1]} : vector<80x4xf32> to vector<16x4xf32>
    %cst_49 = arith.constant dense<0.000000e+00> : vector<16x4xf32>
    %138 = tpu.matmul %136, %137, %cst_49 {dimension_numbers = #tpu.dot_dimension_numbers<[1], [0], [0], [1], [0, 0, 1, 1], [], []>} : vector<16x16xf32>, vector<16x4xf32>, vector<16x4xf32> -> vector<16x4xf32>
    %c0_50 = arith.constant 0 : index
    %c12 = arith.constant 12 : index
    %139 = vector.load %arg14[%c0_50, %c12] : memref<80x32xf32, #tpu.memory_space<vmem>>, vector<16x4xf32>
    tpu.vector_store %arg14[%c0_50, %c12], %138 {strides = array<i32>} : memref<80x32xf32, #tpu.memory_space<vmem>>, vector<16x4xf32>,
    %140 = vector.extract_strided_slice %29 {offsets = [16, 12], sizes = [64, 4], strides = [1, 1]} : vector<80x32xf32> to vector<64x4xf32>
    %cst_51 = arith.constant dense<0.000000e+00> : vector<64x80xf32>
    %141 = tpu.matmul %140, %123, %cst_51 {dimension_numbers = #tpu.dot_dimension_numbers<[1], [0], [0], [1], [0, 0, 1, 1], [], []>} : vector<64x4xf32>, vector<4x80xf32>, vector<64x80xf32> -> vector<64x80xf32>
    %cst_52 = arith.constant dense<0xFF800000> : vector<64xf32>
    %142 = vector.multi_reduction <maximumf>, %141, %cst_52 [1] : vector<64x80xf32> to vector<64xf32>
    %143 = vector.shape_cast %142 : vector<64xf32> to vector<64x1xf32>
    %144 = vector.broadcast %143 : vector<64x1xf32> to vector<64x80xf32>
    %145 = arith.subf %141, %144 : vector<64x80xf32>
    %146 = math.exp %145 : vector<64x80xf32>
    %cst_53 = arith.constant dense<0.000000e+00> : vector<64xf32>
    %147 = vector.multi_reduction <add>, %146, %cst_53 [1] : vector<64x80xf32> to vector<64xf32>
    %148 = vector.shape_cast %147 : vector<64xf32> to vector<64x1xf32>
    %149 = vector.broadcast %148 : vector<64x1xf32> to vector<64x80xf32>
    %150 = arith.divf %146, %149 : vector<64x80xf32>
    %cst_54 = arith.constant dense<0.000000e+00> : vector<64x4xf32>
    %151 = tpu.matmul %150, %124, %cst_54 {dimension_numbers = #tpu.dot_dimension_numbers<[1], [0], [0], [1], [0, 0, 1, 1], [], []>} : vector<64x80xf32>, vector<80x4xf32>, vector<64x4xf32> -> vector<64x4xf32>
    %c16_55 = arith.constant 16 : index
    %c12_56 = arith.constant 12 : index
    %152 = vector.load %arg14[%c16_55, %c12_56] : memref<80x32xf32, #tpu.memory_space<vmem>>, vector<64x4xf32>
    tpu.vector_store %arg14[%c16_55, %c12_56], %151 {strides = array<i32>} : memref<80x32xf32, #tpu.memory_space<vmem>>, vector<64x4xf32>,
    %153 = vector.extract_strided_slice %32 {offsets = [16, 0], sizes = [4, 80], strides = [1, 1]} : vector<32x80xf32> to vector<4x80xf32>
    %154 = vector.extract_strided_slice %30 {offsets = [0, 16], sizes = [80, 4], strides = [1, 1]} : vector<80x32xf32> to vector<80x4xf32>
    %155 = vector.extract_strided_slice %29 {offsets = [0, 16], sizes = [16, 4], strides = [1, 1]} : vector<80x32xf32> to vector<16x4xf32>
    %156 = vector.extract_strided_slice %153 {offsets = [0, 0], sizes = [4, 16], strides = [1, 1]} : vector<4x80xf32> to vector<4x16xf32>
    %cst_57 = arith.constant dense<0.000000e+00> : vector<16x16xf32>
    %157 = tpu.matmul %155, %156, %cst_57 {dimension_numbers = #tpu.dot_dimension_numbers<[1], [0], [0], [1], [0, 0, 1, 1], [], []>} : vector<16x4xf32>, vector<4x16xf32>, vector<16x16xf32> -> vector<16x16xf32>
    %cst_58 = arith.constant dense<0xFF800000> : vector<16xf32>
    %158 = vector.multi_reduction <maximumf>, %157, %cst_58 [1] : vector<16x16xf32> to vector<16xf32>
    %159 = vector.shape_cast %158 : vector<16xf32> to vector<16x1xf32>
    %160 = vector.broadcast %159 : vector<16x1xf32> to vector<16x16xf32>
    %161 = arith.subf %157, %160 : vector<16x16xf32>
    %162 = math.exp %161 : vector<16x16xf32>
    %cst_59 = arith.constant dense<0.000000e+00> : vector<16xf32>
    %163 = vector.multi_reduction <add>, %162, %cst_59 [1] : vector<16x16xf32> to vector<16xf32>
    %164 = vector.shape_cast %163 : vector<16xf32> to vector<16x1xf32>
    %165 = vector.broadcast %164 : vector<16x1xf32> to vector<16x16xf32>
    %166 = arith.divf %162, %165 : vector<16x16xf32>
    %167 = vector.extract_strided_slice %154 {offsets = [0, 0], sizes = [16, 4], strides = [1, 1]} : vector<80x4xf32> to vector<16x4xf32>
    %cst_60 = arith.constant dense<0.000000e+00> : vector<16x4xf32>
    %168 = tpu.matmul %166, %167, %cst_60 {dimension_numbers = #tpu.dot_dimension_numbers<[1], [0], [0], [1], [0, 0, 1, 1], [], []>} : vector<16x16xf32>, vector<16x4xf32>, vector<16x4xf32> -> vector<16x4xf32>
    %c0_61 = arith.constant 0 : index
    %c16_62 = arith.constant 16 : index
    %169 = vector.load %arg14[%c0_61, %c16_62] : memref<80x32xf32, #tpu.memory_space<vmem>>, vector<16x4xf32>
    tpu.vector_store %arg14[%c0_61, %c16_62], %168 {strides = array<i32>} : memref<80x32xf32, #tpu.memory_space<vmem>>, vector<16x4xf32>,
    %170 = vector.extract_strided_slice %29 {offsets = [16, 16], sizes = [64, 4], strides = [1, 1]} : vector<80x32xf32> to vector<64x4xf32>
    %cst_63 = arith.constant dense<0.000000e+00> : vector<64x80xf32>
    %171 = tpu.matmul %170, %153, %cst_63 {dimension_numbers = #tpu.dot_dimension_numbers<[1], [0], [0], [1], [0, 0, 1, 1], [], []>} : vector<64x4xf32>, vector<4x80xf32>, vector<64x80xf32> -> vector<64x80xf32>
    %cst_64 = arith.constant dense<0xFF800000> : vector<64xf32>
    %172 = vector.multi_reduction <maximumf>, %171, %cst_64 [1] : vector<64x80xf32> to vector<64xf32>
    %173 = vector.shape_cast %172 : vector<64xf32> to vector<64x1xf32>
    %174 = vector.broadcast %173 : vector<64x1xf32> to vector<64x80xf32>
    %175 = arith.subf %171, %174 : vector<64x80xf32>
    %176 = math.exp %175 : vector<64x80xf32>
    %cst_65 = arith.constant dense<0.000000e+00> : vector<64xf32>
    %177 = vector.multi_reduction <add>, %176, %cst_65 [1] : vector<64x80xf32> to vector<64xf32>
    %178 = vector.shape_cast %177 : vector<64xf32> to vector<64x1xf32>
    %179 = vector.broadcast %178 : vector<64x1xf32> to vector<64x80xf32>
    %180 = arith.divf %176, %179 : vector<64x80xf32>
    %cst_66 = arith.constant dense<0.000000e+00> : vector<64x4xf32>
    %181 = tpu.matmul %180, %154, %cst_66 {dimension_numbers = #tpu.dot_dimension_numbers<[1], [0], [0], [1], [0, 0, 1, 1], [], []>} : vector<64x80xf32>, vector<80x4xf32>, vector<64x4xf32> -> vector<64x4xf32>
    %c16_67 = arith.constant 16 : index
    %c16_68 = arith.constant 16 : index
    %182 = vector.load %arg14[%c16_67, %c16_68] : memref<80x32xf32, #tpu.memory_space<vmem>>, vector<64x4xf32>
    tpu.vector_store %arg14[%c16_67, %c16_68], %181 {strides = array<i32>} : memref<80x32xf32, #tpu.memory_space<vmem>>, vector<64x4xf32>,
    %183 = vector.extract_strided_slice %32 {offsets = [20, 0], sizes = [4, 80], strides = [1, 1]} : vector<32x80xf32> to vector<4x80xf32>
    %184 = vector.extract_strided_slice %30 {offsets = [0, 20], sizes = [80, 4], strides = [1, 1]} : vector<80x32xf32> to vector<80x4xf32>
    %185 = vector.extract_strided_slice %29 {offsets = [0, 20], sizes = [16, 4], strides = [1, 1]} : vector<80x32xf32> to vector<16x4xf32>
    %186 = vector.extract_strided_slice %183 {offsets = [0, 0], sizes = [4, 16], strides = [1, 1]} : vector<4x80xf32> to vector<4x16xf32>
    %cst_69 = arith.constant dense<0.000000e+00> : vector<16x16xf32>
    %187 = tpu.matmul %185, %186, %cst_69 {dimension_numbers = #tpu.dot_dimension_numbers<[1], [0], [0], [1], [0, 0, 1, 1], [], []>} : vector<16x4xf32>, vector<4x16xf32>, vector<16x16xf32> -> vector<16x16xf32>
    %cst_70 = arith.constant dense<0xFF800000> : vector<16xf32>
    %188 = vector.multi_reduction <maximumf>, %187, %cst_70 [1] : vector<16x16xf32> to vector<16xf32>
    %189 = vector.shape_cast %188 : vector<16xf32> to vector<16x1xf32>
    %190 = vector.broadcast %189 : vector<16x1xf32> to vector<16x16xf32>
    %191 = arith.subf %187, %190 : vector<16x16xf32>
    %192 = math.exp %191 : vector<16x16xf32>
    %cst_71 = arith.constant dense<0.000000e+00> : vector<16xf32>
    %193 = vector.multi_reduction <add>, %192, %cst_71 [1] : vector<16x16xf32> to vector<16xf32>
    %194 = vector.shape_cast %193 : vector<16xf32> to vector<16x1xf32>
    %195 = vector.broadcast %194 : vector<16x1xf32> to vector<16x16xf32>
    %196 = arith.divf %192, %195 : vector<16x16xf32>
    %197 = vector.extract_strided_slice %184 {offsets = [0, 0], sizes = [16, 4], strides = [1, 1]} : vector<80x4xf32> to vector<16x4xf32>
    %cst_72 = arith.constant dense<0.000000e+00> : vector<16x4xf32>
    %198 = tpu.matmul %196, %197, %cst_72 {dimension_numbers = #tpu.dot_dimension_numbers<[1], [0], [0], [1], [0, 0, 1, 1], [], []>} : vector<16x16xf32>, vector<16x4xf32>, vector<16x4xf32> -> vector<16x4xf32>
    %c0_73 = arith.constant 0 : index
    %c20 = arith.constant 20 : index
    %199 = vector.load %arg14[%c0_73, %c20] : memref<80x32xf32, #tpu.memory_space<vmem>>, vector<16x4xf32>
    tpu.vector_store %arg14[%c0_73, %c20], %198 {strides = array<i32>} : memref<80x32xf32, #tpu.memory_space<vmem>>, vector<16x4xf32>,
    %200 = vector.extract_strided_slice %29 {offsets = [16, 20], sizes = [64, 4], strides = [1, 1]} : vector<80x32xf32> to vector<64x4xf32>
    %cst_74 = arith.constant dense<0.000000e+00> : vector<64x80xf32>
    %201 = tpu.matmul %200, %183, %cst_74 {dimension_numbers = #tpu.dot_dimension_numbers<[1], [0], [0], [1], [0, 0, 1, 1], [], []>} : vector<64x4xf32>, vector<4x80xf32>, vector<64x80xf32> -> vector<64x80xf32>
    %cst_75 = arith.constant dense<0xFF800000> : vector<64xf32>
    %202 = vector.multi_reduction <maximumf>, %201, %cst_75 [1] : vector<64x80xf32> to vector<64xf32>
    %203 = vector.shape_cast %202 : vector<64xf32> to vector<64x1xf32>
    %204 = vector.broadcast %203 : vector<64x1xf32> to vector<64x80xf32>
    %205 = arith.subf %201, %204 : vector<64x80xf32>
    %206 = math.exp %205 : vector<64x80xf32>
    %cst_76 = arith.constant dense<0.000000e+00> : vector<64xf32>
    %207 = vector.multi_reduction <add>, %206, %cst_76 [1] : vector<64x80xf32> to vector<64xf32>
    %208 = vector.shape_cast %207 : vector<64xf32> to vector<64x1xf32>
    %209 = vector.broadcast %208 : vector<64x1xf32> to vector<64x80xf32>
    %210 = arith.divf %206, %209 : vector<64x80xf32>
    %cst_77 = arith.constant dense<0.000000e+00> : vector<64x4xf32>
    %211 = tpu.matmul %210, %184, %cst_77 {dimension_numbers = #tpu.dot_dimension_numbers<[1], [0], [0], [1], [0, 0, 1, 1], [], []>} : vector<64x80xf32>, vector<80x4xf32>, vector<64x4xf32> -> vector<64x4xf32>
    %c16_78 = arith.constant 16 : index
    %c20_79 = arith.constant 20 : index
    %212 = vector.load %arg14[%c16_78, %c20_79] : memref<80x32xf32, #tpu.memory_space<vmem>>, vector<64x4xf32>
    tpu.vector_store %arg14[%c16_78, %c20_79], %211 {strides = array<i32>} : memref<80x32xf32, #tpu.memory_space<vmem>>, vector<64x4xf32>,
    %213 = vector.extract_strided_slice %32 {offsets = [24, 0], sizes = [4, 80], strides = [1, 1]} : vector<32x80xf32> to vector<4x80xf32>
    %214 = vector.extract_strided_slice %30 {offsets = [0, 24], sizes = [80, 4], strides = [1, 1]} : vector<80x32xf32> to vector<80x4xf32>
    %215 = vector.extract_strided_slice %29 {offsets = [0, 24], sizes = [16, 4], strides = [1, 1]} : vector<80x32xf32> to vector<16x4xf32>
    %216 = vector.extract_strided_slice %213 {offsets = [0, 0], sizes = [4, 16], strides = [1, 1]} : vector<4x80xf32> to vector<4x16xf32>
    %cst_80 = arith.constant dense<0.000000e+00> : vector<16x16xf32>
    %217 = tpu.matmul %215, %216, %cst_80 {dimension_numbers = #tpu.dot_dimension_numbers<[1], [0], [0], [1], [0, 0, 1, 1], [], []>} : vector<16x4xf32>, vector<4x16xf32>, vector<16x16xf32> -> vector<16x16xf32>
    %cst_81 = arith.constant dense<0xFF800000> : vector<16xf32>
    %218 = vector.multi_reduction <maximumf>, %217, %cst_81 [1] : vector<16x16xf32> to vector<16xf32>
    %219 = vector.shape_cast %218 : vector<16xf32> to vector<16x1xf32>
    %220 = vector.broadcast %219 : vector<16x1xf32> to vector<16x16xf32>
    %221 = arith.subf %217, %220 : vector<16x16xf32>
    %222 = math.exp %221 : vector<16x16xf32>
    %cst_82 = arith.constant dense<0.000000e+00> : vector<16xf32>
    %223 = vector.multi_reduction <add>, %222, %cst_82 [1] : vector<16x16xf32> to vector<16xf32>
    %224 = vector.shape_cast %223 : vector<16xf32> to vector<16x1xf32>
    %225 = vector.broadcast %224 : vector<16x1xf32> to vector<16x16xf32>
    %226 = arith.divf %222, %225 : vector<16x16xf32>
    %227 = vector.extract_strided_slice %214 {offsets = [0, 0], sizes = [16, 4], strides = [1, 1]} : vector<80x4xf32> to vector<16x4xf32>
    %cst_83 = arith.constant dense<0.000000e+00> : vector<16x4xf32>
    %228 = tpu.matmul %226, %227, %cst_83 {dimension_numbers = #tpu.dot_dimension_numbers<[1], [0], [0], [1], [0, 0, 1, 1], [], []>} : vector<16x16xf32>, vector<16x4xf32>, vector<16x4xf32> -> vector<16x4xf32>
    %c0_84 = arith.constant 0 : index
    %c24 = arith.constant 24 : index
    %229 = vector.load %arg14[%c0_84, %c24] : memref<80x32xf32, #tpu.memory_space<vmem>>, vector<16x4xf32>
    tpu.vector_store %arg14[%c0_84, %c24], %228 {strides = array<i32>} : memref<80x32xf32, #tpu.memory_space<vmem>>, vector<16x4xf32>,
    %230 = vector.extract_strided_slice %29 {offsets = [16, 24], sizes = [64, 4], strides = [1, 1]} : vector<80x32xf32> to vector<64x4xf32>
    %cst_85 = arith.constant dense<0.000000e+00> : vector<64x80xf32>
    %231 = tpu.matmul %230, %213, %cst_85 {dimension_numbers = #tpu.dot_dimension_numbers<[1], [0], [0], [1], [0, 0, 1, 1], [], []>} : vector<64x4xf32>, vector<4x80xf32>, vector<64x80xf32> -> vector<64x80xf32>
    %cst_86 = arith.constant dense<0xFF800000> : vector<64xf32>
    %232 = vector.multi_reduction <maximumf>, %231, %cst_86 [1] : vector<64x80xf32> to vector<64xf32>
    %233 = vector.shape_cast %232 : vector<64xf32> to vector<64x1xf32>
    %234 = vector.broadcast %233 : vector<64x1xf32> to vector<64x80xf32>
    %235 = arith.subf %231, %234 : vector<64x80xf32>
    %236 = math.exp %235 : vector<64x80xf32>
    %cst_87 = arith.constant dense<0.000000e+00> : vector<64xf32>
    %237 = vector.multi_reduction <add>, %236, %cst_87 [1] : vector<64x80xf32> to vector<64xf32>
    %238 = vector.shape_cast %237 : vector<64xf32> to vector<64x1xf32>
    %239 = vector.broadcast %238 : vector<64x1xf32> to vector<64x80xf32>
    %240 = arith.divf %236, %239 : vector<64x80xf32>
    %cst_88 = arith.constant dense<0.000000e+00> : vector<64x4xf32>
    %241 = tpu.matmul %240, %214, %cst_88 {dimension_numbers = #tpu.dot_dimension_numbers<[1], [0], [0], [1], [0, 0, 1, 1], [], []>} : vector<64x80xf32>, vector<80x4xf32>, vector<64x4xf32> -> vector<64x4xf32>
    %c16_89 = arith.constant 16 : index
    %c24_90 = arith.constant 24 : index
    %242 = vector.load %arg14[%c16_89, %c24_90] : memref<80x32xf32, #tpu.memory_space<vmem>>, vector<64x4xf32>
    tpu.vector_store %arg14[%c16_89, %c24_90], %241 {strides = array<i32>} : memref<80x32xf32, #tpu.memory_space<vmem>>, vector<64x4xf32>,
    %243 = vector.extract_strided_slice %32 {offsets = [28, 0], sizes = [4, 80], strides = [1, 1]} : vector<32x80xf32> to vector<4x80xf32>
    %244 = vector.extract_strided_slice %30 {offsets = [0, 28], sizes = [80, 4], strides = [1, 1]} : vector<80x32xf32> to vector<80x4xf32>
    %245 = vector.extract_strided_slice %29 {offsets = [0, 28], sizes = [16, 4], strides = [1, 1]} : vector<80x32xf32> to vector<16x4xf32>
    %246 = vector.extract_strided_slice %243 {offsets = [0, 0], sizes = [4, 16], strides = [1, 1]} : vector<4x80xf32> to vector<4x16xf32>
    %cst_91 = arith.constant dense<0.000000e+00> : vector<16x16xf32>
    %247 = tpu.matmul %245, %246, %cst_91 {dimension_numbers = #tpu.dot_dimension_numbers<[1], [0], [0], [1], [0, 0, 1, 1], [], []>} : vector<16x4xf32>, vector<4x16xf32>, vector<16x16xf32> -> vector<16x16xf32>
    %cst_92 = arith.constant dense<0xFF800000> : vector<16xf32>
    %248 = vector.multi_reduction <maximumf>, %247, %cst_92 [1] : vector<16x16xf32> to vector<16xf32>
    %249 = vector.shape_cast %248 : vector<16xf32> to vector<16x1xf32>
    %250 = vector.broadcast %249 : vector<16x1xf32> to vector<16x16xf32>
    %251 = arith.subf %247, %250 : vector<16x16xf32>
    %252 = math.exp %251 : vector<16x16xf32>
    %cst_93 = arith.constant dense<0.000000e+00> : vector<16xf32>
    %253 = vector.multi_reduction <add>, %252, %cst_93 [1] : vector<16x16xf32> to vector<16xf32>
    %254 = vector.shape_cast %253 : vector<16xf32> to vector<16x1xf32>
    %255 = vector.broadcast %254 : vector<16x1xf32> to vector<16x16xf32>
    %256 = arith.divf %252, %255 : vector<16x16xf32>
    %257 = vector.extract_strided_slice %244 {offsets = [0, 0], sizes = [16, 4], strides = [1, 1]} : vector<80x4xf32> to vector<16x4xf32>
    %cst_94 = arith.constant dense<0.000000e+00> : vector<16x4xf32>
    %258 = tpu.matmul %256, %257, %cst_94 {dimension_numbers = #tpu.dot_dimension_numbers<[1], [0], [0], [1], [0, 0, 1, 1], [], []>} : vector<16x16xf32>, vector<16x4xf32>, vector<16x4xf32> -> vector<16x4xf32>
    %c0_95 = arith.constant 0 : index
    %c28 = arith.constant 28 : index
    %259 = vector.load %arg14[%c0_95, %c28] : memref<80x32xf32, #tpu.memory_space<vmem>>, vector<16x4xf32>
    tpu.vector_store %arg14[%c0_95, %c28], %258 {strides = array<i32>} : memref<80x32xf32, #tpu.memory_space<vmem>>, vector<16x4xf32>,
    %260 = vector.extract_strided_slice %29 {offsets = [16, 28], sizes = [64, 4], strides = [1, 1]} : vector<80x32xf32> to vector<64x4xf32>
    %cst_96 = arith.constant dense<0.000000e+00> : vector<64x80xf32>
    %261 = tpu.matmul %260, %243, %cst_96 {dimension_numbers = #tpu.dot_dimension_numbers<[1], [0], [0], [1], [0, 0, 1, 1], [], []>} : vector<64x4xf32>, vector<4x80xf32>, vector<64x80xf32> -> vector<64x80xf32>
    %cst_97 = arith.constant dense<0xFF800000> : vector<64xf32>
    %262 = vector.multi_reduction <maximumf>, %261, %cst_97 [1] : vector<64x80xf32> to vector<64xf32>
    %263 = vector.shape_cast %262 : vector<64xf32> to vector<64x1xf32>
    %264 = vector.broadcast %263 : vector<64x1xf32> to vector<64x80xf32>
    %265 = arith.subf %261, %264 : vector<64x80xf32>
    %266 = math.exp %265 : vector<64x80xf32>
    %cst_98 = arith.constant dense<0.000000e+00> : vector<64xf32>
    %267 = vector.multi_reduction <add>, %266, %cst_98 [1] : vector<64x80xf32> to vector<64xf32>
    %268 = vector.shape_cast %267 : vector<64xf32> to vector<64x1xf32>
    %269 = vector.broadcast %268 : vector<64x1xf32> to vector<64x80xf32>
    %270 = arith.divf %266, %269 : vector<64x80xf32>
    %cst_99 = arith.constant dense<0.000000e+00> : vector<64x4xf32>
    %271 = tpu.matmul %270, %244, %cst_99 {dimension_numbers = #tpu.dot_dimension_numbers<[1], [0], [0], [1], [0, 0, 1, 1], [], []>} : vector<64x80xf32>, vector<80x4xf32>, vector<64x4xf32> -> vector<64x4xf32>
    %c16_100 = arith.constant 16 : index
    %c28_101 = arith.constant 28 : index
    %272 = vector.load %arg14[%c16_100, %c28_101] : memref<80x32xf32, #tpu.memory_space<vmem>>, vector<64x4xf32>
    tpu.vector_store %arg14[%c16_100, %c28_101], %271 {strides = array<i32>} : memref<80x32xf32, #tpu.memory_space<vmem>>, vector<64x4xf32>,
    %c0_102 = arith.constant 0 : index
    %c0_103 = arith.constant 0 : index
    %273 = vector.load %arg14[%c0_102, %c0_103] : memref<80x32xf32, #tpu.memory_space<vmem>>, vector<80x32xf32>
    %c0_104 = arith.constant 0 : index
    %c0_105 = arith.constant 0 : index
    %274 = vector.load %arg5[%c0_104, %c0_105] : memref<32x32xf32, #tpu.memory_space<vmem>>, vector<32x32xf32>
    %cst_106 = arith.constant dense<0.000000e+00> : vector<80x32xf32>
    %275 = tpu.matmul %273, %274, %cst_106 {dimension_numbers = #tpu.dot_dimension_numbers<[1], [0], [0], [1], [0, 0, 1, 1], [], []>} : vector<80x32xf32>, vector<32x32xf32>, vector<80x32xf32> -> vector<80x32xf32>
    %276 = arith.addf %0, %275 : vector<80x32xf32>
    %c0_107 = arith.constant 0 : index
    %c0_108 = arith.constant 0 : index
    %277 = vector.load %arg6[%c0_107, %c0_108] : memref<1x32xf32, #tpu.memory_space<vmem>>, vector<1x32xf32>
    %278 = vector.broadcast %277 : vector<1x32xf32> to vector<80x32xf32>
    %279 = arith.addf %276, %278 : vector<80x32xf32>
    %c0_109 = arith.constant 0 : index
    %c0_110 = arith.constant 0 : index
    %280 = vector.load %arg7[%c0_109, %c0_110] : memref<1x32xf32, #tpu.memory_space<vmem>>, vector<1x32xf32>
    %c0_111 = arith.constant 0 : index
    %c0_112 = arith.constant 0 : index
    %281 = vector.load %arg8[%c0_111, %c0_112] : memref<1x32xf32, #tpu.memory_space<vmem>>, vector<1x32xf32>
    %cst_113 = arith.constant dense<0.000000e+00> : vector<80xf32>
    %282 = vector.multi_reduction <add>, %279, %cst_113 [1] : vector<80x32xf32> to vector<80xf32>
    %283 = vector.shape_cast %282 : vector<80xf32> to vector<80x1xf32>
    %cst_114 = arith.constant 3.200000e+01 : f32
    %284 = vector.broadcast %cst_114 : f32 to vector<80x1xf32>
    %285 = arith.divf %283, %284 : vector<80x1xf32>
    %286 = vector.broadcast %285 : vector<80x1xf32> to vector<80x32xf32>
    %287 = arith.subf %279, %286 : vector<80x32xf32>
    %288 = arith.mulf %287, %287 : vector<80x32xf32>
    %cst_115 = arith.constant dense<0.000000e+00> : vector<80xf32>
    %289 = vector.multi_reduction <add>, %288, %cst_115 [1] : vector<80x32xf32> to vector<80xf32>
    %290 = vector.shape_cast %289 : vector<80xf32> to vector<80x1xf32>
    %cst_116 = arith.constant 3.200000e+01 : f32
    %291 = vector.broadcast %cst_116 : f32 to vector<80x1xf32>
    %292 = arith.divf %290, %291 : vector<80x1xf32>
    %293 = vector.broadcast %285 : vector<80x1xf32> to vector<80x32xf32>
    %294 = arith.subf %279, %293 : vector<80x32xf32>
    %cst_117 = arith.constant 9.99999974E-6 : f32
    %295 = vector.broadcast %cst_117 : f32 to vector<80x1xf32>
    %296 = arith.addf %292, %295 : vector<80x1xf32>
    %297 = math.rsqrt %296 : vector<80x1xf32>
    %298 = vector.broadcast %297 : vector<80x1xf32> to vector<80x32xf32>
    %299 = arith.mulf %294, %298 : vector<80x32xf32>
    %300 = vector.broadcast %280 : vector<1x32xf32> to vector<80x32xf32>
    %301 = arith.mulf %299, %300 : vector<80x32xf32>
    %302 = vector.broadcast %281 : vector<1x32xf32> to vector<80x32xf32>
    %303 = arith.addf %301, %302 : vector<80x32xf32>
    %c0_118 = arith.constant 0 : index
    %c0_119 = arith.constant 0 : index
    %304 = vector.load %arg9[%c0_118, %c0_119] : memref<32x128xf32, #tpu.memory_space<vmem>>, vector<32x128xf32>
    %cst_120 = arith.constant dense<0.000000e+00> : vector<80x128xf32>
    %305 = tpu.matmul %303, %304, %cst_120 {dimension_numbers = #tpu.dot_dimension_numbers<[1], [0], [0], [1], [0, 0, 1, 1], [], []>} : vector<80x32xf32>, vector<32x128xf32>, vector<80x128xf32> -> vector<80x128xf32>
    %c0_121 = arith.constant 0 : index
    %c0_122 = arith.constant 0 : index
    %306 = vector.load %arg10[%c0_121, %c0_122] : memref<1x128xf32, #tpu.memory_space<vmem>>, vector<1x128xf32>
    %307 = vector.broadcast %306 : vector<1x128xf32> to vector<80x128xf32>
    %308 = arith.addf %305, %307 : vector<80x128xf32>
    %cst_123 = arith.constant 5.000000e-01 : f32
    %309 = vector.broadcast %cst_123 : f32 to vector<80x128xf32>
    %310 = arith.mulf %309, %308 : vector<80x128xf32>
    %cst_124 = arith.constant 0.707106769 : f32
    %311 = vector.broadcast %cst_124 : f32 to vector<80x128xf32>
    %312 = arith.mulf %308, %311 : vector<80x128xf32>
    %313 = math.erf %312 : vector<80x128xf32>
    %cst_125 = arith.constant 1.000000e+00 : f32
    %314 = vector.broadcast %cst_125 : f32 to vector<80x128xf32>
    %315 = arith.addf %314, %313 : vector<80x128xf32>
    %316 = arith.mulf %310, %315 : vector<80x128xf32>
    %c0_126 = arith.constant 0 : index
    %c0_127 = arith.constant 0 : index
    %317 = vector.load %arg11[%c0_126, %c0_127] : memref<128x32xf32, #tpu.memory_space<vmem>>, vector<128x32xf32>
    %cst_128 = arith.constant dense<0.000000e+00> : vector<80x32xf32>
    %318 = tpu.matmul %316, %317, %cst_128 {dimension_numbers = #tpu.dot_dimension_numbers<[1], [0], [0], [1], [0, 0, 1, 1], [], []>} : vector<80x128xf32>, vector<128x32xf32>, vector<80x32xf32> -> vector<80x32xf32>
    %c0_129 = arith.constant 0 : index
    %c0_130 = arith.constant 0 : index
    %319 = vector.load %arg12[%c0_129, %c0_130] : memref<1x32xf32, #tpu.memory_space<vmem>>, vector<1x32xf32>
    %320 = vector.broadcast %319 : vector<1x32xf32> to vector<80x32xf32>
    %321 = arith.addf %318, %320 : vector<80x32xf32>
    %322 = arith.addf %279, %321 : vector<80x32xf32>
    %c0_131 = arith.constant 0 : index
    %c0_132 = arith.constant 0 : index
    %323 = vector.load %arg13[%c0_131, %c0_132] : memref<80x32xf32, #tpu.memory_space<vmem>>, vector<80x32xf32>
    tpu.vector_store %arg13[%c0_131, %c0_132], %322 {strides = array<i32>} : memref<80x32xf32, #tpu.memory_space<vmem>>, vector<80x32xf32>,
    return
  }
  func.func @transform_0(%arg0: i32) -> (i32, i32) {
    %c0_i32 = arith.constant 0 : i32
    %c0_i32_0 = arith.constant 0 : i32
    return %arg0, %c0_i32 : i32, i32
  }
  func.func @transform_1(%arg0: i32) -> (i32, i32) {
    %c0_i32 = arith.constant 0 : i32
    %c0_i32_0 = arith.constant 0 : i32
    %c0_i32_1 = arith.constant 0 : i32
    return %c0_i32, %c0_i32_0 : i32, i32
  }
  func.func @transform_2(%arg0: i32) -> (i32, i32) {
    %c0_i32 = arith.constant 0 : i32
    %c0_i32_0 = arith.constant 0 : i32
    %c0_i32_1 = arith.constant 0 : i32
    return %c0_i32, %c0_i32_0 : i32, i32
  }
  func.func @transform_3(%arg0: i32) -> (i32, i32) {
    %c0_i32 = arith.constant 0 : i32
    %c0_i32_0 = arith.constant 0 : i32
    %c0_i32_1 = arith.constant 0 : i32
    return %c0_i32, %c0_i32_0 : i32, i32
  }
  func.func @transform_4(%arg0: i32) -> (i32, i32) {
    %c0_i32 = arith.constant 0 : i32
    %c0_i32_0 = arith.constant 0 : i32
    %c0_i32_1 = arith.constant 0 : i32
    return %c0_i32, %c0_i32_0 : i32, i32
  }
  func.func @transform_5(%arg0: i32) -> (i32, i32) {
    %c0_i32 = arith.constant 0 : i32
    %c0_i32_0 = arith.constant 0 : i32
    %c0_i32_1 = arith.constant 0 : i32
    return %c0_i32, %c0_i32_0 : i32, i32
  }
  func.func @transform_6(%arg0: i32) -> (i32, i32) {
    %c0_i32 = arith.constant 0 : i32
    %c0_i32_0 = arith.constant 0 : i32
    %c0_i32_1 = arith.constant 0 : i32
    return %c0_i32, %c0_i32_0 : i32, i32
  }
  func.func @transform_7(%arg0: i32) -> (i32, i32) {
    %c0_i32 = arith.constant 0 : i32
    %c0_i32_0 = arith.constant 0 : i32
    %c0_i32_1 = arith.constant 0 : i32
    return %c0_i32, %c0_i32_0 : i32, i32
  }
  func.func @transform_8(%arg0: i32) -> (i32, i32) {
    %c0_i32 = arith.constant 0 : i32
    %c0_i32_0 = arith.constant 0 : i32
    %c0_i32_1 = arith.constant 0 : i32
    return %c0_i32, %c0_i32_0 : i32, i32
  }
  func.func @transform_9(%arg0: i32) -> (i32, i32) {
    %c0_i32 = arith.constant 0 : i32
    %c0_i32_0 = arith.constant 0 : i32
    %c0_i32_1 = arith.constant 0 : i32
    return %c0_i32, %c0_i32_0 : i32, i32
  }
  func.func @transform_10(%arg0: i32) -> (i32, i32) {
    %c0_i32 = arith.constant 0 : i32
    %c0_i32_0 = arith.constant 0 : i32
    %c0_i32_1 = arith.constant 0 : i32
    return %c0_i32, %c0_i32_0 : i32, i32
  }
  func.func @transform_11(%arg0: i32) -> (i32, i32) {
    %c0_i32 = arith.constant 0 : i32
    %c0_i32_0 = arith.constant 0 : i32
    %c0_i32_1 = arith.constant 0 : i32
    return %c0_i32, %c0_i32_0 : i32, i32
  }
  func.func @transform_12(%arg0: i32) -> (i32, i32) {
    %c0_i32 = arith.constant 0 : i32
    %c0_i32_0 = arith.constant 0 : i32
    return %arg0, %c0_i32 : i32, i32
  }
}

</mosaic_0001>

<bundles_post_ra>
// kernel: tpu_custom_call.1
= control target key start
LH: loop header
LB: loop body
LE: loop exit
PB: predicated region body
PF: predicated region fallthrough
CT: control target
= control target key end

     0   :  { %s9711_s21 = smov 0   ;;  %s11828_s0 = inlined_call_operand.vmem [shape: f32[160,32], index: 0, kind: input, shape index: {}]   ;;  %s11829_s1 = inlined_call_operand.vmem [shape: f32[1,32], index: 1, kind: input, shape index: {}]   ;;  %s11830_s2 = inlined_call_operand.vmem [shape: f32[1,32], index: 2, kind: input, shape index: {}]   ;;  %s11831_s3 = inlined_call_operand.vmem [shape: f32[32,96], index: 3, kind: input, shape index: {}]   ;;  %s11832_s4 = inlined_call_operand.vmem [shape: f32[32,32], index: 4, kind: input, shape index: {}]   ;;  %s11833_s5 = inlined_call_operand.vmem [shape: f32[1,32], index: 5, kind: input, shape index: {}]   ;;  %s11834_s6 = inlined_call_operand.vmem [shape: f32[1,32], index: 6, kind: input, shape index: {}]   ;;  %s11835_s7 = inlined_call_operand.vmem [shape: f32[1,32], index: 7, kind: input, shape index: {}]   ;;  %s11836_s8 = inlined_call_operand.vmem [shape: f32[32,128], index: 8, kind: input, shape index: {}]   ;;  %s11837_s9 = inlined_call_operand.vmem [shape: f32[1,128], index: 9, kind: input, shape index: {}]   ;;  %s11838_s10 = inlined_call_operand.vmem [shape: f32[128,32], index: 10, kind: input, shape index: {}]   ;;  %s11839_s11 = inlined_call_operand.vmem [shape: f32[1,32], index: 11, kind: input, shape index: {}]   ;;  %s11840_s12 = inlined_call_operand.vmem [shape: f32[160,32], index: 12, kind: output, shape index: {}]  }
   0x1 LB: > { %s6772_s22 = sadd.s32 4294967295, %s9614_s21   ;;  %p6776_p0 = scmp.ge.s32.totalorder %s9614_s21, 1  ;;  %s9614_s21 = sphi %s9711_s21, %s22_s21  }
   0x2   : > { %p363_p1 = scmp.lt.s32.totalorder %s9614_s21, 3 }
   0x4   : > { %p364_p2 = pnand %p6776_p0, %p363_p1 }
   0x6   : > { %367 = sbr.rel (%p364_p2) target bundleno = 7170 (0x1c02), region = 68 }
   0xd   : > { %s405_s23 = smul.u32 10, %s6772_s22  ;;  %vm429_vm0 = vcmask 261120   ;;  %vm758_vm1 = vcmask 31744   ;;  %s9616_s25 = smov 96   ;;  %vm844_vm3 = vcmask 130048   ;;  %vm1125_vm4 = vcmask 654336  }
   0xe   : > { %vm9862_vm2 = vmpackc.low %vm758_vm1, %vm758_vm1  ;;  %s9617_s26 = smov 64   ;;  %s9618_s28 = smov 92   ;;  %vm1583_vm5 = vcmask 64544   ;;  %vm2244_vm6 = vcmask 97344   ;;  %vm2905_vm7 = vcmask 130144   ;;  %vm3566_vm8 = vcmask 162944  }
   0xf   : > { %p406_p3 = scmp.lt.s32.totalorder %s405_s23, 19  ;;  %s9619_s29 = smov 124   ;;  %vm4227_vm9 = vcmask 195744   ;;  %vm4888_vm10 = vcmask 228544   ;;  %vm5549_vm11 = vcmask 261344  }
  0x10   : > { %s9620_s30 = smov 60   ;;  %s9621_s13 = smov 88  }
  0x11   : > { %s11906_s23 = smov (!%p406_p3, %s405_s23), 19  ;;  %s9622_s14 = smov 120  }
  0x12   : > { %s6777_s24 = sshll.u32 %s11906_s23, 3  ;;  %s9623_s15 = smov 56  }
  0x13   : > { %s9727_s27 = scalar_lea.vmem %s11828_s0, %s6777_s24  ;;  %s9624_s16 = smov 84  }
  0x14   : > { %v417_v0 = vld [vmem:[%s9727_s27] sm:$0xff]  ;;  %v419_v1 = vld [vmem:[%s9727_s27 + $0x10] sm:$0xff]  ;;  %v418_v2 = vld [vmem:[%s9727_s27 + $0x8] sm:$0xff]  ;;  %s9625_s17 = smov 116   ;;  %s9626_s18 = smov 52  }
  0x15   : > { %v430_v3 = vsel %vm429_vm0, %v417_v0, 0.0  ;;  %v436_v4 = vsel %vm429_vm0, %v419_v1, 0.0  ;;  %v420_v5 = vld [vmem:[%s9727_s27 + $0x18] sm:$0xff]  ;;  %v433_v6 = vsel %vm429_vm0, %v418_v2, 0.0  ;;  %v421_v8 = vld [vmem:[%s9727_s27 + $0x20] sm:$0xff]  ;;  %v422_v9 = vld [vmem:[%s9727_s27 + $0x28] sm:$0xff] }
  0x16   : > { %431 = vadd.xlane.f32.xlu0 %v430_v3  ;;  %437 = vadd.xlane.f32.xlu1 %v436_v4  ;;  %v439_v7 = vsel %vm429_vm0, %v420_v5, 0.0  ;;  %v442_v10 = vsel %vm429_vm0, %v421_v8, 0.0  ;;  %v445_v11 = vsel %vm429_vm0, %v422_v9, 0.0  ;;  %v423_v12 = vld [vmem:[%s9727_s27 + $0x30] sm:$0xff]  ;;  %v424_v13 = vld [vmem:[%s9727_s27 + $0x38] sm:$0xff]  ;;  %v425_v16 = vld [vmem:[%s9727_s27 + $0x40] sm:$0xff] }
  0x17   : > { %v448_v14 = vsel %vm429_vm0, %v423_v12, 0.0  ;;  %v451_v15 = vsel %vm429_vm0, %v424_v13, 0.0  ;;  %v426_v17 = vld [vmem:[%s9727_s27 + $0x48] sm:$0xff]  ;;  %v454_v18 = vsel %vm429_vm0, %v425_v16, 0.0  ;;  %s9627_s19 = smov 80   ;;  %s9628_s20 = smov 112  }
  0x18   : > { %v457_v19 = vsel %vm429_vm0, %v426_v17, 0.0  ;;  %s9629_s22 = smov 48  }
  0x1a   : > { %434 = vadd.xlane.f32.xlu0 %v433_v6  ;;  %440 = vadd.xlane.f32.xlu1 %v439_v7  ;;  %v593_v6 = vld [vmem:[%s11831_s3] sm:$0xff]  ;;  %v594_v7 = vld [vmem:[%s11831_s3 + $0x8] sm:$0xff] }
  0x1e   : > { %443 = vadd.xlane.f32.xlu0 %v442_v10  ;;  %446 = vadd.xlane.f32.xlu1 %v445_v11  ;;  %v596_v10 = vld [vmem:[%s11831_s3 + $0x18] sm:$0xff] }
  0x22   : > { %449 = vadd.xlane.f32.xlu0 %v448_v14  ;;  %452 = vadd.xlane.f32.xlu1 %v451_v15 }
  0x26   : > { %455 = vadd.xlane.f32.xlu0 %v454_v18  ;;  %458 = vadd.xlane.f32.xlu1 %v457_v19 }
  0xa3   : > { %v432_v20 = vpop.xlane.xlu0 %431  ;;  %v438_v21 = vpop.xlane.xlu1 %437 }
  0xa4   : > { %v461_v22 = vmul.f32 0.03125, %v432_v20  ;;  %v463_v23 = vmul.f32 0.03125, %v438_v21 }
  0xa6   : > { %v9749_v24 = vsub.f32 %v417_v0, %v461_v22  ;;  %v9751_v25 = vsub.f32 %v419_v1, %v463_v23 }
  0xa7   : > { %v435_v26 = vpop.xlane.xlu0 %434  ;;  %v441_v27 = vpop.xlane.xlu1 %440 }
  0xa8   : > { %v462_v28 = vmul.f32 0.03125, %v435_v26  ;;  %v464_v29 = vmul.f32 0.03125, %v441_v27  ;;  %v481_v30 = vmul.f32 %v9749_v24, %v9749_v24  ;;  %v483_v31 = vmul.f32 %v9751_v25, %v9751_v25 }
  0xaa   : > { %v9757_v32 = vsub.f32 %v418_v2, %v462_v28  ;;  %v9759_v33 = vsub.f32 %v420_v5, %v464_v29  ;;  %v491_v34 = vsel %vm429_vm0, %v481_v30, 0.0  ;;  %v497_v37 = vsel %vm429_vm0, %v483_v31, 0.0 }
  0xab   : > { %492 = vadd.xlane.f32.xlu0 %v491_v34  ;;  %v444_v35 = vpop.xlane.xlu0 %443  ;;  %v447_v36 = vpop.xlane.xlu1 %446 }
  0xac   : > { %v465_v38 = vmul.f32 0.03125, %v444_v35  ;;  %v466_v39 = vmul.f32 0.03125, %v447_v36  ;;  %v482_v40 = vmul.f32 %v9757_v32, %v9757_v32  ;;  %v484_v41 = vmul.f32 %v9759_v33, %v9759_v33 }
  0xae   : > { %v9767_v42 = vsub.f32 %v421_v8, %v465_v38  ;;  %v9769_v43 = vsub.f32 %v422_v9, %v466_v39  ;;  %v494_v44 = vsel %vm429_vm0, %v482_v40, 0.0  ;;  %v500_v47 = vsel %vm429_vm0, %v484_v41, 0.0  ;;  %v595_v9 = vld [vmem:[%s11831_s3 + $0x10] sm:$0xff]  ;;  %v6779_v38 = vld [vmem:[%s11829_s1] ss:$0 sm:$0xff] }
  0xaf   : > { %498 = vadd.xlane.f32.xlu0 %v497_v37  ;;  %495 = vadd.xlane.f32.xlu1 %v494_v44  ;;  %v450_v45 = vpop.xlane.xlu0 %449  ;;  %v453_v46 = vpop.xlane.xlu1 %452  ;;  %v8234_v8 = vpack.c.bf16 %v594_v7, %v593_v6  ;;  %v8238_v11 = vpack.c.bf16 %v596_v10, %v595_v9 }
  0xb0   : > { %v467_v48 = vmul.f32 0.03125, %v450_v45  ;;  %v468_v49 = vmul.f32 0.03125, %v453_v46  ;;  %v485_v50 = vmul.f32 %v9767_v42, %v9767_v42  ;;  %v486_v51 = vmul.f32 %v9769_v43, %v9769_v43  ;;  %v6780_v46 = vld [vmem:[%s11830_s2] ss:$0 sm:$0xff] }
  0xb1   : > { %8235 = vmatprep.subr.bf16.mxu0 %v8234_v8 }
  0xb2   : > { %v9777_v52 = vsub.f32 %v423_v12, %v467_v48  ;;  %v9779_v53 = vsub.f32 %v424_v13, %v468_v49  ;;  %v503_v54 = vsel %vm429_vm0, %v485_v50, 0.0  ;;  %v506_v57 = vsel %vm429_vm0, %v486_v51, 0.0  ;;  %8237 = vmatpush3.bf16.msra.mxu0 %v8234_v8 }
  0xb3   : > { %501 = vadd.xlane.f32.xlu1 %v500_v47  ;;  %504 = vadd.xlane.f32.xlu0 %v503_v54  ;;  %v456_v55 = vpop.xlane.xlu0 %455  ;;  %v459_v56 = vpop.xlane.xlu1 %458 }
  0xb4   : > { %v469_v58 = vmul.f32 0.03125, %v456_v55  ;;  %v470_v59 = vmul.f32 0.03125, %v459_v56  ;;  %v487_v60 = vmul.f32 %v9777_v52, %v9777_v52  ;;  %v488_v61 = vmul.f32 %v9779_v53, %v9779_v53  ;;  %8239 = vmatprep.subr.bf16.mxu0 %v8238_v11 }
  0xb6   : > { %v9787_v62 = vsub.f32 %v425_v16, %v469_v58  ;;  %v9789_v63 = vsub.f32 %v426_v17, %v470_v59  ;;  %v509_v0 = vsel %vm429_vm0, %v487_v60, 0.0  ;;  %v512_v1 = vsel %vm429_vm0, %v488_v61, 0.0  ;;  %8241 = vmatpush3.bf16.msra.mxu0 %v8238_v11 }
  0xb7   : > { %507 = vadd.xlane.f32.xlu1 %v506_v57  ;;  %510 = vadd.xlane.f32.xlu0 %v509_v0 }
  0xb8   : > { %v489_v2 = vmul.f32 %v9787_v62, %v9787_v62  ;;  %v490_v3 = vmul.f32 %v9789_v63, %v9789_v63 }
  0xba   : > { %v515_v4 = vsel %vm429_vm0, %v489_v2, 0.0  ;;  %v518_v5 = vsel %vm429_vm0, %v490_v3, 0.0 }
  0xbb   : > { %513 = vadd.xlane.f32.xlu1 %v512_v1  ;;  %516 = vadd.xlane.f32.xlu0 %v515_v4 }
  0xbf   : > { %519 = vadd.xlane.f32.xlu1 %v518_v5 }
 0x138   : > { %v493_v12 = vpop.xlane.xlu0 %492 }
 0x139   : > { %v521_v13 = vmul.f32 0.03125, %v493_v12 }
 0x13b   : > { %v531_v14 = vadd.f32 1e-05, %v521_v13 }
 0x13c   : > { %v496_v15 = vpop.xlane.xlu1 %495  ;;  %v499_v16 = vpop.xlane.xlu0 %498 }
 0x13d   : > { %9218 = vrsqrt.f32 %v531_v14  ;;  %v522_v17 = vmul.f32 0.03125, %v496_v15  ;;  %v523_v18 = vmul.f32 0.03125, %v499_v16 }
 0x13f   : > { %v532_v19 = vadd.f32 1e-05, %v522_v17  ;;  %v533_v20 = vadd.f32 1e-05, %v523_v18 }
 0x140   : > { %v502_v21 = vpop.xlane.xlu1 %501  ;;  %v505_v22 = vpop.xlane.xlu0 %504 }
 0x141   : > { %9220 = vrsqrt.f32 %v532_v19  ;;  %v524_v23 = vmul.f32 0.03125, %v502_v21  ;;  %v525_v26 = vmul.f32 0.03125, %v505_v22 }
 0x142   : > { %9222 = vrsqrt.f32 %v533_v20 }
 0x143   : > { %v534_v27 = vadd.f32 1e-05, %v524_v23  ;;  %v535_v28 = vadd.f32 1e-05, %v525_v26 }
 0x144   : > { %v508_v29 = vpop.xlane.xlu1 %507  ;;  %v511_v30 = vpop.xlane.xlu0 %510 }
 0x145   : > { %9224 = vrsqrt.f32 %v534_v27  ;;  %v526_v31 = vmul.f32 0.03125, %v508_v29  ;;  %v527_v34 = vmul.f32 0.03125, %v511_v30 }
 0x146   : > { %9226 = vrsqrt.f32 %v535_v28 }
 0x147   : > { %v9219_v35 = vpop.eup %9218  ;;  %v536_v36 = vadd.f32 1e-05, %v526_v31  ;;  %v537_v37 = vadd.f32 1e-05, %v527_v34 }
 0x148   : > { %v514_v39 = vpop.xlane.xlu1 %513  ;;  %v517_v40 = vpop.xlane.xlu0 %516  ;;  %v551_v41 = vmul.f32 %v9219_v35, %v9749_v24 }
 0x149   : > { %9228 = vrsqrt.f32 %v536_v36  ;;  %v528_v44 = vmul.f32 0.03125, %v514_v39  ;;  %v529_v45 = vmul.f32 0.03125, %v517_v40 }
 0x14a   : > { %9230 = vrsqrt.f32 %v537_v37  ;;  %v567_v47 = vmul.f32 %v6779_v38, %v551_v41 }
 0x14b   : > { %v9221_v48 = vpop.eup %9220  ;;  %v538_v49 = vadd.f32 1e-05, %v528_v44  ;;  %v539_v50 = vadd.f32 1e-05, %v529_v45 }
 0x14c   : > { %v9223_v51 = vpop.eup %9222  ;;  %v520_v54 = vpop.xlane.xlu1 %519  ;;  %v583_v55 = vadd.f32 %v6780_v46, %v567_v47  ;;  %v552_v56 = vmul.f32 %v9221_v48, %v9757_v32 }
 0x14d   : > { %9232 = vrsqrt.f32 %v538_v49  ;;  %v530_v57 = vmul.f32 0.03125, %v520_v54  ;;  %v553_v24 = vmul.f32 %v9223_v51, %v9751_v25 }
 0x14e   : > { %9234 = vrsqrt.f32 %v539_v50  ;;  %7502 = vmatprep.mubr.msk.f32.mxu0 %vm429_vm0, %v583_v55  ;;  %v568_v58 = vmul.f32 %v6779_v38, %v552_v56 }
 0x14f   : > { %v9225_v59 = vpop.eup %9224  ;;  %v540_v60 = vadd.f32 1e-05, %v530_v57  ;;  %v569_v61 = vmul.f32 %v6779_v38, %v553_v24 }
 0x150   : > { %v9227_v0 = vpop.eup %9226  ;;  %v584_v1 = vadd.f32 %v6780_v46, %v568_v58  ;;  %v554_v2 = vmul.f32 %v9225_v59, %v9759_v33 }
 0x151   : > { %9236 = vrsqrt.f32 %v540_v60  ;;  %v585_v3 = vadd.f32 %v6780_v46, %v569_v61  ;;  %v555_v4 = vmul.f32 %v9227_v0, %v9767_v42 }
 0x152   : > { %7503 = vmatmul.mubr.msk.f32.vlgmr.msra.gmra.mrb[0].mxu0 %vm429_vm0, %v584_v1  ;;  %v570_v32 = vmul.f32 %v6779_v38, %v554_v2 }
 0x153   : > { %v9229_v5 = vpop.eup %9228  ;;  %7505 = vmatprep.mubr.msk.f32.mxu0 %vm429_vm0, %v585_v3  ;;  %v571_v25 = vmul.f32 %v6779_v38, %v555_v4 }
 0x154   : > { %v9231_v6 = vpop.eup %9230  ;;  %v586_v7 = vadd.f32 %v6780_v46, %v570_v32  ;;  %v556_v8 = vmul.f32 %v9229_v5, %v9769_v43 }
 0x155   : > { %v587_v9 = vadd.f32 %v6780_v46, %v571_v25  ;;  %v557_v10 = vmul.f32 %v9231_v6, %v9777_v52 }
 0x156   : > { %7506 = vmatmul.mubr.msk.f32.gmra.mrb[2].mxu0 %vm429_vm0, %v586_v7  ;;  %v572_v33 = vmul.f32 %v6779_v38, %v556_v8 }
 0x157   : > { %v9233_v11 = vpop.eup %9232  ;;  %7508 = vmatprep.mubr.msk.f32.mxu0 %vm429_vm0, %v587_v9  ;;  %v573_v42 = vmul.f32 %v6779_v38, %v557_v10 }
 0x158   : > { %v9235_v12 = vpop.eup %9234  ;;  %v588_v13 = vadd.f32 %v6780_v46, %v572_v33  ;;  %v558_v14 = vmul.f32 %v9233_v11, %v9779_v53 }
 0x159   : > { %v589_v15 = vadd.f32 %v6780_v46, %v573_v42  ;;  %v559_v16 = vmul.f32 %v9235_v12, %v9787_v62 }
 0x15a   : > { %7509 = vmatmul.mubr.msk.f32.gmra.mrb[4].mxu0 %vm429_vm0, %v588_v13  ;;  %v574_v43 = vmul.f32 %v6779_v38, %v558_v14 }
 0x15b   : > { %v9237_v17 = vpop.eup %9236  ;;  %7511 = vmatprep.mubr.msk.f32.mxu0 %vm429_vm0, %v589_v15  ;;  %v575_v52 = vmul.f32 %v6779_v38, %v559_v16 }
 0x15c   : > { %v590_v18 = vadd.f32 %v6780_v46, %v574_v43  ;;  %v560_v19 = vmul.f32 %v9237_v17, %v9789_v63 }
 0x15d   : > { %v591_v20 = vadd.f32 %v6780_v46, %v575_v52 }
 0x15e   : > { %7512 = vmatmul.mubr.msk.f32.gmra.mrb[6].mxu0 %vm429_vm0, %v590_v18  ;;  %v576_v21 = vmul.f32 %v6779_v38, %v560_v19 }
 0x15f   : > { %7514 = vmatprep.mubr.msk.f32.mxu0 %vm429_vm0, %v591_v20 }
 0x160   : > { %v592_v53 = vadd.f32 %v6780_v46, %v576_v21 }
 0x162   : > { %7515 = vmatmul.mubr.msk.f32.gmra.mrb[8].mxu0 %vm429_vm0, %v592_v53 }
 0x225   : > { %v7504_v62 = vpop.f32.mrb[0].mxu0 }
 0x226   : > { %v693_v22 = vpop.f32.mrb[1].mxu0  ;;  %v9876_v57 = vmul.f32 0.5, %v7504_v62 }
 0x227   : > { %v9837_v23 = vpack.i.bf16 %v7504_v62, %v693_v22  ;;  %v9839_v26 = vmul.f32 0.5, %v693_v22 }
 0x229   : > { %8819 = vrot.lane.b32.xlu0 %v9837_v23, %s9616_s25  ;;  %v7507_v63 = vpop.f32.mrb[2].mxu0  ;;  %7521 = vmatprep.mubr.msk.f32.mxu1 %vm758_vm1, %v9839_v26 }
 0x22a   : > { %v703_v27 = vpop.f32.mrb[3].mxu0  ;;  %v9894_v4 = vmul.f32 0.5, %v7507_v63 }
 0x22b   : > { %v9844_v28 = vpack.i.bf16 %v7507_v63, %v703_v27  ;;  %v9846_v29 = vmul.f32 0.5, %v703_v27 }
 0x22d   : > { %8824 = vrot.lane.b32.xlu1 %v9844_v28, %s9616_s25  ;;  %v7510_v30 = vpop.f32.mrb[4].mxu0  ;;  %7551 = vmatprep.mubr.msk.f32.mxu0 %vm758_vm1, %v9846_v29 }
 0x22e   : > { %v713_v31 = vpop.f32.mrb[5].mxu0  ;;  %v9902_v5 = vmul.f32 0.5, %v7510_v30 }
 0x22f   : > { %v9851_v34 = vpack.i.bf16 %v7510_v30, %v713_v31  ;;  %v9896_v32 = vmul.f32 0.5, %v713_v31 }
 0x231   : > { %8829 = vrot.lane.b32.xlu1 %v9851_v34, %s9616_s25  ;;  %v7513_v35 = vpop.f32.mrb[6].mxu0 }
 0x232   : > { %v723_v36 = vpop.f32.mrb[7].mxu0  ;;  %v9910_v6 = vmul.f32 0.5, %v7513_v35 }
 0x233   : > { %v9854_v37 = vpack.i.bf16 %v7513_v35, %v723_v36  ;;  %v9904_v25 = vmul.f32 0.5, %v723_v36 }
 0x235   : > { %8834 = vrot.lane.b32.xlu1 %v9854_v37, %s9616_s25  ;;  %v7516_v38 = vpop.f32.mrb[8].mxu0 }
 0x236   : > { %v733_v39 = vpop.f32.mrb[9].mxu0  ;;  %v9918_v8 = vmul.f32 0.5, %v7516_v38 }
 0x237   : > { %v9857_v40 = vpack.i.bf16 %v7516_v38, %v733_v39  ;;  %v9912_v7 = vmul.f32 0.5, %v733_v39 }
 0x239   : > { %8839 = vrot.lane.b32.xlu0 %v9857_v40, %s9616_s25  ;;  %s9630_s25 = smov 76  }
 0x29b   : > { %v8820_v41 = vpop.permute.xlu0 %8819 }
 0x29c   : > { %v8822_v44 = vunpack.i.h.bf16 %v8820_v41  ;;  %v8821_v45 = vunpack.i.l.bf16 %v8820_v41 }
 0x29e   : > { %v8242_v47 = vpack.c.bf16 %v8822_v44, %v8821_v45 }
 0x29f   : > { %v8825_v48 = vpop.permute.xlu1 %8824 }
 0x2a0   : > { %v8827_v49 = vunpack.i.h.bf16 %v8825_v48  ;;  %v8826_v50 = vunpack.i.l.bf16 %v8825_v48  ;;  %8244 = vmatprep.subr.msk.bf16.mxu1 %vm9862_vm2, %v8242_v47  ;;  %8254 = vmatprep.subr.msk.bf16.mxu0 %vm9862_vm2, %v8242_v47 }
 0x2a1   : > { %8247 = vmatpush3.bf16.xpose.msk.msra.mxu1 %vm9862_vm2, %v8242_v47  ;;  %8257 = vmatpush3.bf16.xpose.msk.msra.mxu0 %vm9862_vm2, %v8242_v47 }
 0x2a2   : > { %v8258_v51 = vpack.c.bf16 %v8827_v49, %v8826_v50 }
 0x2a3   : > { %v8830_v54 = vpop.permute.xlu1 %8829 }
 0x2a4   : > { %v8832_v55 = vunpack.i.h.bf16 %v8830_v54  ;;  %v8831_v56 = vunpack.i.l.bf16 %v8830_v54  ;;  %8260 = vmatprep.subr.msk.bf16.mxu0 %vm9862_vm2, %v8258_v51 }
 0x2a6   : > { %v8264_v24 = vpack.c.bf16 %v8832_v55, %v8831_v56 }
 0x2a7   : > { %v8835_v58 = vpop.permute.xlu1 %8834 }
 0x2a8   : > { %7522 = vmatmul.mubr.msk.f32.vlgmr.msra.gmra.mrb[0].mxu1 %vm758_vm1, %v9876_v57  ;;  %v8837_v59 = vunpack.i.h.bf16 %v8835_v58  ;;  %v8836_v60 = vunpack.i.l.bf16 %v8835_v58 }
 0x2a9   : > { %8263 = vmatpush3.bf16.xpose.msk.msra.mxu0 %vm9862_vm2, %v8258_v51 }
 0x2aa   : > { %8266 = vmatprep.subr.msk.bf16.mxu0 %vm9862_vm2, %v8264_v24  ;;  %v8270_v61 = vpack.c.bf16 %v8837_v59, %v8836_v60 }
 0x2ab   : > { %v8840_v0 = vpop.permute.xlu0 %8839 }
 0x2ac   : > { %v8842_v1 = vunpack.i.h.bf16 %v8840_v0  ;;  %v8841_v2 = vunpack.i.l.bf16 %v8840_v0 }
 0x2ae   : > { %v8276_v3 = vpack.c.bf16 %v8842_v1, %v8841_v2 }
 0x2b1   : > { %8269 = vmatpush3.bf16.xpose.msk.msra.mxu0 %vm9862_vm2, %v8264_v24 }
 0x2b2   : > { %8272 = vmatprep.subr.msk.bf16.mxu0 %vm9862_vm2, %v8270_v61 }
 0x2b9   : > { %8275 = vmatpush3.bf16.xpose.msk.msra.mxu0 %vm9862_vm2, %v8270_v61 }
 0x2ba   : > { %8278 = vmatprep.subr.msk.bf16.mxu0 %vm9862_vm2, %v8276_v3 }
 0x2c1   : > { %8281 = vmatpush3.bf16.xpose.msk.msra.mxu0 %vm9862_vm2, %v8276_v3 }
 0x2c8   : > { %7552 = vmatmul.mubr.msk.f32.vlgmr.msra.gmra.mrb[10].mxu0 %vm758_vm1, %v9894_v4 }
 0x2c9   : > { %7554 = vmatprep.mubr.msk.f32.mxu0 %vm758_vm1, %v9896_v32 }
 0x2cc   : > { %7555 = vmatmul.mubr.msk.f32.gmra.mrb[12].mxu0 %vm758_vm1, %v9902_v5 }
 0x2cd   : > { %7557 = vmatprep.mubr.msk.f32.mxu0 %vm758_vm1, %v9904_v25 }
 0x2d0   : > { %7558 = vmatmul.mubr.msk.f32.gmra.mrb[14].mxu0 %vm758_vm1, %v9910_v6 }
 0x2d1   : > { %7560 = vmatprep.mubr.msk.f32.mxu0 %vm758_vm1, %v9912_v7 }
 0x2d4   : > { %7561 = vmatmul.mubr.msk.f32.gmra.mrb[16].mxu0 %vm758_vm1, %v9918_v8 }
 0x37b   : > { %v7523_v9 = vpop.f32.mrb[0].mxu1 }
 0x37c   : > { %v835_v10 = vpop.f32.mrb[1].mxu1  ;;  %v848_v33 = vsel %vm844_vm3, %v7523_v9, -inf }
 0x37d   : > { %849 = vmax.xlane.f32.xlu0 %v848_v33  ;;  %v845_v11 = vsel %vm844_vm3, %v835_v10, -inf }
 0x37e   : > { %846 = vmax.xlane.f32.xlu1 %v845_v11 }
 0x39b   : > { %v9924_v42 = vpop.f32.mrb[10].mxu0 }
 0x39c   : > { %v1086_v12 = vpop.f32.mrb[11].mxu0  ;;  %v1129_v13 = vsel %vm1125_vm4, %v9924_v42, -inf }
 0x39d   : > { %1130 = vmax.xlane.f32.xlu0 %v1129_v13  ;;  %v1126_v16 = vsel %vm1125_vm4, %v1086_v12, -inf }
 0x39f   : > { %v9928_v14 = vpop.f32.mrb[12].mxu0 }
 0x3a0   : > { %v9930_v15 = vpop.f32.mrb[13].mxu0  ;;  %v1135_v18 = vsel %vm1125_vm4, %v9928_v14, -inf }
 0x3a1   : > { %1127 = vmax.xlane.f32.xlu0 %v1126_v16  ;;  %v1132_v43 = vsel %vm1125_vm4, %v9930_v15, -inf }
 0x3a2   : > { %1133 = vmax.xlane.f32.xlu1 %v1132_v43 }
 0x3a3   : > { %v9935_v17 = vpop.f32.mrb[14].mxu0 }
 0x3a4   : > { %v9937_v52 = vpop.f32.mrb[15].mxu0  ;;  %v1141_v53 = vsel %vm1125_vm4, %v9935_v17, -inf }
 0x3a5   : > { %1136 = vmax.xlane.f32.xlu0 %v1135_v18  ;;  %v1138_v19 = vsel %vm1125_vm4, %v9937_v52, -inf }
 0x3a6   : > { %1139 = vmax.xlane.f32.xlu1 %v1138_v19 }
 0x3a7   : > { %v7562_v20 = vpop.f32.mrb[16].mxu0 }
 0x3a8   : > { %v9943_v21 = vpop.f32.mrb[17].mxu0  ;;  %v1147_v22 = vsel %vm1125_vm4, %v7562_v20, -inf }
 0x3a9   : > { %1142 = vmax.xlane.f32.xlu0 %v1141_v53  ;;  %v1144_v62 = vsel %vm1125_vm4, %v9943_v21, -inf }
 0x3aa   : > { %1145 = vmax.xlane.f32.xlu1 %v1144_v62 }
 0x3ad   : > { %1148 = vmax.xlane.f32.xlu0 %v1147_v22 }
 0x3bb   : > { %8844 = vrot.lane.b32.xlu1 %v9837_v23, %s9617_s26 }
 0x40a   : > { %v850_v63 = vpop.xlane.xlu0 %849 }
 0x40b   : > { %v852_v27 = vsub.f32 %v7523_v9, %v850_v63  ;;  %v847_v30 = vpop.xlane.xlu1 %846 }
 0x40c   : > { %v851_v31 = vsub.f32 %v835_v10, %v847_v30 }
 0x40d   : > { %v855_v35 = vmul.f32 1.442695, %v852_v27 }
 0x40e   : > { %v853_v36 = vmul.f32 1.442695, %v851_v31 }
 0x40f   : > { %9238 = vpow2.f32 %v855_v35 }
 0x410   : > { %9240 = vpow2.f32 %v853_v36 }
 0x419   : > { %v9952_v38 = vpop.eup %9238 }
 0x41a   : > { %v9954_v39 = vpop.eup %9240  ;;  %v860_v41 = vsel %vm844_vm3, %v9952_v38, 0.0 }
 0x41b   : > { %861 = vadd.xlane.f32.xlu0 %v860_v41  ;;  %v857_v44 = vsel %vm844_vm3, %v9954_v39, 0.0 }
 0x41c   : > { %858 = vadd.xlane.f32.xlu1 %v857_v44 }
 0x42a   : > { %v1131_v45 = vpop.xlane.xlu0 %1130 }
 0x42b   : > { %v1151_v2 = vsub.f32 %v9924_v42, %v1131_v45 }
 0x42d   : > { %8849 = vrot.lane.b32.xlu1 %v9844_v28, %s9617_s26  ;;  %v1160_v3 = vmul.f32 1.442695, %v1151_v2 }
 0x42e   : > { %v1128_v47 = vpop.xlane.xlu0 %1127 }
 0x42f   : > { %v1134_v48 = vpop.xlane.xlu1 %1133  ;;  %v1150_v55 = vsub.f32 %v1086_v12, %v1128_v47 }
 0x430   : > { %v1152_v33 = vsub.f32 %v9930_v15, %v1134_v48 }
 0x431   : > { %8854 = vrot.lane.b32.xlu0 %v9851_v34, %s9617_s26  ;;  %v1158_v61 = vmul.f32 1.442695, %v1150_v55 }
 0x432   : > { %v1137_v49 = vpop.xlane.xlu0 %1136  ;;  %v1162_v16 = vmul.f32 1.442695, %v1152_v33 }
 0x433   : > { %v1140_v50 = vpop.xlane.xlu1 %1139  ;;  %9242 = vpow2.f32 %v1158_v61  ;;  %v1153_v9 = vsub.f32 %v9928_v14, %v1137_v49 }
 0x434   : > { %v1154_v14 = vsub.f32 %v9937_v52, %v1140_v50 }
 0x435   : > { %8859 = vrot.lane.b32.xlu0 %v9854_v37, %s9617_s26  ;;  %v1164_v11 = vmul.f32 1.442695, %v1153_v9 }
 0x436   : > { %v1143_v51 = vpop.xlane.xlu0 %1142  ;;  %v1166_v19 = vmul.f32 1.442695, %v1154_v14 }
 0x437   : > { %v9966_v54 = vpop.xlane.xlu1 %1145  ;;  %v1155_v42 = vsub.f32 %v9935_v17, %v1143_v51 }
 0x438   : > { %v1156_v31 = vsub.f32 %v9943_v21, %v9966_v54 }
 0x439   : > { %8864 = vrot.lane.b32.xlu0 %v9837_v23, %s9618_s28  ;;  %v1168_v18 = vmul.f32 1.442695, %v1155_v42 }
 0x43a   : > { %v1149_v24 = vpop.xlane.xlu0 %1148  ;;  %v1170_v35 = vmul.f32 1.442695, %v1156_v31 }
 0x43b   : > { %v8845_v56 = vpop.permute.xlu1 %8844  ;;  %v1157_v0 = vsub.f32 %v7562_v20, %v1149_v24 }
 0x43c   : > { %v8847_v58 = vunpack.i.h.bf16 %v8845_v56  ;;  %v8846_v59 = vunpack.i.l.bf16 %v8845_v56 }
 0x43d   : > { %8869 = vrot.lane.b32.xlu0 %v9857_v40, %s9617_s26  ;;  %v1172_v1 = vmul.f32 1.442695, %v1157_v0  ;;  %v9979_v10 = vpop.eup %9242  ;;  %s9631_s26 = smov 108  }
 0x43e   : > { %v9972_v60 = vpack.c.bf16 %v8847_v58, %v8846_v59  ;;  %v1174_v12 = vsel %vm1125_vm4, %v9979_v10, 0.0 }
 0x43f   : > { %9244 = vpow2.f32 %v1172_v1 }
 0x440   : > { %8249 = vmatprep.subr.bf16.mxu1 %v9972_v60  ;;  %9246 = vpow2.f32 %v1160_v3 }
 0x441   : > { %8251 = vmatpush3.bf16.msra.mxu1 %v9972_v60  ;;  %9248 = vpow2.f32 %v1164_v11 }
 0x442   : > { %8283 = vmatprep.subr.bf16.mxu1 %v9972_v60  ;;  %9250 = vpow2.f32 %v1162_v16 }
 0x443   : > { %9252 = vpow2.f32 %v1168_v18 }
 0x444   : > { %9254 = vpow2.f32 %v1166_v19 }
 0x445   : > { %9256 = vpow2.f32 %v1170_v35 }
 0x449   : > { %v9984_v13 = vpop.eup %9244 }
 0x44a   : > { %v1195_v43 = vsel %vm1125_vm4, %v9984_v13, 0.0  ;;  %v9990_v15 = vpop.eup %9246 }
 0x44b   : > { %v1177_v20 = vsel %vm1125_vm4, %v9990_v15, 0.0  ;;  %v9994_v53 = vpop.eup %9248 }
 0x44c   : > { %v1183_v17 = vsel %vm1125_vm4, %v9994_v53, 0.0  ;;  %v9998_v62 = vpop.eup %9250 }
 0x44d   : > { %v1180_v52 = vsel %vm1125_vm4, %v9998_v62, 0.0  ;;  %v10002_v22 = vpop.eup %9252 }
 0x44e   : > { %v1189_v63 = vsel %vm1125_vm4, %v10002_v22, 0.0  ;;  %v10008_v27 = vpop.eup %9254 }
 0x44f   : > { %v1186_v30 = vsel %vm1125_vm4, %v10008_v27, 0.0  ;;  %v10026_v36 = vpop.eup %9256 }
 0x450   : > { %v1192_v41 = vsel %vm1125_vm4, %v10026_v36, 0.0 }
 0x451   : > { %1175 = vadd.xlane.f32.xlu1 %v1174_v12 }
 0x455   : > { %1196 = vadd.xlane.f32.xlu1 %v1195_v43 }
 0x45c   : > { %1178 = vadd.xlane.f32.xlu0 %v1177_v20 }
 0x460   : > { %1184 = vadd.xlane.f32.xlu0 %v1183_v17 }
 0x464   : > { %1181 = vadd.xlane.f32.xlu0 %v1180_v52 }
 0x466   : > { %8874 = vrot.lane.b32.xlu1 %v9844_v28, %s9618_s28 }
 0x468   : > { %1190 = vadd.xlane.f32.xlu0 %v1189_v63 }
 0x46a   : > { %1586 = vrot.lane.b32.xlu1 %v9846_v29, %s9619_s29 }
 0x46c   : > { %1187 = vadd.xlane.f32.xlu0 %v1186_v30 }
 0x46e   : > { %1590 = vrot.lane.b32.xlu1 %v9896_v32, %s9619_s29 }
 0x472   : > { %1594 = vrot.lane.b32.xlu1 %v9904_v25, %s9619_s29 }
 0x476   : > { %1598 = vrot.lane.b32.xlu1 %v9912_v7, %s9619_s29 }
 0x482   : > { %8879 = vrot.lane.b32.xlu0 %v9851_v34, %s9618_s28 }
 0x486   : > { %1375 = vrot.lane.b32.xlu0 %v9839_v26, %s9619_s29 }
 0x4a5   : > { %1193 = vadd.xlane.f32.xlu0 %v1192_v41 }
 0x4a8   : > { %v862_v44 = vpop.xlane.xlu0 %861 }
 0x4a9   : > { %9258 = vrcp.f32 %v862_v44  ;;  %v859_v45 = vpop.xlane.xlu1 %858 }
 0x4aa   : > { %9260 = vrcp.f32 %v859_v45 }
 0x4ac   : > { %v8855_v47 = vpop.permute.xlu0 %8854 }
 0x4ad   : > { %v8850_v49 = vpop.permute.xlu1 %8849  ;;  %v8857_v0 = vunpack.i.h.bf16 %v8855_v47  ;;  %v8856_v1 = vunpack.i.l.bf16 %v8855_v47 }
 0x4ae   : > { %v8852_v55 = vunpack.i.h.bf16 %v8850_v49  ;;  %v8851_v56 = vunpack.i.l.bf16 %v8850_v49 }
 0x4af   : > { %v8290_v3 = vpack.c.bf16 %v8857_v0, %v8856_v1 }
 0x4b0   : > { %v8860_v48 = vpop.permute.xlu0 %8859  ;;  %v8286_v2 = vpack.c.bf16 %v8852_v55, %v8851_v56 }
 0x4b3   : > { %v9259_v50 = vpop.eup %9258 }
 0x4b4   : > { %v9261_v51 = vpop.eup %9260  ;;  %v8865_v21 = vpop.permute.xlu0 %8864  ;;  %v866_v59 = vmul.f32 %v9259_v50, %v9952_v38  ;;  %v8862_v38 = vunpack.i.h.bf16 %v8860_v48 }
 0x4b5   : > { %v8867_v54 = vunpack.i.h.bf16 %v8865_v21  ;;  %v8866_v24 = vunpack.i.l.bf16 %v8865_v21  ;;  %v864_v58 = vmul.f32 %v9261_v51, %v9954_v39  ;;  %v8861_v39 = vunpack.i.l.bf16 %v8860_v48 }
 0x4b7   : > { %v8302_v61 = vpack.c.bf16 %v8867_v54, %v8866_v24  ;;  %7528 = vmatprep.mubr.msk.f32.mxu1 %vm844_vm3, %v864_v58  ;;  %v8294_v11 = vpack.c.bf16 %v8862_v38, %v8861_v39 }
 0x4b8   : > { %7529 = vmatmul.mubr.msk.f32.vlgmr.msra.gmra.mrb[2].mxu1 %vm844_vm3, %v866_v59  ;;  %v8870_v9 = vpop.permute.xlu0 %8869 }
 0x4b9   : > { %8285 = vmatpush3.bf16.msra.mxu1 %v9972_v60  ;;  %8314 = vmatprep.subr.msk.bf16.mxu0 %vm9862_vm2, %v8302_v61  ;;  %v8872_v60 = vunpack.i.h.bf16 %v8870_v9  ;;  %v8871_v33 = vunpack.i.l.bf16 %v8870_v9 }
 0x4ba   : > { %8287 = vmatprep.subr.bf16.mxu1 %v8286_v2  ;;  %8317 = vmatpush3.bf16.xpose.msk.msra.mxu0 %vm9862_vm2, %v8302_v61 }
 0x4bb   : > { %1377 = vrot.lane.b32.xlu0 %v9876_v57, %s9619_s29  ;;  %v8298_v12 = vpack.c.bf16 %v8872_v60, %v8871_v33 }
 0x4bd   : > { %8289 = vmatpush3.bf16.msra.mxu1 %v8286_v2 }
 0x4be   : > { %8291 = vmatprep.subr.bf16.mxu1 %v8290_v3 }
 0x4bf   : > { %8884 = vrot.lane.b32.xlu0 %v9854_v37, %s9618_s28 }
 0x4c1   : > { %8293 = vmatpush3.bf16.msra.mxu1 %v8290_v3 }
 0x4c2   : > { %8295 = vmatprep.subr.bf16.mxu1 %v8294_v11 }
 0x4c3   : > { %8889 = vrot.lane.b32.xlu0 %v9857_v40, %s9618_s28  ;;  %s9632_s28 = smov 44  }
 0x4c5   : > { %8297 = vmatpush3.bf16.msra.mxu1 %v8294_v11 }
 0x4c6   : > { %8299 = vmatprep.subr.bf16.mxu1 %v8298_v12 }
 0x4c7   : > { %1588 = vrot.lane.b32.xlu0 %v9894_v4, %s9619_s29 }
 0x4c9   : > { %8301 = vmatpush3.bf16.msra.mxu1 %v8298_v12 }
 0x4ca   : > { %8304 = vmatprep.subr.msk.bf16.mxu1 %vm9862_vm2, %v8302_v61 }
 0x4cb   : > { %1592 = vrot.lane.b32.xlu0 %v9902_v5, %s9619_s29 }
 0x4cf   : > { %1596 = vrot.lane.b32.xlu0 %v9910_v6, %s9619_s29 }
 0x4d3   : > { %1600 = vrot.lane.b32.xlu0 %v9918_v8, %s9619_s29  ;;  %s9633_s29 = smov 72  }
 0x4de   : > { %v1176_v16 = vpop.xlane.xlu1 %1175 }
 0x4df   : > { %9262 = vrcp.f32 %v1176_v16 }
 0x4e2   : > { %v1197_v42 = vpop.xlane.xlu1 %1196 }
 0x4e6   : > { %v8875_v43 = vpop.permute.xlu1 %8874 }
 0x4e7   : > { %v8877_v14 = vunpack.i.h.bf16 %v8875_v43  ;;  %v8876_v18 = vunpack.i.l.bf16 %v8875_v43 }
 0x4e9   : > { %v9263_v19 = vpop.eup %9262  ;;  %v8318_v20 = vpack.c.bf16 %v8877_v14, %v8876_v18  ;;  %v1179_v17 = vpop.xlane.xlu0 %1178 }
 0x4ea   : > { %9264 = vrcp.f32 %v1179_v17  ;;  %v1587_v52 = vpop.permute.xlu1 %1586  ;;  %v1199_v63 = vmul.f32 %v9263_v19, %v9979_v10 }
 0x4eb   : > { %8320 = vmatprep.subr.msk.bf16.mxu0 %vm9862_vm2, %v8318_v20  ;;  %7629 = vmatprep.mubr.msk.f32.mxu0 %vm758_vm1, %v1587_v52 }
 0x4ec   : > { %7583 = vmatprep.mubr.msk.f32.mxu1 %vm1125_vm4, %v1199_v63  ;;  %8323 = vmatpush3.bf16.xpose.msk.msra.mxu0 %vm9862_vm2, %v8318_v20 }
 0x4ed   : > { %v1185_v30 = vpop.xlane.xlu0 %1184 }
 0x4ee   : > { %9266 = vrcp.f32 %v1185_v30 }
 0x4f1   : > { %v1182_v31 = vpop.xlane.xlu0 %1181 }
 0x4f2   : > { %9268 = vrcp.f32 %v1182_v31 }
 0x4f4   : > { %v9265_v35 = vpop.eup %9264 }
 0x4f5   : > { %v1191_v41 = vpop.xlane.xlu0 %1190  ;;  %v1201_v44 = vmul.f32 %v9265_v35, %v9990_v15 }
 0x4f6   : > { %9270 = vrcp.f32 %v1191_v41 }
 0x4f7   : > { %7584 = vmatmul.mubr.msk.f32.vlgmr.msra.gmra.mrb[4].mxu1 %vm1125_vm4, %v1201_v44 }
 0x4f8   : > { %8307 = vmatpush3.bf16.xpose.msk.msra.mxu1 %vm9862_vm2, %v8302_v61  ;;  %v9267_v45 = vpop.eup %9266 }
 0x4f9   : > { %v1188_v10 = vpop.xlane.xlu0 %1187  ;;  %v1205_v55 = vmul.f32 %v9267_v45, %v9994_v53 }
 0x4fa   : > { %9272 = vrcp.f32 %v1188_v10 }
 0x4fb   : > { %9274 = vrcp.f32 %v1197_v42 }
 0x4fc   : > { %v9269_v47 = vpop.eup %9268 }
 0x4fd   : > { %v8880_v48 = vpop.permute.xlu0 %8879  ;;  %v1203_v49 = vmul.f32 %v9269_v47, %v9998_v62 }
 0x4fe   : > { %v8882_v50 = vunpack.i.h.bf16 %v8880_v48  ;;  %v8881_v51 = vunpack.i.l.bf16 %v8880_v48 }
 0x4ff   : > { %7586 = vmatprep.mubr.msk.f32.mxu1 %vm1125_vm4, %v1203_v49 }
 0x500   : > { %v8324_v15 = vpack.c.bf16 %v8882_v50, %v8881_v51  ;;  %7587 = vmatmul.mubr.msk.f32.gmra.mrb[6].mxu1 %vm1125_vm4, %v1205_v55  ;;  %v9271_v56 = vpop.eup %9270 }
 0x501   : > { %v1209_v62 = vmul.f32 %v9271_v56, %v10002_v22  ;;  %v1376_v53 = vpop.permute.xlu0 %1375 }
 0x502   : > { %8326 = vmatprep.subr.msk.bf16.mxu0 %vm9862_vm2, %v8324_v15 }
 0x503   : > { %8329 = vmatpush3.bf16.xpose.msk.msra.mxu0 %vm9862_vm2, %v8324_v15 }
 0x504   : > { %v9273_v21 = vpop.eup %9272 }
 0x505   : > { %v1207_v54 = vmul.f32 %v9273_v21, %v10008_v27  ;;  %v9275_v1 = vpop.eup %9274 }
 0x506   : > { %v1213_v9 = vmul.f32 %v9275_v1, %v9984_v13  ;;  %v1591_v13 = vpop.permute.xlu1 %1590 }
 0x507   : > { %7589 = vmatprep.mubr.msk.f32.mxu1 %vm1125_vm4, %v1207_v54 }
 0x508   : > { %7590 = vmatmul.mubr.msk.f32.gmra.mrb[8].mxu1 %vm1125_vm4, %v1209_v62 }
 0x50a   : > { %v1595_v11 = vpop.permute.xlu1 %1594 }
 0x50e   : > { %v1599_v16 = vpop.permute.xlu1 %1598 }
 0x532   : > { %v1194_v24 = vpop.xlane.xlu0 %1193 }
 0x533   : > { %9276 = vrcp.f32 %v1194_v24 }
 0x536   : > { %v1378_v58 = vpop.permute.xlu0 %1377 }
 0x53a   : > { %v8885_v59 = vpop.permute.xlu0 %8884 }
 0x53b   : > { %v8887_v61 = vunpack.i.h.bf16 %v8885_v59  ;;  %v8886_v0 = vunpack.i.l.bf16 %v8885_v59 }
 0x53d   : > { %v9277_v2 = vpop.eup %9276  ;;  %v8330_v38 = vpack.c.bf16 %v8887_v61, %v8886_v0 }
 0x53e   : > { %v8890_v39 = vpop.permute.xlu0 %8889  ;;  %v1211_v27 = vmul.f32 %v9277_v2, %v10026_v36 }
 0x53f   : > { %v8892_v3 = vunpack.i.h.bf16 %v8890_v39  ;;  %v8891_v22 = vunpack.i.l.bf16 %v8890_v39  ;;  %8332 = vmatprep.subr.msk.bf16.mxu0 %vm9862_vm2, %v8330_v38 }
 0x540   : > { %7592 = vmatprep.mubr.msk.f32.mxu1 %vm1125_vm4, %v1211_v27  ;;  %8335 = vmatpush3.bf16.xpose.msk.msra.mxu0 %vm9862_vm2, %v8330_v38 }
 0x541   : > { %v8336_v60 = vpack.c.bf16 %v8892_v3, %v8891_v22  ;;  %7593 = vmatmul.mubr.msk.f32.gmra.mrb[10].mxu1 %vm1125_vm4, %v1213_v9 }
 0x542   : > { %7599 = vmatprep.mubr.msk.f32.mxu1 %vm758_vm1, %v1376_v53  ;;  %v1589_v36 = vpop.permute.xlu0 %1588 }
 0x543   : > { %8338 = vmatprep.subr.msk.bf16.mxu0 %vm9862_vm2, %v8336_v60 }
 0x545   : > { %7600 = vmatmul.mubr.msk.f32.vlgmr.msra.gmra.mrb[12].mxu1 %vm758_vm1, %v1378_v58 }
 0x546   : > { %v1593_v33 = vpop.permute.xlu0 %1592 }
 0x548   : > { %8341 = vmatpush3.bf16.xpose.msk.msra.mxu0 %vm9862_vm2, %v8336_v60 }
 0x54a   : > { %v1597_v12 = vpop.permute.xlu0 %1596 }
 0x54e   : > { %v1601_v42 = vpop.permute.xlu0 %1600 }
 0x54f   : > { %7630 = vmatmul.mubr.msk.f32.vlgmr.msra.gmra.mrb[18].mxu0 %vm758_vm1, %v1589_v36 }
 0x550   : > { %7632 = vmatprep.mubr.msk.f32.mxu0 %vm758_vm1, %v1591_v13 }
 0x553   : > { %7633 = vmatmul.mubr.msk.f32.gmra.mrb[20].mxu0 %vm758_vm1, %v1593_v33 }
 0x554   : > { %7635 = vmatprep.mubr.msk.f32.mxu0 %vm758_vm1, %v1595_v11 }
 0x557   : > { %7636 = vmatmul.mubr.msk.f32.gmra.mrb[22].mxu0 %vm758_vm1, %v1597_v12 }
 0x558   : > { %7638 = vmatprep.mubr.msk.f32.mxu0 %vm758_vm1, %v1599_v16 }
 0x55b   : > { %7639 = vmatmul.mubr.msk.f32.gmra.mrb[24].mxu0 %vm758_vm1, %v1601_v42 }
 0x58b   : > { %v7530_v43 = vpop.f32.mrb[2].mxu1 }
 0x58c   : > { %955 = vst.msk [vmem:[#allocation2 + $0x8] sm:$0xff] %vm758_vm1, %v7530_v43  ;;  %v945_v14 = vpop.f32.mrb[3].mxu1 }
 0x58d   : > { %954 = vst.msk [vmem:[#allocation2] sm:$0xff] %vm758_vm1, %v945_v14 }
 0x5ca   : > { %v7585_v18 = vpop.f32.mrb[4].mxu1 }
 0x5cb   : > { %1368 = vst.msk [vmem:[#allocation2 + $0x18] sm:$0xff] %vm758_vm1, %v7585_v18  ;;  %v1328_v19 = vpop.f32.mrb[5].mxu1 }
 0x5cc   : > { %1367 = vst.msk [vmem:[#allocation2 + $0x10] sm:$0xff] %vm758_vm1, %v1328_v19 }
 0x5d3   : > { %v7588_v20 = vpop.f32.mrb[6].mxu1 }
 0x5d4   : > { %1370 = vst.msk [vmem:[#allocation2 + $0x28] sm:$0xff] %vm758_vm1, %v7588_v20  ;;  %v1338_v17 = vpop.f32.mrb[7].mxu1 }
 0x5d5   : > { %1369 = vst.msk [vmem:[#allocation2 + $0x20] sm:$0xff] %vm758_vm1, %v1338_v17 }
 0x5db   : > { %v7591_v52 = vpop.f32.mrb[8].mxu1 }
 0x5dc   : > { %1372 = vst.msk [vmem:[#allocation2 + $0x38] sm:$0xff] %vm758_vm1, %v7591_v52  ;;  %v1348_v63 = vpop.f32.mrb[9].mxu1 }
 0x5dd   : > { %1371 = vst.msk [vmem:[#allocation2 + $0x30] sm:$0xff] %vm758_vm1, %v1348_v63 }
 0x614   : > { %v7594_v30 = vpop.f32.mrb[10].mxu1 }
 0x615   : > { %1374 = vst.msk [vmem:[#allocation2 + $0x48] sm:$0xff] %vm758_vm1, %v7594_v30  ;;  %v1358_v31 = vpop.f32.mrb[11].mxu1 }
 0x616   : > { %1373 = vst.msk [vmem:[#allocation2 + $0x40] sm:$0xff] %vm758_vm1, %v1358_v31 }
 0x618   : > { %v10109_v35 = vpop.f32.mrb[12].mxu1 }
 0x619   : > { %v10111_v41 = vpop.f32.mrb[13].mxu1  ;;  %v1469_v44 = vsel %vm844_vm3, %v10109_v35, -inf }
 0x61a   : > { %1470 = vmax.xlane.f32.xlu0 %v1469_v44  ;;  %v1466_v51 = vsel %vm844_vm3, %v10111_v41, -inf }
 0x622   : > { %v7631_v10 = vpop.f32.mrb[18].mxu0 }
 0x623   : > { %v1716_v45 = vpop.f32.mrb[19].mxu0  ;;  %v1758_v47 = vsel %vm1125_vm4, %v7631_v10, -inf }
 0x624   : > { %1759 = vmax.xlane.f32.xlu1 %v1758_v47  ;;  %v1755_v48 = vsel %vm1125_vm4, %v1716_v45, -inf }
 0x625   : > { %1756 = vmax.xlane.f32.xlu0 %v1755_v48 }
 0x626   : > { %v7634_v49 = vpop.f32.mrb[20].mxu0 }
 0x627   : > { %v1726_v50 = vpop.f32.mrb[21].mxu0  ;;  %v1764_v21 = vsel %vm1125_vm4, %v7634_v49, -inf }
 0x628   : > { %1467 = vmax.xlane.f32.xlu1 %v1466_v51  ;;  %v1761_v55 = vsel %vm1125_vm4, %v1726_v50, -inf }
 0x629   : > { %1762 = vmax.xlane.f32.xlu0 %v1761_v55 }
 0x62a   : > { %v7637_v15 = vpop.f32.mrb[22].mxu0 }
 0x62b   : > { %v1736_v56 = vpop.f32.mrb[23].mxu0  ;;  %v1770_v24 = vsel %vm1125_vm4, %v7637_v15, -inf }
 0x62c   : > { %1765 = vmax.xlane.f32.xlu1 %v1764_v21  ;;  %v1767_v54 = vsel %vm1125_vm4, %v1736_v56, -inf }
 0x62d   : > { %1768 = vmax.xlane.f32.xlu0 %v1767_v54 }
 0x62e   : > { %v10122_v62 = vpop.f32.mrb[24].mxu0 }
 0x62f   : > { %v1746_v53 = vpop.f32.mrb[25].mxu0  ;;  %v1776_v59 = vsel %vm1125_vm4, %v10122_v62, -inf }
 0x630   : > { %1771 = vmax.xlane.f32.xlu1 %v1770_v24  ;;  %v1773_v58 = vsel %vm1125_vm4, %v1746_v53, -inf }
 0x631   : > { %1774 = vmax.xlane.f32.xlu0 %v1773_v58 }
 0x634   : > { %1777 = vmax.xlane.f32.xlu1 %v1776_v59 }
 0x6a7   : > { %v1471_v61 = vpop.xlane.xlu0 %1470 }
 0x6b1   : > { %v1760_v0 = vpop.xlane.xlu1 %1759 }
 0x6b2   : > { %v1780_v1 = vsub.f32 %v7631_v10, %v1760_v0  ;;  %v1757_v2 = vpop.xlane.xlu0 %1756 }
 0x6b3   : > { %v1779_v38 = vsub.f32 %v1716_v45, %v1757_v2 }
 0x6b4   : > { %v1789_v39 = vmul.f32 1.442695, %v1780_v1 }
 0x6b5   : > { %v1787_v27 = vmul.f32 1.442695, %v1779_v38  ;;  %v1468_v3 = vpop.xlane.xlu1 %1467 }
 0x6b6   : > { %9278 = vpow2.f32 %v1789_v39  ;;  %v1763_v22 = vpop.xlane.xlu0 %1762  ;;  %v1472_v48 = vsub.f32 %v10111_v41, %v1468_v3 }
 0x6b7   : > { %9280 = vpow2.f32 %v1787_v27  ;;  %v1781_v9 = vsub.f32 %v1726_v50, %v1763_v22 }
 0x6b8   : > { %v1474_v50 = vmul.f32 1.442695, %v1472_v48 }
 0x6b9   : > { %v1791_v60 = vmul.f32 1.442695, %v1781_v9  ;;  %v1766_v36 = vpop.xlane.xlu1 %1765 }
 0x6ba   : > { %v1782_v13 = vsub.f32 %v7634_v49, %v1766_v36  ;;  %v1769_v33 = vpop.xlane.xlu0 %1768 }
 0x6bb   : > { %9282 = vpow2.f32 %v1791_v60  ;;  %v1783_v11 = vsub.f32 %v1736_v56, %v1769_v33 }
 0x6bc   : > { %v1793_v12 = vmul.f32 1.442695, %v1782_v13 }
 0x6bd   : > { %v1795_v16 = vmul.f32 1.442695, %v1783_v11  ;;  %v1772_v42 = vpop.xlane.xlu1 %1771 }
 0x6be   : > { %9284 = vpow2.f32 %v1793_v12  ;;  %v1784_v43 = vsub.f32 %v7637_v15, %v1772_v42  ;;  %v1775_v49 = vpop.xlane.xlu0 %1774  ;;  %v1473_v15 = vsub.f32 %v10109_v35, %v1471_v61 }
 0x6bf   : > { %9286 = vpow2.f32 %v1795_v16  ;;  %v1785_v51 = vsub.f32 %v1746_v53, %v1775_v49 }
 0x6c0   : > { %v10128_v14 = vpop.eup %9278  ;;  %v1797_v19 = vmul.f32 1.442695, %v1784_v43  ;;  %v1476_v54 = vmul.f32 1.442695, %v1473_v15 }
 0x6c1   : > { %v10130_v18 = vpop.eup %9280  ;;  %v1806_v20 = vsel %vm1125_vm4, %v10128_v14, 0.0  ;;  %v1799_v55 = vmul.f32 1.442695, %v1785_v51  ;;  %v1778_v56 = vpop.xlane.xlu1 %1777 }
 0x6c2   : > { %1807 = vadd.xlane.f32.xlu1 %v1806_v20  ;;  %v1803_v17 = vsel %vm1125_vm4, %v10130_v18, 0.0  ;;  %9288 = vpow2.f32 %v1797_v19  ;;  %v1786_v24 = vsub.f32 %v10122_v62, %v1778_v56 }
 0x6c3   : > { %1804 = vadd.xlane.f32.xlu0 %v1803_v17  ;;  %9290 = vpow2.f32 %v1474_v50 }
 0x6c4   : > { %9292 = vpow2.f32 %v1799_v55  ;;  %v1801_v41 = vmul.f32 1.442695, %v1786_v24 }
 0x6c5   : > { %v10136_v52 = vpop.eup %9282  ;;  %9294 = vpow2.f32 %v1476_v54 }
 0x6c6   : > { %v1809_v63 = vsel %vm1125_vm4, %v10136_v52, 0.0  ;;  %9296 = vpow2.f32 %v1801_v41 }
 0x6c7   : > { %1810 = vadd.xlane.f32.xlu1 %v1809_v63 }
 0x6c8   : > { %v10140_v30 = vpop.eup %9284 }
 0x6c9   : > { %v1812_v31 = vsel %vm1125_vm4, %v10140_v30, 0.0  ;;  %v10144_v44 = vpop.eup %9286 }
 0x6ca   : > { %v1815_v10 = vsel %vm1125_vm4, %v10144_v44, 0.0 }
 0x6cb   : > { %1813 = vadd.xlane.f32.xlu1 %v1812_v31 }
 0x6cc   : > { %v10148_v45 = vpop.eup %9288 }
 0x6cd   : > { %v1818_v47 = vsel %vm1125_vm4, %v10148_v45, 0.0  ;;  %v9291_v21 = vpop.eup %9290 }
 0x6ce   : > { %v1478_v58 = vsel %vm844_vm3, %v9291_v21, 0.0  ;;  %v10160_v59 = vpop.eup %9292 }
 0x6cf   : > { %1816 = vadd.xlane.f32.xlu1 %v1815_v10  ;;  %v1821_v53 = vsel %vm1125_vm4, %v10160_v59, 0.0  ;;  %v10164_v0 = vpop.eup %9294 }
 0x6d0   : > { %v1481_v35 = vsel %vm844_vm3, %v10164_v0, 0.0  ;;  %v10168_v61 = vpop.eup %9296 }
 0x6d1   : > { %v1824_v62 = vsel %vm1125_vm4, %v10168_v61, 0.0 }
 0x6d3   : > { %1819 = vadd.xlane.f32.xlu1 %v1818_v47 }
 0x6d9   : > { %8894 = vrot.lane.b32.xlu0 %v9837_v23, %s9620_s30 }
 0x6e4   : > { %8899 = vrot.lane.b32.xlu1 %v9844_v28, %s9620_s30 }
 0x6f8   : > { %1479 = vadd.xlane.f32.xlu0 %v1478_v58 }
 0x6fc   : > { %1822 = vadd.xlane.f32.xlu0 %v1821_v53 }
 0x708   : > { %1482 = vadd.xlane.f32.xlu1 %v1481_v35 }
 0x70c   : > { %1825 = vadd.xlane.f32.xlu1 %v1824_v62 }
 0x712   : > { %8904 = vrot.lane.b32.xlu0 %v9851_v34, %s9620_s30 }
 0x716   : > { %8914 = vrot.lane.b32.xlu0 %v9837_v23, %s9621_s13 }
 0x71a   : > { %8919 = vrot.lane.b32.xlu0 %v9857_v40, %s9620_s30 }
 0x71d   : > { %8909 = vrot.lane.b32.xlu1 %v9854_v37, %s9620_s30  ;;  %s9634_s30 = smov 104  }
 0x71e   : > { %8924 = vrot.lane.b32.xlu0 %v9844_v28, %s9621_s13 }
 0x721   : > { %2036 = vrot.lane.b32.xlu1 %v9839_v26, %s9622_s14 }
 0x722   : > { %8929 = vrot.lane.b32.xlu0 %v9851_v34, %s9621_s13 }
 0x725   : > { %8934 = vrot.lane.b32.xlu1 %v9854_v37, %s9621_s13 }
 0x726   : > { %2038 = vrot.lane.b32.xlu0 %v9876_v57, %s9622_s14 }
 0x729   : > { %2247 = vrot.lane.b32.xlu1 %v9846_v29, %s9622_s14 }
 0x72a   : > { %8939 = vrot.lane.b32.xlu0 %v9857_v40, %s9621_s13  ;;  %s9635_s13 = smov 40  }
 0x72d   : > { %2251 = vrot.lane.b32.xlu1 %v9896_v32, %s9622_s14 }
 0x72e   : > { %2249 = vrot.lane.b32.xlu0 %v9894_v4, %s9622_s14 }
 0x731   : > { %2255 = vrot.lane.b32.xlu1 %v9904_v25, %s9622_s14 }
 0x732   : > { %2253 = vrot.lane.b32.xlu0 %v9902_v5, %s9622_s14 }
 0x735   : > { %2259 = vrot.lane.b32.xlu1 %v9912_v7, %s9622_s14 }
 0x736   : > { %2257 = vrot.lane.b32.xlu0 %v9910_v6, %s9622_s14 }
 0x73a   : > { %2261 = vrot.lane.b32.xlu0 %v9918_v8, %s9622_s14  ;;  %s9636_s14 = smov 68  }
 0x74f   : > { %v1808_v3 = vpop.xlane.xlu1 %1807 }
 0x750   : > { %v1805_v1 = vpop.xlane.xlu0 %1804 }
 0x754   : > { %v8895_v2 = vpop.permute.xlu0 %8894  ;;  %v1811_v22 = vpop.xlane.xlu1 %1810 }
 0x755   : > { %v8897_v38 = vunpack.i.h.bf16 %v8895_v2  ;;  %v8896_v39 = vunpack.i.l.bf16 %v8895_v2 }
 0x757   : > { %v8308_v27 = vpack.c.bf16 %v8897_v38, %v8896_v39 }
 0x758   : > { %v10193_v9 = vpop.xlane.xlu1 %1813 }
 0x759   : > { %8309 = vmatprep.subr.bf16.mxu1 %v8308_v27 }
 0x75a   : > { %8311 = vmatpush3.bf16.msra.mxu1 %v8308_v27 }
 0x75b   : > { %8343 = vmatprep.subr.bf16.mxu1 %v8308_v27 }
 0x75c   : > { %v10195_v60 = vpop.xlane.xlu1 %1816 }
 0x760   : > { %v10199_v33 = vpop.xlane.xlu1 %1819 }
 0x764   : > { %v8900_v16 = vpop.permute.xlu1 %8899 }
 0x765   : > { %v8902_v54 = vunpack.i.h.bf16 %v8900_v16  ;;  %v8901_v24 = vunpack.i.l.bf16 %v8900_v16 }
 0x767   : > { %v8346_v39 = vpack.c.bf16 %v8902_v54, %v8901_v24 }
 0x785   : > { %v1480_v36 = vpop.xlane.xlu0 %1479 }
 0x786   : > { %9298 = vrcp.f32 %v1480_v36 }
 0x787   : > { %9300 = vrcp.f32 %v1805_v1 }
 0x789   : > { %v10197_v13 = vpop.xlane.xlu0 %1822 }
 0x78d   : > { %v8905_v11 = vpop.permute.xlu0 %8904 }
 0x78e   : > { %v8907_v2 = vunpack.i.h.bf16 %v8905_v11  ;;  %v8906_v38 = vunpack.i.l.bf16 %v8905_v11 }
 0x790   : > { %v9299_v12 = vpop.eup %9298 }
 0x791   : > { %v8915_v42 = vpop.permute.xlu0 %8914  ;;  %v1485_v43 = vmul.f32 %v9299_v12, %v9291_v21  ;;  %v9301_v21 = vpop.eup %9300 }
 0x792   : > { %v8917_v19 = vunpack.i.h.bf16 %v8915_v42  ;;  %v8916_v20 = vunpack.i.l.bf16 %v8915_v42  ;;  %v1828_v1 = vmul.f32 %v9301_v21, %v10130_v18 }
 0x793   : > { %7606 = vmatprep.mubr.msk.f32.mxu1 %vm844_vm3, %v1485_v43 }
 0x794   : > { %v10202_v17 = vpack.c.bf16 %v8917_v19, %v8916_v20  ;;  %v8350_v19 = vpack.c.bf16 %v8907_v2, %v8906_v38 }
 0x795   : > { %v8920_v63 = vpop.permute.xlu0 %8919  ;;  %v1483_v31 = vpop.xlane.xlu1 %1482 }
 0x796   : > { %9302 = vrcp.f32 %v1483_v31  ;;  %8374 = vmatprep.subr.msk.bf16.mxu0 %vm9862_vm2, %v10202_v17  ;;  %v8922_v31 = vunpack.i.h.bf16 %v8920_v63 }
 0x797   : > { %8377 = vmatpush3.bf16.xpose.msk.msra.mxu0 %vm9862_vm2, %v10202_v17  ;;  %9304 = vrcp.f32 %v1808_v3 }
 0x798   : > { %9306 = vrcp.f32 %v1811_v22 }
 0x799   : > { %v8925_v10 = vpop.permute.xlu0 %8924  ;;  %v1826_v47 = vpop.xlane.xlu1 %1825  ;;  %9308 = vrcp.f32 %v10193_v9 }
 0x79a   : > { %v8927_v48 = vunpack.i.h.bf16 %v8925_v10  ;;  %v8926_v49 = vunpack.i.l.bf16 %v8925_v10  ;;  %v8921_v10 = vunpack.i.l.bf16 %v8920_v63  ;;  %9310 = vrcp.f32 %v10195_v60 }
 0x79b   : > { %9312 = vrcp.f32 %v10199_v33 }
 0x79c   : > { %v8378_v50 = vpack.c.bf16 %v8927_v48, %v8926_v49  ;;  %v8358_v22 = vpack.c.bf16 %v8922_v31, %v8921_v10  ;;  %9314 = vrcp.f32 %v10197_v13 }
 0x79d   : > { %v8930_v51 = vpop.permute.xlu0 %8929  ;;  %v8910_v55 = vpop.permute.xlu1 %8909  ;;  %9316 = vrcp.f32 %v1826_v47 }
 0x79e   : > { %v8932_v15 = vunpack.i.h.bf16 %v8930_v51  ;;  %v8931_v56 = vunpack.i.l.bf16 %v8930_v51  ;;  %8380 = vmatprep.subr.msk.bf16.mxu0 %vm9862_vm2, %v8378_v50  ;;  %v8912_v42 = vunpack.i.h.bf16 %v8910_v55  ;;  %v8911_v43 = vunpack.i.l.bf16 %v8910_v55 }
 0x79f   : > { %8383 = vmatpush3.bf16.xpose.msk.msra.mxu0 %vm9862_vm2, %v8378_v50 }
 0x7a0   : > { %v9303_v58 = vpop.eup %9302  ;;  %v8384_v41 = vpack.c.bf16 %v8932_v15, %v8931_v56  ;;  %v8354_v48 = vpack.c.bf16 %v8912_v42, %v8911_v43 }
 0x7a1   : > { %v10214_v53 = vpop.permute.xlu0 %2038  ;;  %v10216_v35 = vpop.permute.xlu1 %2036  ;;  %v1487_v62 = vmul.f32 %v9303_v58, %v10164_v0 }
 0x7a2   : > { %8386 = vmatprep.subr.msk.bf16.mxu0 %vm9862_vm2, %v8384_v41  ;;  %v9305_v63 = vpop.eup %9304 }
 0x7a3   : > { %7607 = vmatmul.mubr.msk.f32.vlgmr.msra.gmra.mrb[14].mxu1 %vm844_vm3, %v1487_v62  ;;  %v9307_v9 = vpop.eup %9306  ;;  %v1830_v60 = vmul.f32 %v9305_v63, %v10128_v14 }
 0x7a4   : > { %8345 = vmatpush3.bf16.msra.mxu1 %v8308_v27  ;;  %7661 = vmatprep.mubr.msk.f32.mxu1 %vm1125_vm4, %v1828_v1  ;;  %v9309_v49 = vpop.eup %9308  ;;  %v1832_v33 = vmul.f32 %v9307_v9, %v10136_v52 }
 0x7a5   : > { %8347 = vmatprep.subr.bf16.mxu1 %v8346_v39  ;;  %v8935_v36 = vpop.permute.xlu1 %8934  ;;  %v8940_v0 = vpop.permute.xlu0 %8939  ;;  %v1834_v13 = vmul.f32 %v9309_v49, %v10140_v30 }
 0x7a6   : > { %v8937_v12 = vunpack.i.h.bf16 %v8935_v36  ;;  %v8936_v16 = vunpack.i.l.bf16 %v8935_v36  ;;  %v8942_v27 = vunpack.i.h.bf16 %v8940_v0  ;;  %v8941_v20 = vunpack.i.l.bf16 %v8940_v0  ;;  %v9311_v50 = vpop.eup %9310 }
 0x7a7   : > { %8389 = vmatpush3.bf16.xpose.msk.msra.mxu0 %vm9862_vm2, %v8384_v41  ;;  %v9313_v47 = vpop.eup %9312  ;;  %v1836_v15 = vmul.f32 %v9311_v50, %v10144_v44 }
 0x7a8   : > { %v8390_v18 = vpack.c.bf16 %v8937_v12, %v8936_v16  ;;  %8349 = vmatpush3.bf16.msra.mxu1 %v8346_v39  ;;  %v8396_v3 = vpack.c.bf16 %v8942_v27, %v8941_v20  ;;  %v9315_v56 = vpop.eup %9314  ;;  %v1838_v52 = vmul.f32 %v9313_v47, %v10148_v45 }
 0x7a9   : > { %8351 = vmatprep.subr.bf16.mxu1 %v8350_v19  ;;  %v2248_v11 = vpop.permute.xlu1 %2247  ;;  %v2250_v51 = vpop.permute.xlu0 %2249  ;;  %v1840_v30 = vmul.f32 %v9315_v56, %v10160_v59 }
 0x7aa   : > { %8392 = vmatprep.subr.msk.bf16.mxu0 %vm9862_vm2, %v8390_v18  ;;  %7707 = vmatprep.mubr.msk.f32.mxu0 %vm758_vm1, %v2248_v11  ;;  %v9317_v21 = vpop.eup %9316 }
 0x7ab   : > { %v1842_v54 = vmul.f32 %v9317_v21, %v10168_v61 }
 0x7ac   : > { %8353 = vmatpush3.bf16.msra.mxu1 %v8350_v19 }
 0x7ad   : > { %8355 = vmatprep.subr.bf16.mxu1 %v8354_v48  ;;  %v2252_v55 = vpop.permute.xlu1 %2251  ;;  %v2254_v14 = vpop.permute.xlu0 %2253 }
 0x7af   : > { %8395 = vmatpush3.bf16.xpose.msk.msra.mxu0 %vm9862_vm2, %v8390_v18 }
 0x7b0   : > { %8357 = vmatpush3.bf16.msra.mxu1 %v8354_v48  ;;  %8398 = vmatprep.subr.msk.bf16.mxu0 %vm9862_vm2, %v8396_v3 }
 0x7b1   : > { %8359 = vmatprep.subr.bf16.mxu1 %v8358_v22  ;;  %v2256_v44 = vpop.permute.xlu1 %2255  ;;  %v2258_v24 = vpop.permute.xlu0 %2257 }
 0x7b4   : > { %8361 = vmatpush3.bf16.msra.mxu1 %v8358_v22 }
 0x7b5   : > { %8364 = vmatprep.subr.msk.bf16.mxu1 %vm9862_vm2, %v10202_v17  ;;  %v2260_v45 = vpop.permute.xlu1 %2259  ;;  %v2262_v59 = vpop.permute.xlu0 %2261 }
 0x7b7   : > { %7662 = vmatmul.mubr.msk.f32.vlgmr.msra.gmra.mrb[16].mxu1 %vm1125_vm4, %v1830_v60  ;;  %8401 = vmatpush3.bf16.xpose.msk.msra.mxu0 %vm9862_vm2, %v8396_v3 }
 0x7b8   : > { %7664 = vmatprep.mubr.msk.f32.mxu1 %vm1125_vm4, %v1832_v33 }
 0x7bb   : > { %7665 = vmatmul.mubr.msk.f32.gmra.mrb[18].mxu1 %vm1125_vm4, %v1834_v13 }
 0x7bc   : > { %7667 = vmatprep.mubr.msk.f32.mxu1 %vm1125_vm4, %v1836_v15 }
 0x7bd   : > { %8367 = vmatpush3.bf16.xpose.msk.msra.mxu1 %vm9862_vm2, %v10202_v17 }
 0x7be   : > { %7708 = vmatmul.mubr.msk.f32.vlgmr.msra.gmra.mrb[26].mxu0 %vm758_vm1, %v2250_v51 }
 0x7bf   : > { %7668 = vmatmul.mubr.msk.f32.gmra.mrb[20].mxu1 %vm1125_vm4, %v1838_v52  ;;  %7710 = vmatprep.mubr.msk.f32.mxu0 %vm758_vm1, %v2252_v55 }
 0x7c0   : > { %7670 = vmatprep.mubr.msk.f32.mxu1 %vm1125_vm4, %v1840_v30 }
 0x7c2   : > { %7711 = vmatmul.mubr.msk.f32.gmra.mrb[28].mxu0 %vm758_vm1, %v2254_v14 }
 0x7c3   : > { %7671 = vmatmul.mubr.msk.f32.gmra.mrb[22].mxu1 %vm1125_vm4, %v1842_v54  ;;  %7713 = vmatprep.mubr.msk.f32.mxu0 %vm758_vm1, %v2256_v44 }
 0x7c4   : > { %7677 = vmatprep.mubr.msk.f32.mxu1 %vm758_vm1, %v10216_v35 }
 0x7c6   : > { %7714 = vmatmul.mubr.msk.f32.gmra.mrb[30].mxu0 %vm758_vm1, %v2258_v24 }
 0x7c7   : > { %7678 = vmatmul.mubr.msk.f32.vlgmr.msra.gmra.mrb[24].mxu1 %vm758_vm1, %v10214_v53  ;;  %7716 = vmatprep.mubr.msk.f32.mxu0 %vm758_vm1, %v2260_v45 }
 0x7ca   : > { %7717 = vmatmul.mubr.msk.f32.gmra.mrb[32].mxu0 %vm758_vm1, %v2262_v59 }
 0x876   : > { %v10270_v61 = vpop.f32.mrb[14].mxu1 }
 0x877   : > { %v10272_v17 = vpop.f32.mrb[15].mxu1 }
 0x88a   : > { %v10274_v58 = vpop.f32.mrb[16].mxu1 }
 0x88b   : > { %11843 = vst [vmem:[#allocation3_spill] sm:$0xff] %v10274_v58  ;;  %v10276_v41 = vpop.f32.mrb[17].mxu1 }
 0x88e   : > { %v10278_v35 = vpop.f32.mrb[18].mxu1 }
 0x88f   : > { %11844 = vst [vmem:[#allocation4_spill] sm:$0xff] %v10278_v35  ;;  %v10280_v62 = vpop.f32.mrb[19].mxu1 }
 0x890   : > { %11845 = vst [vmem:[#allocation5_spill] sm:$0xff] %v10280_v62 }
 0x891   : > { %v7709_v1 = vpop.f32.mrb[26].mxu0 }
 0x892   : > { %v10282_v2 = vpop.f32.mrb[20].mxu1  ;;  %v2377_v53 = vpop.f32.mrb[27].mxu0  ;;  %v2419_v38 = vsel %vm1125_vm4, %v7709_v1, -inf }
 0x893   : > { %11846 = vst [vmem:[#allocation6_spill] sm:$0xff] %v10282_v2  ;;  %v10285_v39 = vpop.f32.mrb[21].mxu1  ;;  %2420 = vmax.xlane.f32.xlu1 %v2419_v38  ;;  %v2416_v10 = vsel %vm1125_vm4, %v2377_v53, -inf }
 0x894   : > { %11847 = vst [vmem:[#allocation7_spill] sm:$0xff] %v10285_v39 }
 0x895   : > { %v7712_v36 = vpop.f32.mrb[28].mxu0 }
 0x896   : > { %v10287_v12 = vpop.f32.mrb[22].mxu1  ;;  %v2387_v16 = vpop.f32.mrb[29].mxu0  ;;  %v2425_v48 = vsel %vm1125_vm4, %v7712_v36, -inf }
 0x897   : > { %11848 = vst [vmem:[#allocation8_spill] sm:$0xff] %v10287_v12  ;;  %v10289_v42 = vpop.f32.mrb[23].mxu1  ;;  %v2422_v3 = vsel %vm1125_vm4, %v2387_v16, -inf }
 0x898   : > { %11849 = vst [vmem:[#allocation9_spill] sm:$0xff] %v10289_v42 }
 0x899   : > { %v7715_v43 = vpop.f32.mrb[30].mxu0 }
 0x89a   : > { %v10291_v0 = vpop.f32.mrb[24].mxu1  ;;  %v2397_v19 = vpop.f32.mrb[31].mxu0  ;;  %v2431_v22 = vsel %vm1125_vm4, %v7715_v43, -inf }
 0x89b   : > { %v10293_v18 = vpop.f32.mrb[25].mxu1  ;;  %v2130_v11 = vsel %vm844_vm3, %v10291_v0, -inf  ;;  %v2428_v63 = vsel %vm1125_vm4, %v2397_v19, -inf }
 0x89c   : > { %2131 = vmax.xlane.f32.xlu0 %v2130_v11  ;;  %v2127_v27 = vsel %vm844_vm3, %v10293_v18, -inf }
 0x89d   : > { %2128 = vmax.xlane.f32.xlu1 %v2127_v27  ;;  %v10299_v20 = vpop.f32.mrb[32].mxu0 }
 0x89e   : > { %v10301_v31 = vpop.f32.mrb[33].mxu0  ;;  %v2437_v9 = vsel %vm1125_vm4, %v10299_v20, -inf }
 0x89f   : > { %v2434_v60 = vsel %vm1125_vm4, %v10301_v31, -inf }
 0x8a0   : > { %2417 = vmax.xlane.f32.xlu0 %v2416_v10 }
 0x8a1   : > { %2426 = vmax.xlane.f32.xlu1 %v2425_v48 }
 0x8a4   : > { %2423 = vmax.xlane.f32.xlu0 %v2422_v3 }
 0x8a5   : > { %2432 = vmax.xlane.f32.xlu1 %v2431_v22 }
 0x8a8   : > { %2429 = vmax.xlane.f32.xlu0 %v2428_v63 }
 0x8a9   : > { %2438 = vmax.xlane.f32.xlu1 %v2437_v9 }
 0x8ac   : > { %2435 = vmax.xlane.f32.xlu0 %v2434_v60 }
 0x920   : > { %v2421_v49 = vpop.xlane.xlu1 %2420 }
 0x921   : > { %v2441_v33 = vsub.f32 %v7709_v1, %v2421_v49 }
 0x923   : > { %v2450_v50 = vmul.f32 1.442695, %v2441_v33 }
 0x925   : > { %9318 = vpow2.f32 %v2450_v50 }
 0x929   : > { %v2132_v51 = vpop.xlane.xlu0 %2131 }
 0x92a   : > { %v2129_v13 = vpop.xlane.xlu1 %2128 }
 0x92b   : > { %v2133_v9 = vsub.f32 %v10293_v18, %v2129_v13 }
 0x92d   : > { %v2418_v47 = vpop.xlane.xlu0 %2417  ;;  %v2135_v49 = vmul.f32 1.442695, %v2133_v9 }
 0x92e   : > { %v2440_v55 = vsub.f32 %v2377_v53, %v2418_v47  ;;  %v2427_v15 = vpop.xlane.xlu1 %2426  ;;  %v2134_v47 = vsub.f32 %v10291_v0, %v2132_v51 }
 0x92f   : > { %v10312_v56 = vpop.eup %9318  ;;  %v2443_v52 = vsub.f32 %v7712_v36, %v2427_v15 }
 0x930   : > { %v2448_v14 = vmul.f32 1.442695, %v2440_v55  ;;  %v2467_v21 = vsel %vm1125_vm4, %v10312_v56, 0.0 }
 0x931   : > { %v2424_v30 = vpop.xlane.xlu0 %2423  ;;  %2468 = vadd.xlane.f32.xlu1 %v2467_v21  ;;  %v2454_v54 = vmul.f32 1.442695, %v2443_v52 }
 0x932   : > { %9320 = vpow2.f32 %v2448_v14  ;;  %v2442_v44 = vsub.f32 %v2387_v16, %v2424_v30  ;;  %v2433_v45 = vpop.xlane.xlu1 %2432  ;;  %v2137_v14 = vmul.f32 1.442695, %v2134_v47 }
 0x933   : > { %v2445_v53 = vsub.f32 %v7715_v43, %v2433_v45 }
 0x934   : > { %v2452_v24 = vmul.f32 1.442695, %v2442_v44 }
 0x935   : > { %v2430_v59 = vpop.xlane.xlu0 %2429  ;;  %v2458_v27 = vmul.f32 1.442695, %v2445_v53 }
 0x936   : > { %9322 = vpow2.f32 %v2452_v24  ;;  %v2444_v1 = vsub.f32 %v2397_v19, %v2430_v59  ;;  %v2439_v55 = vpop.xlane.xlu1 %2438 }
 0x937   : > { %9324 = vpow2.f32 %v2454_v54  ;;  %v2447_v52 = vsub.f32 %v10299_v20, %v2439_v55 }
 0x938   : > { %v2456_v38 = vmul.f32 1.442695, %v2444_v1 }
 0x939   : > { %v2436_v60 = vpop.xlane.xlu0 %2435  ;;  %v2462_v13 = vmul.f32 1.442695, %v2447_v52 }
 0x93a   : > { %9326 = vpow2.f32 %v2456_v38  ;;  %v2446_v33 = vsub.f32 %v10301_v31, %v2436_v60 }
 0x93b   : > { %9328 = vpow2.f32 %v2458_v27 }
 0x93c   : > { %v10316_v11 = vpop.eup %9320  ;;  %9330 = vpow2.f32 %v2135_v49  ;;  %v2460_v50 = vmul.f32 1.442695, %v2446_v33 }
 0x93d   : > { %v2464_v36 = vsel %vm1125_vm4, %v10316_v11, 0.0 }
 0x93e   : > { %2465 = vadd.xlane.f32.xlu0 %v2464_v36  ;;  %9332 = vpow2.f32 %v2460_v50 }
 0x93f   : > { %9334 = vpow2.f32 %v2137_v14 }
 0x940   : > { %v10320_v10 = vpop.eup %9322  ;;  %9336 = vpow2.f32 %v2462_v13 }
 0x941   : > { %v2470_v16 = vsel %vm1125_vm4, %v10320_v10, 0.0  ;;  %v10324_v48 = vpop.eup %9324 }
 0x942   : > { %2471 = vadd.xlane.f32.xlu1 %v2470_v16  ;;  %v2473_v43 = vsel %vm1125_vm4, %v10324_v48, 0.0 }
 0x944   : > { %v10328_v19 = vpop.eup %9326 }
 0x945   : > { %v2476_v3 = vsel %vm1125_vm4, %v10328_v19, 0.0  ;;  %v10332_v22 = vpop.eup %9328 }
 0x946   : > { %2474 = vadd.xlane.f32.xlu1 %v2473_v43  ;;  %v2479_v63 = vsel %vm1125_vm4, %v10332_v22, 0.0  ;;  %v9331_v15 = vpop.eup %9330 }
 0x947   : > { %v2139_v21 = vsel %vm844_vm3, %v9331_v15, 0.0 }
 0x948   : > { %v10345_v18 = vpop.eup %9332 }
 0x949   : > { %v2482_v31 = vsel %vm1125_vm4, %v10345_v18, 0.0  ;;  %v10349_v30 = vpop.eup %9334 }
 0x94a   : > { %2477 = vadd.xlane.f32.xlu1 %v2476_v3  ;;  %v2142_v0 = vsel %vm844_vm3, %v10349_v30, 0.0  ;;  %v10353_v51 = vpop.eup %9336 }
 0x94b   : > { %v2485_v20 = vsel %vm1125_vm4, %v10353_v51, 0.0 }
 0x94e   : > { %2480 = vadd.xlane.f32.xlu1 %v2479_v63 }
 0x954   : > { %8944 = vrot.lane.b32.xlu0 %v9837_v23, %s9623_s15 }
 0x95f   : > { %8949 = vrot.lane.b32.xlu1 %v9844_v28, %s9623_s15 }
 0x973   : > { %2140 = vadd.xlane.f32.xlu0 %v2139_v21 }
 0x977   : > { %2483 = vadd.xlane.f32.xlu0 %v2482_v31 }
 0x983   : > { %2143 = vadd.xlane.f32.xlu1 %v2142_v0 }
 0x987   : > { %2486 = vadd.xlane.f32.xlu1 %v2485_v20 }
 0x98d   : > { %8954 = vrot.lane.b32.xlu0 %v9851_v34, %s9623_s15 }
 0x991   : > { %8964 = vrot.lane.b32.xlu0 %v9837_v23, %s9624_s16 }
 0x995   : > { %8969 = vrot.lane.b32.xlu0 %v9857_v40, %s9623_s15 }
 0x998   : > { %8959 = vrot.lane.b32.xlu1 %v9854_v37, %s9623_s15  ;;  %s9637_s15 = smov 100  }
 0x999   : > { %8974 = vrot.lane.b32.xlu0 %v9844_v28, %s9624_s16 }
 0x99c   : > { %2697 = vrot.lane.b32.xlu1 %v9839_v26, %s9625_s17 }
 0x99d   : > { %8979 = vrot.lane.b32.xlu0 %v9851_v34, %s9624_s16 }
 0x9a0   : > { %8984 = vrot.lane.b32.xlu1 %v9854_v37, %s9624_s16 }
 0x9a1   : > { %2699 = vrot.lane.b32.xlu0 %v9876_v57, %s9625_s17 }
 0x9a4   : > { %2908 = vrot.lane.b32.xlu1 %v9846_v29, %s9625_s17 }
 0x9a5   : > { %8989 = vrot.lane.b32.xlu0 %v9857_v40, %s9624_s16  ;;  %s9638_s16 = smov 36  }
 0x9a8   : > { %2912 = vrot.lane.b32.xlu1 %v9896_v32, %s9625_s17 }
 0x9a9   : > { %2910 = vrot.lane.b32.xlu0 %v9894_v4, %s9625_s17 }
 0x9ac   : > { %2916 = vrot.lane.b32.xlu1 %v9904_v25, %s9625_s17 }
 0x9ad   : > { %2914 = vrot.lane.b32.xlu0 %v9902_v5, %s9625_s17 }
 0x9b0   : > { %2920 = vrot.lane.b32.xlu1 %v9912_v7, %s9625_s17 }
 0x9b1   : > { %2918 = vrot.lane.b32.xlu0 %v9910_v6, %s9625_s17 }
 0x9b5   : > { %2922 = vrot.lane.b32.xlu0 %v9918_v8, %s9625_s17  ;;  %s9639_s17 = smov 4  }
 0x9be   : > { %v2469_v1 = vpop.xlane.xlu1 %2468 }
 0x9cb   : > { %v2466_v44 = vpop.xlane.xlu0 %2465 }
 0x9cf   : > { %v8945_v54 = vpop.permute.xlu0 %8944  ;;  %v2472_v53 = vpop.xlane.xlu1 %2471 }
 0x9d0   : > { %v8947_v24 = vunpack.i.h.bf16 %v8945_v54  ;;  %v8946_v45 = vunpack.i.l.bf16 %v8945_v54 }
 0x9d2   : > { %v8368_v59 = vpack.c.bf16 %v8947_v24, %v8946_v45 }
 0x9d3   : > { %v10378_v38 = vpop.xlane.xlu1 %2474 }
 0x9d4   : > { %8369 = vmatprep.subr.bf16.mxu1 %v8368_v59 }
 0x9d5   : > { %8371 = vmatpush3.bf16.msra.mxu1 %v8368_v59 }
 0x9d6   : > { %8403 = vmatprep.subr.bf16.mxu1 %v8368_v59 }
 0x9d7   : > { %v10380_v27 = vpop.xlane.xlu1 %2477 }
 0x9db   : > { %v10384_v43 = vpop.xlane.xlu1 %2480 }
 0x9df   : > { %v8950_v9 = vpop.permute.xlu1 %8949 }
 0x9e0   : > { %v8952_v45 = vunpack.i.h.bf16 %v8950_v9 }
 0xa00   : > { %v2141_v36 = vpop.xlane.xlu0 %2140 }
 0xa01   : > { %9338 = vrcp.f32 %v2141_v36  ;;  %v8951_v36 = vunpack.i.l.bf16 %v8950_v9 }
 0xa02   : > { %9340 = vrcp.f32 %v2466_v44 }
 0xa03   : > { %v8406_v9 = vpack.c.bf16 %v8952_v45, %v8951_v36 }
 0xa04   : > { %v10382_v16 = vpop.xlane.xlu0 %2483 }
 0xa08   : > { %v8955_v3 = vpop.permute.xlu0 %8954 }
 0xa0b   : > { %v9339_v63 = vpop.eup %9338 }
 0xa0c   : > { %v8965_v60 = vpop.permute.xlu0 %8964  ;;  %v2146_v49 = vmul.f32 %v9339_v63, %v9331_v15  ;;  %v9341_v24 = vpop.eup %9340 }
 0xa0d   : > { %v8967_v33 = vunpack.i.h.bf16 %v8965_v60  ;;  %v8966_v50 = vunpack.i.l.bf16 %v8965_v60 }
 0xa0e   : > { %7684 = vmatprep.mubr.msk.f32.mxu1 %vm844_vm3, %v2146_v49 }
 0xa0f   : > { %v10387_v47 = vpack.c.bf16 %v8967_v33, %v8966_v50 }
 0xa10   : > { %v8970_v55 = vpop.permute.xlu0 %8969  ;;  %v2144_v14 = vpop.xlane.xlu1 %2143 }
 0xa11   : > { %9342 = vrcp.f32 %v2144_v14  ;;  %8434 = vmatprep.subr.msk.bf16.mxu0 %vm9862_vm2, %v10387_v47  ;;  %v2489_v14 = vmul.f32 %v9341_v24, %v10316_v11  ;;  %v8972_v45 = vunpack.i.h.bf16 %v8970_v55 }
 0xa12   : > { %8437 = vmatpush3.bf16.xpose.msk.msra.mxu0 %vm9862_vm2, %v10387_v47  ;;  %9344 = vrcp.f32 %v2469_v1 }
 0xa13   : > { %9346 = vrcp.f32 %v2472_v53 }
 0xa14   : > { %v8975_v52 = vpop.permute.xlu0 %8974  ;;  %v2487_v15 = vpop.xlane.xlu1 %2486  ;;  %9348 = vrcp.f32 %v10378_v38 }
 0xa15   : > { %v8977_v21 = vunpack.i.h.bf16 %v8975_v52  ;;  %v8976_v13 = vunpack.i.l.bf16 %v8975_v52  ;;  %v8957_v52 = vunpack.i.h.bf16 %v8955_v3  ;;  %9350 = vrcp.f32 %v10380_v27 }
 0xa16   : > { %9352 = vrcp.f32 %v10384_v43 }
 0xa17   : > { %v8438_v31 = vpack.c.bf16 %v8977_v21, %v8976_v13  ;;  %v8956_v21 = vunpack.i.l.bf16 %v8955_v3  ;;  %9354 = vrcp.f32 %v10382_v16 }
 0xa18   : > { %v8980_v0 = vpop.permute.xlu0 %8979  ;;  %v8960_v20 = vpop.permute.xlu1 %8959  ;;  %9356 = vrcp.f32 %v2487_v15 }
 0xa19   : > { %v8982_v54 = vunpack.i.h.bf16 %v8980_v0  ;;  %v8981_v44 = vunpack.i.l.bf16 %v8980_v0  ;;  %8440 = vmatprep.subr.msk.bf16.mxu0 %vm9862_vm2, %v8438_v31 }
 0xa1a   : > { %8443 = vmatpush3.bf16.xpose.msk.msra.mxu0 %vm9862_vm2, %v8438_v31 }
 0xa1b   : > { %v9343_v63 = vpop.eup %9342  ;;  %v8444_v60 = vpack.c.bf16 %v8982_v54, %v8981_v44  ;;  %v8962_v54 = vunpack.i.h.bf16 %v8960_v20  ;;  %v8961_v44 = vunpack.i.l.bf16 %v8960_v20  ;;  %v8971_v20 = vunpack.i.l.bf16 %v8970_v55 }
 0xa1c   : > { %v10399_v49 = vpop.permute.xlu0 %2699  ;;  %v10401_v33 = vpop.permute.xlu1 %2697  ;;  %v2148_v50 = vmul.f32 %v9343_v63, %v10349_v30  ;;  %v8410_v63 = vpack.c.bf16 %v8957_v52, %v8956_v21 }
 0xa1d   : > { %8446 = vmatprep.subr.msk.bf16.mxu0 %vm9862_vm2, %v8444_v60  ;;  %v8414_v36 = vpack.c.bf16 %v8962_v54, %v8961_v44  ;;  %v8418_v53 = vpack.c.bf16 %v8972_v45, %v8971_v20  ;;  %v9345_v55 = vpop.eup %9344 }
 0xa1e   : > { %7685 = vmatmul.mubr.msk.f32.vlgmr.msra.gmra.mrb[26].mxu1 %vm844_vm3, %v2148_v50  ;;  %v9347_v38 = vpop.eup %9346  ;;  %v2491_v27 = vmul.f32 %v9345_v55, %v10312_v56 }
 0xa1f   : > { %8405 = vmatpush3.bf16.msra.mxu1 %v8368_v59  ;;  %7739 = vmatprep.mubr.msk.f32.mxu1 %vm1125_vm4, %v2489_v14  ;;  %v2493_v43 = vmul.f32 %v9347_v38, %v10320_v10 }
 0xa20   : > { %8407 = vmatprep.subr.bf16.mxu1 %v8406_v9  ;;  %v8985_v13 = vpop.permute.xlu1 %8984  ;;  %v8990_v30 = vpop.permute.xlu0 %8989 }
 0xa21   : > { %v8987_v31 = vunpack.i.h.bf16 %v8985_v13  ;;  %v8986_v0 = vunpack.i.l.bf16 %v8985_v13  ;;  %v8992_v59 = vunpack.i.h.bf16 %v8990_v30  ;;  %v8991_v24 = vunpack.i.l.bf16 %v8990_v30 }
 0xa22   : > { %8449 = vmatpush3.bf16.xpose.msk.msra.mxu0 %vm9862_vm2, %v8444_v60  ;;  %v9349_v60 = vpop.eup %9348 }
 0xa23   : > { %v8450_v11 = vpack.c.bf16 %v8987_v31, %v8986_v0  ;;  %8409 = vmatpush3.bf16.msra.mxu1 %v8406_v9  ;;  %v8456_v1 = vpack.c.bf16 %v8992_v59, %v8991_v24  ;;  %v9351_v50 = vpop.eup %9350  ;;  %v2495_v16 = vmul.f32 %v9349_v60, %v10324_v48 }
 0xa24   : > { %8411 = vmatprep.subr.bf16.mxu1 %v8410_v63  ;;  %v2909_v3 = vpop.permute.xlu1 %2908  ;;  %v2911_v14 = vpop.permute.xlu0 %2910  ;;  %v2497_v21 = vmul.f32 %v9351_v50, %v10328_v19 }
 0xa25   : > { %8452 = vmatprep.subr.msk.bf16.mxu0 %vm9862_vm2, %v8450_v11  ;;  %7785 = vmatprep.mubr.msk.f32.mxu0 %vm758_vm1, %v2909_v3  ;;  %v9353_v15 = vpop.eup %9352 }
 0xa26   : > { %v9355_v9 = vpop.eup %9354  ;;  %v2499_v10 = vmul.f32 %v9353_v15, %v10332_v22 }
 0xa27   : > { %8413 = vmatpush3.bf16.msra.mxu1 %v8410_v63  ;;  %v9357_v13 = vpop.eup %9356  ;;  %v2501_v48 = vmul.f32 %v9355_v9, %v10345_v18 }
 0xa28   : > { %8415 = vmatprep.subr.bf16.mxu1 %v8414_v36  ;;  %v2913_v52 = vpop.permute.xlu1 %2912  ;;  %v2915_v56 = vpop.permute.xlu0 %2914  ;;  %v2503_v31 = vmul.f32 %v9357_v13, %v10353_v51 }
 0xa2a   : > { %8455 = vmatpush3.bf16.xpose.msk.msra.mxu0 %vm9862_vm2, %v8450_v11 }
 0xa2b   : > { %8417 = vmatpush3.bf16.msra.mxu1 %v8414_v36  ;;  %8458 = vmatprep.subr.msk.bf16.mxu0 %vm9862_vm2, %v8456_v1 }
 0xa2c   : > { %8419 = vmatprep.subr.bf16.mxu1 %v8418_v53  ;;  %v2917_v19 = vpop.permute.xlu1 %2916  ;;  %v2919_v0 = vpop.permute.xlu0 %2918 }
 0xa2f   : > { %8421 = vmatpush3.bf16.msra.mxu1 %v8418_v53 }
 0xa30   : > { %8424 = vmatprep.subr.msk.bf16.mxu1 %vm9862_vm2, %v10387_v47  ;;  %v2921_v22 = vpop.permute.xlu1 %2920  ;;  %v2923_v18 = vpop.permute.xlu0 %2922 }
 0xa32   : > { %7740 = vmatmul.mubr.msk.f32.vlgmr.msra.gmra.mrb[28].mxu1 %vm1125_vm4, %v2491_v27  ;;  %8461 = vmatpush3.bf16.xpose.msk.msra.mxu0 %vm9862_vm2, %v8456_v1 }
 0xa33   : > { %7742 = vmatprep.mubr.msk.f32.mxu1 %vm1125_vm4, %v2493_v43 }
 0xa36   : > { %7743 = vmatmul.mubr.msk.f32.gmra.mrb[30].mxu1 %vm1125_vm4, %v2495_v16 }
 0xa37   : > { %7745 = vmatprep.mubr.msk.f32.mxu1 %vm1125_vm4, %v2497_v21 }
 0xa38   : > { %8427 = vmatpush3.bf16.xpose.msk.msra.mxu1 %vm9862_vm2, %v10387_v47 }
 0xa39   : > { %7786 = vmatmul.mubr.msk.f32.vlgmr.msra.gmra.mrb[34].mxu0 %vm758_vm1, %v2911_v14 }
 0xa3a   : > { %7746 = vmatmul.mubr.msk.f32.gmra.mrb[32].mxu1 %vm1125_vm4, %v2499_v10  ;;  %7788 = vmatprep.mubr.msk.f32.mxu0 %vm758_vm1, %v2913_v52 }
 0xa3b   : > { %7748 = vmatprep.mubr.msk.f32.mxu1 %vm1125_vm4, %v2501_v48 }
 0xa3d   : > { %7789 = vmatmul.mubr.msk.f32.gmra.mrb[36].mxu0 %vm758_vm1, %v2915_v56 }
 0xa3e   : > { %7749 = vmatmul.mubr.msk.f32.gmra.mrb[34].mxu1 %vm1125_vm4, %v2503_v31  ;;  %7791 = vmatprep.mubr.msk.f32.mxu0 %vm758_vm1, %v2917_v19 }
 0xa3f   : > { %7755 = vmatprep.mubr.msk.f32.mxu1 %vm758_vm1, %v10401_v33 }
 0xa41   : > { %7792 = vmatmul.mubr.msk.f32.gmra.mrb[38].mxu0 %vm758_vm1, %v2919_v0 }
 0xa42   : > { %7756 = vmatmul.mubr.msk.f32.vlgmr.msra.gmra.mrb[36].mxu1 %vm758_vm1, %v10399_v49  ;;  %7794 = vmatprep.mubr.msk.f32.mxu0 %vm758_vm1, %v2921_v22 }
 0xa45   : > { %7795 = vmatmul.mubr.msk.f32.gmra.mrb[40].mxu0 %vm758_vm1, %v2923_v18 }
 0xaf1   : > { %v10455_v51 = vpop.f32.mrb[26].mxu1 }
 0xaf2   : > { %v10457_v47 = vpop.f32.mrb[27].mxu1 }
 0xb05   : > { %v10459_v54 = vpop.f32.mrb[28].mxu1 }
 0xb06   : > { %11850 = vst [vmem:[#allocation10_spill] sm:$0xff] %v10459_v54  ;;  %v10461_v44 = vpop.f32.mrb[29].mxu1 }
 0xb09   : > { %v10463_v33 = vpop.f32.mrb[30].mxu1 }
 0xb0a   : > { %11851 = vst [vmem:[#allocation11_spill] sm:$0xff] %v10463_v33  ;;  %v10465_v30 = vpop.f32.mrb[31].mxu1 }
 0xb0b   : > { %11852 = vst [vmem:[#allocation12_spill] sm:$0xff] %v10465_v30 }
 0xb0c   : > { %v7787_v63 = vpop.f32.mrb[34].mxu0 }
 0xb0d   : > { %v10467_v11 = vpop.f32.mrb[32].mxu1  ;;  %v3038_v49 = vpop.f32.mrb[35].mxu0  ;;  %v3080_v3 = vsel %vm1125_vm4, %v7787_v63, -inf }
 0xb0e   : > { %11853 = vst [vmem:[#allocation13_spill] sm:$0xff] %v10467_v11  ;;  %v10470_v59 = vpop.f32.mrb[33].mxu1  ;;  %3081 = vmax.xlane.f32.xlu1 %v3080_v3  ;;  %v3077_v14 = vsel %vm1125_vm4, %v3038_v49, -inf }
 0xb0f   : > { %11854 = vst [vmem:[#allocation14_spill] sm:$0xff] %v10470_v59 }
 0xb10   : > { %v7790_v24 = vpop.f32.mrb[36].mxu0 }
 0xb11   : > { %v10472_v45 = vpop.f32.mrb[34].mxu1  ;;  %v3048_v20 = vpop.f32.mrb[37].mxu0  ;;  %v3086_v16 = vsel %vm1125_vm4, %v7790_v24, -inf }
 0xb12   : > { %11855 = vst [vmem:[#allocation15_spill] sm:$0xff] %v10472_v45  ;;  %v10474_v36 = vpop.f32.mrb[35].mxu1  ;;  %v3083_v15 = vsel %vm1125_vm4, %v3048_v20, -inf }
 0xb13   : > { %11856 = vst [vmem:[#allocation16_spill] sm:$0xff] %v10474_v36 }
 0xb14   : > { %v7793_v1 = vpop.f32.mrb[38].mxu0 }
 0xb15   : > { %v10476_v53 = vpop.f32.mrb[36].mxu1  ;;  %v3058_v55 = vpop.f32.mrb[39].mxu0  ;;  %v3092_v52 = vsel %vm1125_vm4, %v7793_v1, -inf }
 0xb16   : > { %v10478_v38 = vpop.f32.mrb[37].mxu1  ;;  %v2791_v27 = vsel %vm844_vm3, %v10476_v53, -inf  ;;  %v3089_v21 = vsel %vm1125_vm4, %v3058_v55, -inf }
 0xb17   : > { %2792 = vmax.xlane.f32.xlu0 %v2791_v27  ;;  %v2788_v60 = vsel %vm844_vm3, %v10478_v38, -inf }
 0xb18   : > { %2789 = vmax.xlane.f32.xlu1 %v2788_v60  ;;  %v10484_v43 = vpop.f32.mrb[40].mxu0 }
 0xb19   : > { %v10486_v50 = vpop.f32.mrb[41].mxu0  ;;  %v3098_v9 = vsel %vm1125_vm4, %v10484_v43, -inf }
 0xb1a   : > { %v3095_v56 = vsel %vm1125_vm4, %v10486_v50, -inf }
 0xb1b   : > { %3078 = vmax.xlane.f32.xlu0 %v3077_v14 }
 0xb1c   : > { %3087 = vmax.xlane.f32.xlu1 %v3086_v16 }
 0xb1f   : > { %3084 = vmax.xlane.f32.xlu0 %v3083_v15 }
 0xb20   : > { %3093 = vmax.xlane.f32.xlu1 %v3092_v52 }
 0xb23   : > { %3090 = vmax.xlane.f32.xlu0 %v3089_v21 }
 0xb24   : > { %3099 = vmax.xlane.f32.xlu1 %v3098_v9 }
 0xb27   : > { %3096 = vmax.xlane.f32.xlu0 %v3095_v56 }
 0xb9b   : > { %v3082_v10 = vpop.xlane.xlu1 %3081 }
 0xb9c   : > { %v3102_v13 = vsub.f32 %v7787_v63, %v3082_v10 }
 0xb9e   : > { %v3111_v48 = vmul.f32 1.442695, %v3102_v13 }
 0xba0   : > { %9358 = vpow2.f32 %v3111_v48 }
 0xba4   : > { %v2793_v19 = vpop.xlane.xlu0 %2792 }
 0xba5   : > { %v2790_v31 = vpop.xlane.xlu1 %2789 }
 0xba8   : > { %v3079_v0 = vpop.xlane.xlu0 %3078 }
 0xba9   : > { %v3101_v22 = vsub.f32 %v3038_v49, %v3079_v0  ;;  %v3088_v18 = vpop.xlane.xlu1 %3087 }
 0xbaa   : > { %v10497_v3 = vpop.eup %9358  ;;  %v3104_v60 = vsub.f32 %v7790_v24, %v3088_v18 }
 0xbab   : > { %v3109_v27 = vmul.f32 1.442695, %v3101_v22  ;;  %v3128_v14 = vsel %vm1125_vm4, %v10497_v3, 0.0 }
 0xbac   : > { %v3085_v16 = vpop.xlane.xlu0 %3084  ;;  %3129 = vadd.xlane.f32.xlu1 %v3128_v14  ;;  %v3115_v52 = vmul.f32 1.442695, %v3104_v60  ;;  %v2794_v14 = vsub.f32 %v10478_v38, %v2790_v31 }
 0xbad   : > { %9360 = vpow2.f32 %v3109_v27  ;;  %v3103_v15 = vsub.f32 %v3048_v20, %v3085_v16  ;;  %v3094_v21 = vpop.xlane.xlu1 %3093 }
 0xbae   : > { %v3106_v49 = vsub.f32 %v7793_v1, %v3094_v21  ;;  %v2795_v21 = vsub.f32 %v10476_v53, %v2793_v19 }
 0xbaf   : > { %v3113_v63 = vmul.f32 1.442695, %v3103_v15  ;;  %v2796_v15 = vmul.f32 1.442695, %v2794_v14 }
 0xbb0   : > { %v3091_v9 = vpop.xlane.xlu0 %3090  ;;  %v3119_v48 = vmul.f32 1.442695, %v3106_v49  ;;  %v2798_v49 = vmul.f32 1.442695, %v2795_v21 }
 0xbb1   : > { %9362 = vpow2.f32 %v3113_v63  ;;  %v3105_v56 = vsub.f32 %v3058_v55, %v3091_v9  ;;  %v3100_v9 = vpop.xlane.xlu1 %3099 }
 0xbb2   : > { %9364 = vpow2.f32 %v3115_v52 }
 0xbb3   : > { %v3117_v10 = vmul.f32 1.442695, %v3105_v56 }
 0xbb4   : > { %v3097_v16 = vpop.xlane.xlu0 %3096 }
 0xbb5   : > { %9366 = vpow2.f32 %v3117_v10  ;;  %v3107_v52 = vsub.f32 %v10486_v50, %v3097_v16  ;;  %v3108_v10 = vsub.f32 %v10484_v43, %v3100_v9 }
 0xbb6   : > { %9368 = vpow2.f32 %v3119_v48 }
 0xbb7   : > { %v10501_v13 = vpop.eup %9360  ;;  %9370 = vpow2.f32 %v2796_v15  ;;  %v3121_v63 = vmul.f32 1.442695, %v3107_v52  ;;  %v3123_v31 = vmul.f32 1.442695, %v3108_v10 }
 0xbb8   : > { %v3125_v24 = vsel %vm1125_vm4, %v10501_v13, 0.0 }
 0xbb9   : > { %3126 = vadd.xlane.f32.xlu0 %v3125_v24  ;;  %9372 = vpow2.f32 %v3121_v63 }
 0xbba   : > { %9374 = vpow2.f32 %v2798_v49 }
 0xbbb   : > { %v10505_v0 = vpop.eup %9362  ;;  %9376 = vpow2.f32 %v3123_v31 }
 0xbbc   : > { %v3131_v20 = vsel %vm1125_vm4, %v10505_v0, 0.0  ;;  %v10509_v22 = vpop.eup %9364 }
 0xbbd   : > { %3132 = vadd.xlane.f32.xlu1 %v3131_v20  ;;  %v3134_v1 = vsel %vm1125_vm4, %v10509_v22, 0.0 }
 0xbbf   : > { %v10513_v55 = vpop.eup %9366 }
 0xbc0   : > { %v3137_v18 = vsel %vm1125_vm4, %v10513_v55, 0.0  ;;  %v10517_v27 = vpop.eup %9368 }
 0xbc1   : > { %3135 = vadd.xlane.f32.xlu1 %v3134_v1  ;;  %v3140_v60 = vsel %vm1125_vm4, %v10517_v27, 0.0  ;;  %v9371_v56 = vpop.eup %9370 }
 0xbc2   : > { %v2800_v48 = vsel %vm844_vm3, %v9371_v56, 0.0 }
 0xbc3   : > { %v10530_v38 = vpop.eup %9372 }
 0xbc4   : > { %v3143_v50 = vsel %vm1125_vm4, %v10530_v38, 0.0  ;;  %v10534_v24 = vpop.eup %9374 }
 0xbc5   : > { %3138 = vadd.xlane.f32.xlu1 %v3137_v18  ;;  %v2803_v53 = vsel %vm844_vm3, %v10534_v24, 0.0  ;;  %v10538_v19 = vpop.eup %9376 }
 0xbc6   : > { %v3146_v43 = vsel %vm1125_vm4, %v10538_v19, 0.0 }
 0xbc9   : > { %3141 = vadd.xlane.f32.xlu1 %v3140_v60 }
 0xbcf   : > { %8994 = vrot.lane.b32.xlu0 %v9837_v23, %s9626_s18 }
 0xbda   : > { %8999 = vrot.lane.b32.xlu1 %v9844_v28, %s9626_s18 }
 0xbee   : > { %2801 = vadd.xlane.f32.xlu0 %v2800_v48 }
 0xbf2   : > { %3144 = vadd.xlane.f32.xlu0 %v3143_v50 }
 0xbfe   : > { %2804 = vadd.xlane.f32.xlu1 %v2803_v53 }
 0xc02   : > { %3147 = vadd.xlane.f32.xlu1 %v3146_v43 }
 0xc08   : > { %9004 = vrot.lane.b32.xlu0 %v9851_v34, %s9626_s18 }
 0xc0c   : > { %9014 = vrot.lane.b32.xlu0 %v9837_v23, %s9627_s19 }
 0xc10   : > { %9019 = vrot.lane.b32.xlu0 %v9857_v40, %s9626_s18 }
 0xc13   : > { %9009 = vrot.lane.b32.xlu1 %v9854_v37, %s9626_s18  ;;  %s9640_s18 = smov 8  }
 0xc14   : > { %9024 = vrot.lane.b32.xlu0 %v9844_v28, %s9627_s19 }
 0xc17   : > { %3358 = vrot.lane.b32.xlu1 %v9839_v26, %s9628_s20 }
 0xc18   : > { %9029 = vrot.lane.b32.xlu0 %v9851_v34, %s9627_s19 }
 0xc1b   : > { %9034 = vrot.lane.b32.xlu1 %v9854_v37, %s9627_s19 }
 0xc1c   : > { %3360 = vrot.lane.b32.xlu0 %v9876_v57, %s9628_s20 }
 0xc1f   : > { %3569 = vrot.lane.b32.xlu1 %v9846_v29, %s9628_s20 }
 0xc20   : > { %9039 = vrot.lane.b32.xlu0 %v9857_v40, %s9627_s19  ;;  %s9641_s19 = smov 12  }
 0xc23   : > { %3573 = vrot.lane.b32.xlu1 %v9896_v32, %s9628_s20 }
 0xc24   : > { %3571 = vrot.lane.b32.xlu0 %v9894_v4, %s9628_s20 }
 0xc27   : > { %3577 = vrot.lane.b32.xlu1 %v9904_v25, %s9628_s20 }
 0xc28   : > { %3575 = vrot.lane.b32.xlu0 %v9902_v5, %s9628_s20 }
 0xc2b   : > { %3581 = vrot.lane.b32.xlu1 %v9912_v7, %s9628_s20 }
 0xc2c   : > { %3579 = vrot.lane.b32.xlu0 %v9910_v6, %s9628_s20 }
 0xc30   : > { %3583 = vrot.lane.b32.xlu0 %v9918_v8, %s9628_s20  ;;  %s9642_s20 = smov 16  }
 0xc39   : > { %v3130_v16 = vpop.xlane.xlu1 %3129 }
 0xc46   : > { %v3127_v20 = vpop.xlane.xlu0 %3126 }
 0xc4a   : > { %v8995_v1 = vpop.permute.xlu0 %8994  ;;  %v3133_v15 = vpop.xlane.xlu1 %3132 }
 0xc4b   : > { %v8997_v18 = vunpack.i.h.bf16 %v8995_v1  ;;  %v8996_v60 = vunpack.i.l.bf16 %v8995_v1 }
 0xc4d   : > { %v8428_v14 = vpack.c.bf16 %v8997_v18, %v8996_v60 }
 0xc4e   : > { %v10563_v52 = vpop.xlane.xlu1 %3135 }
 0xc4f   : > { %8429 = vmatprep.subr.bf16.mxu1 %v8428_v14 }
 0xc50   : > { %8431 = vmatpush3.bf16.msra.mxu1 %v8428_v14 }
 0xc51   : > { %8463 = vmatprep.subr.bf16.mxu1 %v8428_v14 }
 0xc52   : > { %v10565_v63 = vpop.xlane.xlu1 %3138 }
 0xc56   : > { %v10569_v49 = vpop.xlane.xlu1 %3141 }
 0xc5a   : > { %v9000_v31 = vpop.permute.xlu1 %8999 }
 0xc5b   : > { %v9002_v42 = vunpack.i.h.bf16 %v9000_v31  ;;  %v9001_v12 = vunpack.i.l.bf16 %v9000_v31 }
 0xc5d   : > { %v8466_v31 = vpack.c.bf16 %v9002_v42, %v9001_v12 }
 0xc7b   : > { %v2802_v21 = vpop.xlane.xlu0 %2801 }
 0xc7c   : > { %9378 = vrcp.f32 %v2802_v21 }
 0xc7d   : > { %9380 = vrcp.f32 %v3127_v20 }
 0xc7f   : > { %v10567_v9 = vpop.xlane.xlu0 %3144 }
 0xc83   : > { %v9005_v10 = vpop.permute.xlu0 %9004 }
 0xc86   : > { %v9379_v48 = vpop.eup %9378 }
 0xc87   : > { %v9015_v50 = vpop.permute.xlu0 %9014  ;;  %v2807_v53 = vmul.f32 %v9379_v48, %v9371_v56 }
 0xc88   : > { %v9017_v43 = vunpack.i.h.bf16 %v9015_v50  ;;  %v9016_v1 = vunpack.i.l.bf16 %v9015_v50 }
 0xc89   : > { %7762 = vmatprep.mubr.msk.f32.mxu1 %vm844_vm3, %v2807_v53 }
 0xc8a   : > { %v10572_v18 = vpack.c.bf16 %v9017_v43, %v9016_v1 }
 0xc8b   : > { %v9020_v60 = vpop.permute.xlu0 %9019  ;;  %v2805_v36 = vpop.xlane.xlu1 %2804 }
 0xc8c   : > { %9382 = vrcp.f32 %v2805_v36  ;;  %8494 = vmatprep.subr.msk.bf16.mxu0 %vm9862_vm2, %v10572_v18  ;;  %v9381_v36 = vpop.eup %9380 }
 0xc8d   : > { %8497 = vmatpush3.bf16.xpose.msk.msra.mxu0 %vm9862_vm2, %v10572_v18  ;;  %9384 = vrcp.f32 %v3130_v16 }
 0xc8e   : > { %9386 = vrcp.f32 %v3133_v15 }
 0xc8f   : > { %v9025_v21 = vpop.permute.xlu0 %9024  ;;  %v3148_v56 = vpop.xlane.xlu1 %3147  ;;  %9388 = vrcp.f32 %v10563_v52 }
 0xc90   : > { %v9027_v48 = vunpack.i.h.bf16 %v9025_v21  ;;  %v9026_v50 = vunpack.i.l.bf16 %v9025_v21  ;;  %9390 = vrcp.f32 %v10565_v63 }
 0xc91   : > { %9392 = vrcp.f32 %v10569_v49 }
 0xc92   : > { %v8498_v45 = vpack.c.bf16 %v9027_v48, %v9026_v50  ;;  %v3150_v48 = vmul.f32 %v9381_v36, %v10501_v13  ;;  %v9007_v50 = vunpack.i.h.bf16 %v9005_v10  ;;  %9394 = vrcp.f32 %v10567_v9 }
 0xc93   : > { %v9030_v53 = vpop.permute.xlu0 %9029  ;;  %v9010_v43 = vpop.permute.xlu1 %9009  ;;  %9396 = vrcp.f32 %v3148_v56 }
 0xc94   : > { %v9032_v1 = vunpack.i.h.bf16 %v9030_v53  ;;  %v9031_v20 = vunpack.i.l.bf16 %v9030_v53  ;;  %8500 = vmatprep.subr.msk.bf16.mxu0 %vm9862_vm2, %v8498_v45  ;;  %v9006_v53 = vunpack.i.l.bf16 %v9005_v10  ;;  %v9012_v33 = vunpack.i.h.bf16 %v9010_v43 }
 0xc95   : > { %8503 = vmatpush3.bf16.xpose.msk.msra.mxu0 %vm9862_vm2, %v8498_v45  ;;  %v9011_v35 = vunpack.i.l.bf16 %v9010_v43  ;;  %v9022_v10 = vunpack.i.h.bf16 %v9020_v60  ;;  %v9021_v43 = vunpack.i.l.bf16 %v9020_v60 }
 0xc96   : > { %v9383_v59 = vpop.eup %9382  ;;  %v8504_v11 = vpack.c.bf16 %v9032_v1, %v9031_v20 }
 0xc97   : > { %v10584_v39 = vpop.permute.xlu0 %3360  ;;  %v10586_v2 = vpop.permute.xlu1 %3358  ;;  %v2809_v21 = vmul.f32 %v9383_v59, %v10534_v24  ;;  %v8470_v24 = vpack.c.bf16 %v9007_v50, %v9006_v53  ;;  %v8474_v36 = vpack.c.bf16 %v9012_v33, %v9011_v35  ;;  %v8478_v16 = vpack.c.bf16 %v9022_v10, %v9021_v43 }
 0xc98   : > { %8506 = vmatprep.subr.msk.bf16.mxu0 %vm9862_vm2, %v8504_v11  ;;  %v9385_v35 = vpop.eup %9384 }
 0xc99   : > { %7763 = vmatmul.mubr.msk.f32.vlgmr.msra.gmra.mrb[38].mxu1 %vm844_vm3, %v2809_v21  ;;  %v9387_v33 = vpop.eup %9386  ;;  %v3152_v15 = vmul.f32 %v9385_v35, %v10497_v3 }
 0xc9a   : > { %8465 = vmatpush3.bf16.msra.mxu1 %v8428_v14  ;;  %7817 = vmatprep.mubr.msk.f32.mxu1 %vm1125_vm4, %v3150_v48  ;;  %v9389_v52 = vpop.eup %9388  ;;  %v3154_v63 = vmul.f32 %v9387_v33, %v10505_v0 }
 0xc9b   : > { %8467 = vmatprep.subr.bf16.mxu1 %v8466_v31  ;;  %v9035_v45 = vpop.permute.xlu1 %9034  ;;  %v9040_v59 = vpop.permute.xlu0 %9039  ;;  %v3156_v9 = vmul.f32 %v9389_v52, %v10509_v22 }
 0xc9c   : > { %v9037_v1 = vunpack.i.h.bf16 %v9035_v45  ;;  %v9036_v20 = vunpack.i.l.bf16 %v9035_v45  ;;  %v9042_v42 = vunpack.i.h.bf16 %v9040_v59  ;;  %v9041_v14 = vunpack.i.l.bf16 %v9040_v59  ;;  %v9391_v49 = vpop.eup %9390 }
 0xc9d   : > { %8509 = vmatpush3.bf16.xpose.msk.msra.mxu0 %vm9862_vm2, %v8504_v11  ;;  %v9393_v56 = vpop.eup %9392  ;;  %v3158_v48 = vmul.f32 %v9391_v49, %v10513_v55 }
 0xc9e   : > { %v8510_v13 = vpack.c.bf16 %v9037_v1, %v9036_v20  ;;  %8469 = vmatpush3.bf16.msra.mxu1 %v8466_v31  ;;  %v8516_v11 = vpack.c.bf16 %v9042_v42, %v9041_v14  ;;  %v9395_v50 = vpop.eup %9394  ;;  %v3160_v0 = vmul.f32 %v9393_v56, %v10517_v27 }
 0xc9f   : > { %8471 = vmatprep.subr.bf16.mxu1 %v8470_v24  ;;  %v3570_v12 = vpop.permute.xlu1 %3569  ;;  %v3572_v60 = vpop.permute.xlu0 %3571  ;;  %v3162_v22 = vmul.f32 %v9395_v50, %v10530_v38 }
 0xca0   : > { %8512 = vmatprep.subr.msk.bf16.mxu0 %vm9862_vm2, %v8510_v13  ;;  %7863 = vmatprep.mubr.msk.f32.mxu0 %vm758_vm1, %v3570_v12  ;;  %v9397_v53 = vpop.eup %9396 }
 0xca1   : > { %v3164_v31 = vmul.f32 %v9397_v53, %v10538_v19 }
 0xca2   : > { %8473 = vmatpush3.bf16.msra.mxu1 %v8470_v24 }
 0xca3   : > { %8475 = vmatprep.subr.bf16.mxu1 %v8474_v36  ;;  %v3574_v21 = vpop.permute.xlu1 %3573  ;;  %v3576_v3 = vpop.permute.xlu0 %3575 }
 0xca5   : > { %8515 = vmatpush3.bf16.xpose.msk.msra.mxu0 %vm9862_vm2, %v8510_v13 }
 0xca6   : > { %8477 = vmatpush3.bf16.msra.mxu1 %v8474_v36  ;;  %8518 = vmatprep.subr.msk.bf16.mxu0 %vm9862_vm2, %v8516_v11 }
 0xca7   : > { %8479 = vmatprep.subr.bf16.mxu1 %v8478_v16  ;;  %v3578_v55 = vpop.permute.xlu1 %3577  ;;  %v3580_v45 = vpop.permute.xlu0 %3579 }
 0xcaa   : > { %8481 = vmatpush3.bf16.msra.mxu1 %v8478_v16 }
 0xcab   : > { %8484 = vmatprep.subr.msk.bf16.mxu1 %vm9862_vm2, %v10572_v18  ;;  %v3582_v27 = vpop.permute.xlu1 %3581  ;;  %v3584_v38 = vpop.permute.xlu0 %3583 }
 0xcad   : > { %7818 = vmatmul.mubr.msk.f32.vlgmr.msra.gmra.mrb[40].mxu1 %vm1125_vm4, %v3152_v15  ;;  %8521 = vmatpush3.bf16.xpose.msk.msra.mxu0 %vm9862_vm2, %v8516_v11 }
 0xcae   : > { %7820 = vmatprep.mubr.msk.f32.mxu1 %vm1125_vm4, %v3154_v63 }
 0xcb1   : > { %7821 = vmatmul.mubr.msk.f32.gmra.mrb[42].mxu1 %vm1125_vm4, %v3156_v9 }
 0xcb2   : > { %7823 = vmatprep.mubr.msk.f32.mxu1 %vm1125_vm4, %v3158_v48 }
 0xcb3   : > { %8487 = vmatpush3.bf16.xpose.msk.msra.mxu1 %vm9862_vm2, %v10572_v18 }
 0xcb4   : > { %7864 = vmatmul.mubr.msk.f32.vlgmr.msra.gmra.mrb[42].mxu0 %vm758_vm1, %v3572_v60 }
 0xcb5   : > { %7824 = vmatmul.mubr.msk.f32.gmra.mrb[44].mxu1 %vm1125_vm4, %v3160_v0  ;;  %7866 = vmatprep.mubr.msk.f32.mxu0 %vm758_vm1, %v3574_v21 }
 0xcb6   : > { %7826 = vmatprep.mubr.msk.f32.mxu1 %vm1125_vm4, %v3162_v22 }
 0xcb8   : > { %7867 = vmatmul.mubr.msk.f32.gmra.mrb[44].mxu0 %vm758_vm1, %v3576_v3 }
 0xcb9   : > { %7827 = vmatmul.mubr.msk.f32.gmra.mrb[46].mxu1 %vm1125_vm4, %v3164_v31  ;;  %7869 = vmatprep.mubr.msk.f32.mxu0 %vm758_vm1, %v3578_v55 }
 0xcba   : > { %7833 = vmatprep.mubr.msk.f32.mxu1 %vm758_vm1, %v10586_v2 }
 0xcbc   : > { %7870 = vmatmul.mubr.msk.f32.gmra.mrb[46].mxu0 %vm758_vm1, %v3580_v45 }
 0xcbd   : > { %7834 = vmatmul.mubr.msk.f32.vlgmr.msra.gmra.mrb[48].mxu1 %vm758_vm1, %v10584_v39  ;;  %7872 = vmatprep.mubr.msk.f32.mxu0 %vm758_vm1, %v3582_v27 }
 0xcc0   : > { %7873 = vmatmul.mubr.msk.f32.gmra.mrb[48].mxu0 %vm758_vm1, %v3584_v38 }
 0xd6c   : > { %v10640_v19 = vpop.f32.mrb[38].mxu1 }
 0xd6d   : > { %v10642_v18 = vpop.f32.mrb[39].mxu1 }
 0xd80   : > { %v10644_v1 = vpop.f32.mrb[40].mxu1 }
 0xd81   : > { %11857 = vst [vmem:[#allocation17_spill] sm:$0xff] %v10644_v1  ;;  %v10646_v20 = vpop.f32.mrb[41].mxu1 }
 0xd82   : > { %11858 = vst [vmem:[#allocation18_spill] sm:$0xff] %v10646_v20 }
 0xd84   : > { %v10648_v2 = vpop.f32.mrb[42].mxu1 }
 0xd85   : > { %11859 = vst [vmem:[#allocation19_spill] sm:$0xff] %v10648_v2  ;;  %v10650_v59 = vpop.f32.mrb[43].mxu1 }
 0xd86   : > { %11860 = vst [vmem:[#allocation20_spill] sm:$0xff] %v10650_v59 }
 0xd87   : > { %v7865_v24 = vpop.f32.mrb[42].mxu0 }
 0xd88   : > { %v10652_v13 = vpop.f32.mrb[44].mxu1  ;;  %v3699_v39 = vpop.f32.mrb[43].mxu0  ;;  %v3741_v12 = vsel %vm1125_vm4, %v7865_v24, -inf }
 0xd89   : > { %11861 = vst [vmem:[#allocation21_spill] sm:$0xff] %v10652_v13  ;;  %v10655_v42 = vpop.f32.mrb[45].mxu1  ;;  %3742 = vmax.xlane.f32.xlu1 %v3741_v12  ;;  %v3738_v60 = vsel %vm1125_vm4, %v3699_v39, -inf }
 0xd8a   : > { %11862 = vst [vmem:[#allocation22_spill] sm:$0xff] %v10655_v42 }
 0xd8b   : > { %v7868_v14 = vpop.f32.mrb[44].mxu0 }
 0xd8c   : > { %v10657_v10 = vpop.f32.mrb[46].mxu1  ;;  %v3709_v43 = vpop.f32.mrb[45].mxu0  ;;  %v3747_v9 = vsel %vm1125_vm4, %v7868_v14, -inf }
 0xd8d   : > { %11863 = vst [vmem:[#allocation23_spill] sm:$0xff] %v10657_v10  ;;  %v10659_v36 = vpop.f32.mrb[47].mxu1  ;;  %v3744_v56 = vsel %vm1125_vm4, %v3709_v43, -inf }
 0xd8e   : > { %11864 = vst [vmem:[#allocation24_spill] sm:$0xff] %v10659_v36 }
 0xd8f   : > { %v7871_v11 = vpop.f32.mrb[46].mxu0 }
 0xd90   : > { %v10661_v16 = vpop.f32.mrb[48].mxu1  ;;  %v3719_v35 = vpop.f32.mrb[47].mxu0  ;;  %v3753_v21 = vsel %vm1125_vm4, %v7871_v11, -inf }
 0xd91   : > { %v10663_v33 = vpop.f32.mrb[49].mxu1  ;;  %v3452_v15 = vsel %vm844_vm3, %v10661_v16, -inf  ;;  %v3750_v48 = vsel %vm1125_vm4, %v3719_v35, -inf }
 0xd92   : > { %3453 = vmax.xlane.f32.xlu0 %v3452_v15  ;;  %v3449_v52 = vsel %vm844_vm3, %v10663_v33, -inf }
 0xd93   : > { %3450 = vmax.xlane.f32.xlu1 %v3449_v52  ;;  %v10669_v63 = vpop.f32.mrb[48].mxu0 }
 0xd94   : > { %v10671_v49 = vpop.f32.mrb[49].mxu0  ;;  %v3759_v50 = vsel %vm1125_vm4, %v10669_v63, -inf }
 0xd95   : > { %v3756_v3 = vsel %vm1125_vm4, %v10671_v49, -inf }
 0xd96   : > { %3739 = vmax.xlane.f32.xlu0 %v3738_v60 }
 0xd97   : > { %3748 = vmax.xlane.f32.xlu1 %v3747_v9 }
 0xd9a   : > { %3745 = vmax.xlane.f32.xlu0 %v3744_v56 }
 0xd9b   : > { %3754 = vmax.xlane.f32.xlu1 %v3753_v21 }
 0xd9e   : > { %3751 = vmax.xlane.f32.xlu0 %v3750_v48 }
 0xd9f   : > { %3760 = vmax.xlane.f32.xlu1 %v3759_v50 }
 0xda2   : > { %3757 = vmax.xlane.f32.xlu0 %v3756_v3 }
 0xe16   : > { %v3743_v0 = vpop.xlane.xlu1 %3742 }
 0xe17   : > { %v3763_v53 = vsub.f32 %v7865_v24, %v3743_v0 }
 0xe19   : > { %v3772_v22 = vmul.f32 1.442695, %v3763_v53 }
 0xe1b   : > { %9398 = vpow2.f32 %v3772_v22 }
 0xe1f   : > { %v3454_v55 = vpop.xlane.xlu0 %3453 }
 0xe20   : > { %v3451_v31 = vpop.xlane.xlu1 %3450 }
 0xe23   : > { %v3740_v45 = vpop.xlane.xlu0 %3739 }
 0xe24   : > { %v3762_v27 = vsub.f32 %v3699_v39, %v3740_v45  ;;  %v3749_v38 = vpop.xlane.xlu1 %3748 }
 0xe25   : > { %v10682_v12 = vpop.eup %9398  ;;  %v3765_v52 = vsub.f32 %v7868_v14, %v3749_v38 }
 0xe26   : > { %v3770_v15 = vmul.f32 1.442695, %v3762_v27  ;;  %v3789_v60 = vsel %vm1125_vm4, %v10682_v12, 0.0 }
 0xe27   : > { %v3746_v9 = vpop.xlane.xlu0 %3745  ;;  %3790 = vadd.xlane.f32.xlu1 %v3789_v60  ;;  %v3776_v21 = vmul.f32 1.442695, %v3765_v52  ;;  %v3455_v60 = vsub.f32 %v10663_v33, %v3451_v31 }
 0xe28   : > { %9400 = vpow2.f32 %v3770_v15  ;;  %v3764_v56 = vsub.f32 %v3709_v43, %v3746_v9  ;;  %v3755_v48 = vpop.xlane.xlu1 %3754 }
 0xe29   : > { %v3767_v39 = vsub.f32 %v7871_v11, %v3755_v48  ;;  %v3456_v48 = vsub.f32 %v10661_v16, %v3454_v55 }
 0xe2a   : > { %v3774_v24 = vmul.f32 1.442695, %v3764_v56  ;;  %v3457_v56 = vmul.f32 1.442695, %v3455_v60 }
 0xe2b   : > { %v3752_v50 = vpop.xlane.xlu0 %3751  ;;  %v3780_v22 = vmul.f32 1.442695, %v3767_v39  ;;  %v3459_v39 = vmul.f32 1.442695, %v3456_v48 }
 0xe2c   : > { %9402 = vpow2.f32 %v3774_v24  ;;  %v3766_v3 = vsub.f32 %v3719_v35, %v3752_v50  ;;  %v3761_v50 = vpop.xlane.xlu1 %3760 }
 0xe2d   : > { %9404 = vpow2.f32 %v3776_v21 }
 0xe2e   : > { %v3778_v0 = vmul.f32 1.442695, %v3766_v3 }
 0xe2f   : > { %v3758_v9 = vpop.xlane.xlu0 %3757 }
 0xe30   : > { %9406 = vpow2.f32 %v3778_v0  ;;  %v3768_v21 = vsub.f32 %v10671_v49, %v3758_v9  ;;  %v3769_v0 = vsub.f32 %v10669_v63, %v3761_v50 }
 0xe31   : > { %9408 = vpow2.f32 %v3780_v22 }
 0xe32   : > { %v10686_v53 = vpop.eup %9400  ;;  %9410 = vpow2.f32 %v3457_v56  ;;  %v3782_v24 = vmul.f32 1.442695, %v3768_v21  ;;  %v3784_v31 = vmul.f32 1.442695, %v3769_v0 }
 0xe33   : > { %v3786_v14 = vsel %vm1125_vm4, %v10686_v53, 0.0 }
 0xe34   : > { %3787 = vadd.xlane.f32.xlu0 %v3786_v14  ;;  %9412 = vpow2.f32 %v3782_v24 }
 0xe35   : > { %9414 = vpow2.f32 %v3459_v39 }
 0xe36   : > { %v10690_v45 = vpop.eup %9402  ;;  %9416 = vpow2.f32 %v3784_v31 }
 0xe37   : > { %v3792_v43 = vsel %vm1125_vm4, %v10690_v45, 0.0  ;;  %v10694_v27 = vpop.eup %9404 }
 0xe38   : > { %3793 = vadd.xlane.f32.xlu1 %v3792_v43  ;;  %v3795_v11 = vsel %vm1125_vm4, %v10694_v27, 0.0 }
 0xe3a   : > { %v10698_v35 = vpop.eup %9406 }
 0xe3b   : > { %v3798_v38 = vsel %vm1125_vm4, %v10698_v35, 0.0  ;;  %v10702_v15 = vpop.eup %9408 }
 0xe3c   : > { %3796 = vadd.xlane.f32.xlu1 %v3795_v11  ;;  %v3801_v52 = vsel %vm1125_vm4, %v10702_v15, 0.0  ;;  %v9411_v3 = vpop.eup %9410 }
 0xe3d   : > { %v3461_v22 = vsel %vm844_vm3, %v9411_v3, 0.0 }
 0xe3e   : > { %v10715_v33 = vpop.eup %9412 }
 0xe3f   : > { %v3804_v49 = vsel %vm1125_vm4, %v10715_v33, 0.0  ;;  %v10719_v14 = vpop.eup %9414 }
 0xe40   : > { %3799 = vadd.xlane.f32.xlu1 %v3798_v38  ;;  %v3464_v16 = vsel %vm844_vm3, %v10719_v14, 0.0  ;;  %v10723_v55 = vpop.eup %9416 }
 0xe41   : > { %v3807_v63 = vsel %vm1125_vm4, %v10723_v55, 0.0 }
 0xe44   : > { %3802 = vadd.xlane.f32.xlu1 %v3801_v52 }
 0xe4a   : > { %9044 = vrot.lane.b32.xlu0 %v9837_v23, %s9629_s22 }
 0xe55   : > { %9049 = vrot.lane.b32.xlu1 %v9844_v28, %s9629_s22 }
 0xe69   : > { %3462 = vadd.xlane.f32.xlu0 %v3461_v22 }
 0xe6d   : > { %3805 = vadd.xlane.f32.xlu0 %v3804_v49 }
 0xe79   : > { %3465 = vadd.xlane.f32.xlu1 %v3464_v16 }
 0xe7d   : > { %3808 = vadd.xlane.f32.xlu1 %v3807_v63 }
 0xe83   : > { %9054 = vrot.lane.b32.xlu0 %v9851_v34, %s9629_s22 }
 0xe87   : > { %9064 = vrot.lane.b32.xlu0 %v9837_v23, %s9630_s25 }
 0xe8b   : > { %9069 = vrot.lane.b32.xlu0 %v9857_v40, %s9629_s22 }
 0xe8e   : > { %9059 = vrot.lane.b32.xlu1 %v9854_v37, %s9629_s22  ;;  %s9643_s22 = smov 20  }
 0xe8f   : > { %9074 = vrot.lane.b32.xlu0 %v9844_v28, %s9630_s25 }
 0xe92   : > { %4019 = vrot.lane.b32.xlu1 %v9839_v26, %s9631_s26 }
 0xe93   : > { %9079 = vrot.lane.b32.xlu0 %v9851_v34, %s9630_s25 }
 0xe96   : > { %9084 = vrot.lane.b32.xlu1 %v9854_v37, %s9630_s25 }
 0xe97   : > { %4021 = vrot.lane.b32.xlu0 %v9876_v57, %s9631_s26 }
 0xe9a   : > { %4230 = vrot.lane.b32.xlu1 %v9846_v29, %s9631_s26 }
 0xe9b   : > { %9089 = vrot.lane.b32.xlu0 %v9857_v40, %s9630_s25  ;;  %s9644_s25 = smov 24  }
 0xe9e   : > { %4234 = vrot.lane.b32.xlu1 %v9896_v32, %s9631_s26 }
 0xe9f   : > { %4232 = vrot.lane.b32.xlu0 %v9894_v4, %s9631_s26 }
 0xea2   : > { %4238 = vrot.lane.b32.xlu1 %v9904_v25, %s9631_s26 }
 0xea3   : > { %4236 = vrot.lane.b32.xlu0 %v9902_v5, %s9631_s26 }
 0xea6   : > { %4242 = vrot.lane.b32.xlu1 %v9912_v7, %s9631_s26 }
 0xea7   : > { %4240 = vrot.lane.b32.xlu0 %v9910_v6, %s9631_s26 }
 0xeab   : > { %4244 = vrot.lane.b32.xlu0 %v9918_v8, %s9631_s26  ;;  %s9645_s26 = smov 28  }
 0xeb4   : > { %v3791_v9 = vpop.xlane.xlu1 %3790 }
 0xec1   : > { %v3788_v43 = vpop.xlane.xlu0 %3787 }
 0xec5   : > { %v9045_v11 = vpop.permute.xlu0 %9044  ;;  %v3794_v56 = vpop.xlane.xlu1 %3793 }
 0xec6   : > { %v9047_v38 = vunpack.i.h.bf16 %v9045_v11  ;;  %v9046_v52 = vunpack.i.l.bf16 %v9045_v11 }
 0xec8   : > { %v8488_v60 = vpack.c.bf16 %v9047_v38, %v9046_v52 }
 0xec9   : > { %v10748_v21 = vpop.xlane.xlu1 %3796 }
 0xeca   : > { %8489 = vmatprep.subr.bf16.mxu1 %v8488_v60 }
 0xecb   : > { %8491 = vmatpush3.bf16.msra.mxu1 %v8488_v60 }
 0xecc   : > { %8523 = vmatprep.subr.bf16.mxu1 %v8488_v60 }
 0xecd   : > { %v10750_v24 = vpop.xlane.xlu1 %3799 }
 0xed1   : > { %v10754_v39 = vpop.xlane.xlu1 %3802 }
 0xed5   : > { %v9050_v31 = vpop.permute.xlu1 %9049 }
 0xed6   : > { %v9052_v42 = vunpack.i.h.bf16 %v9050_v31  ;;  %v9051_v13 = vunpack.i.l.bf16 %v9050_v31 }
 0xed8   : > { %v8526_v31 = vpack.c.bf16 %v9052_v42, %v9051_v13 }
 0xef6   : > { %v3463_v48 = vpop.xlane.xlu0 %3462 }
 0xef7   : > { %9418 = vrcp.f32 %v3463_v48 }
 0xef8   : > { %9420 = vrcp.f32 %v3788_v43 }
 0xefa   : > { %v10752_v50 = vpop.xlane.xlu0 %3805 }
 0xefe   : > { %v9055_v0 = vpop.permute.xlu0 %9054 }
 0xf01   : > { %v9419_v22 = vpop.eup %9418 }
 0xf02   : > { %v9065_v49 = vpop.permute.xlu0 %9064  ;;  %v3468_v16 = vmul.f32 %v9419_v22, %v9411_v3 }
 0xf03   : > { %v9067_v63 = vunpack.i.h.bf16 %v9065_v49  ;;  %v9066_v11 = vunpack.i.l.bf16 %v9065_v49 }
 0xf04   : > { %7840 = vmatprep.mubr.msk.f32.mxu1 %vm844_vm3, %v3468_v16 }
 0xf05   : > { %v10757_v38 = vpack.c.bf16 %v9067_v63, %v9066_v11 }
 0xf06   : > { %v9070_v52 = vpop.permute.xlu0 %9069  ;;  %v3466_v36 = vpop.xlane.xlu1 %3465 }
 0xf07   : > { %9422 = vrcp.f32 %v3466_v36  ;;  %8554 = vmatprep.subr.msk.bf16.mxu0 %vm9862_vm2, %v10757_v38  ;;  %v9421_v36 = vpop.eup %9420 }
 0xf08   : > { %8557 = vmatpush3.bf16.xpose.msk.msra.mxu0 %vm9862_vm2, %v10757_v38  ;;  %9424 = vrcp.f32 %v3791_v9 }
 0xf09   : > { %9426 = vrcp.f32 %v3794_v56 }
 0xf0a   : > { %v9075_v48 = vpop.permute.xlu0 %9074  ;;  %v3809_v3 = vpop.xlane.xlu1 %3808  ;;  %9428 = vrcp.f32 %v10748_v21 }
 0xf0b   : > { %v9077_v22 = vunpack.i.h.bf16 %v9075_v48  ;;  %v9076_v49 = vunpack.i.l.bf16 %v9075_v48  ;;  %9430 = vrcp.f32 %v10750_v24 }
 0xf0c   : > { %9432 = vrcp.f32 %v10754_v39 }
 0xf0d   : > { %v8558_v10 = vpack.c.bf16 %v9077_v22, %v9076_v49  ;;  %v3811_v22 = vmul.f32 %v9421_v36, %v10686_v53  ;;  %v9057_v49 = vunpack.i.h.bf16 %v9055_v0  ;;  %9434 = vrcp.f32 %v10752_v50 }
 0xf0e   : > { %v9080_v16 = vpop.permute.xlu0 %9079  ;;  %v9060_v63 = vpop.permute.xlu1 %9059  ;;  %9436 = vrcp.f32 %v3809_v3 }
 0xf0f   : > { %v9082_v11 = vunpack.i.h.bf16 %v9080_v16  ;;  %v9081_v43 = vunpack.i.l.bf16 %v9080_v16  ;;  %8560 = vmatprep.subr.msk.bf16.mxu0 %vm9862_vm2, %v8558_v10  ;;  %v9056_v16 = vunpack.i.l.bf16 %v9055_v0  ;;  %v9062_v62 = vunpack.i.h.bf16 %v9060_v63 }
 0xf10   : > { %8563 = vmatpush3.bf16.xpose.msk.msra.mxu0 %vm9862_vm2, %v8558_v10  ;;  %v9061_v54 = vunpack.i.l.bf16 %v9060_v63  ;;  %v9072_v0 = vunpack.i.h.bf16 %v9070_v52  ;;  %v9071_v63 = vunpack.i.l.bf16 %v9070_v52 }
 0xf11   : > { %v9423_v2 = vpop.eup %9422  ;;  %v8564_v59 = vpack.c.bf16 %v9082_v11, %v9081_v43 }
 0xf12   : > { %v10769_v30 = vpop.permute.xlu0 %4021  ;;  %v10771_v1 = vpop.permute.xlu1 %4019  ;;  %v3470_v48 = vmul.f32 %v9423_v2, %v10719_v14  ;;  %v8530_v14 = vpack.c.bf16 %v9057_v49, %v9056_v16  ;;  %v8534_v36 = vpack.c.bf16 %v9062_v62, %v9061_v54  ;;  %v8538_v9 = vpack.c.bf16 %v9072_v0, %v9071_v63 }
 0xf13   : > { %8566 = vmatprep.subr.msk.bf16.mxu0 %vm9862_vm2, %v8564_v59  ;;  %v9425_v62 = vpop.eup %9424 }
 0xf14   : > { %7841 = vmatmul.mubr.msk.f32.vlgmr.msra.gmra.mrb[50].mxu1 %vm844_vm3, %v3470_v48  ;;  %v9427_v54 = vpop.eup %9426  ;;  %v3813_v56 = vmul.f32 %v9425_v62, %v10682_v12 }
 0xf15   : > { %8525 = vmatpush3.bf16.msra.mxu1 %v8488_v60  ;;  %7895 = vmatprep.mubr.msk.f32.mxu1 %vm1125_vm4, %v3811_v22  ;;  %v9429_v21 = vpop.eup %9428  ;;  %v3815_v24 = vmul.f32 %v9427_v54, %v10690_v45 }
 0xf16   : > { %8527 = vmatprep.subr.bf16.mxu1 %v8526_v31  ;;  %v9085_v10 = vpop.permute.xlu1 %9084  ;;  %v9090_v2 = vpop.permute.xlu0 %9089  ;;  %v3817_v50 = vmul.f32 %v9429_v21, %v10694_v27 }
 0xf17   : > { %v9087_v11 = vunpack.i.h.bf16 %v9085_v10  ;;  %v9086_v43 = vunpack.i.l.bf16 %v9085_v10  ;;  %v9092_v42 = vunpack.i.h.bf16 %v9090_v2  ;;  %v9091_v60 = vunpack.i.l.bf16 %v9090_v2  ;;  %v9431_v39 = vpop.eup %9430 }
 0xf18   : > { %8569 = vmatpush3.bf16.xpose.msk.msra.mxu0 %vm9862_vm2, %v8564_v59  ;;  %v9433_v3 = vpop.eup %9432  ;;  %v3819_v22 = vmul.f32 %v9431_v39, %v10698_v35 }
 0xf19   : > { %v8570_v53 = vpack.c.bf16 %v9087_v11, %v9086_v43  ;;  %8529 = vmatpush3.bf16.msra.mxu1 %v8526_v31  ;;  %v8576_v59 = vpack.c.bf16 %v9092_v42, %v9091_v60  ;;  %v9435_v49 = vpop.eup %9434  ;;  %v3821_v45 = vmul.f32 %v9433_v3, %v10702_v15 }
 0xf1a   : > { %8531 = vmatprep.subr.bf16.mxu1 %v8530_v14  ;;  %v4231_v13 = vpop.permute.xlu1 %4230  ;;  %v4233_v52 = vpop.permute.xlu0 %4232  ;;  %v3823_v27 = vmul.f32 %v9435_v49, %v10715_v33 }
 0xf1b   : > { %8572 = vmatprep.subr.msk.bf16.mxu0 %vm9862_vm2, %v8570_v53  ;;  %7941 = vmatprep.mubr.msk.f32.mxu0 %vm758_vm1, %v4231_v13  ;;  %v9437_v16 = vpop.eup %9436 }
 0xf1c   : > { %v3825_v31 = vmul.f32 %v9437_v16, %v10723_v55 }
 0xf1d   : > { %8533 = vmatpush3.bf16.msra.mxu1 %v8530_v14 }
 0xf1e   : > { %8535 = vmatprep.subr.bf16.mxu1 %v8534_v36  ;;  %v4235_v48 = vpop.permute.xlu1 %4234  ;;  %v4237_v12 = vpop.permute.xlu0 %4236 }
 0xf20   : > { %8575 = vmatpush3.bf16.xpose.msk.msra.mxu0 %vm9862_vm2, %v8570_v53 }
 0xf21   : > { %8537 = vmatpush3.bf16.msra.mxu1 %v8534_v36  ;;  %8578 = vmatprep.subr.msk.bf16.mxu0 %vm9862_vm2, %v8576_v59 }
 0xf22   : > { %8539 = vmatprep.subr.bf16.mxu1 %v8538_v9  ;;  %v4239_v35 = vpop.permute.xlu1 %4238  ;;  %v4241_v10 = vpop.permute.xlu0 %4240 }
 0xf25   : > { %8541 = vmatpush3.bf16.msra.mxu1 %v8538_v9 }
 0xf26   : > { %8544 = vmatprep.subr.msk.bf16.mxu1 %vm9862_vm2, %v10757_v38  ;;  %v4243_v15 = vpop.permute.xlu1 %4242  ;;  %v4245_v33 = vpop.permute.xlu0 %4244 }
 0xf28   : > { %7896 = vmatmul.mubr.msk.f32.vlgmr.msra.gmra.mrb[52].mxu1 %vm1125_vm4, %v3813_v56  ;;  %8581 = vmatpush3.bf16.xpose.msk.msra.mxu0 %vm9862_vm2, %v8576_v59 }
 0xf29   : > { %7898 = vmatprep.mubr.msk.f32.mxu1 %vm1125_vm4, %v3815_v24 }
 0xf2c   : > { %7899 = vmatmul.mubr.msk.f32.gmra.mrb[54].mxu1 %vm1125_vm4, %v3817_v50 }
 0xf2d   : > { %7901 = vmatprep.mubr.msk.f32.mxu1 %vm1125_vm4, %v3819_v22 }
 0xf2e   : > { %8547 = vmatpush3.bf16.xpose.msk.msra.mxu1 %vm9862_vm2, %v10757_v38 }
 0xf2f   : > { %7942 = vmatmul.mubr.msk.f32.vlgmr.msra.gmra.mrb[50].mxu0 %vm758_vm1, %v4233_v52 }
 0xf30   : > { %7902 = vmatmul.mubr.msk.f32.gmra.mrb[56].mxu1 %vm1125_vm4, %v3821_v45  ;;  %7944 = vmatprep.mubr.msk.f32.mxu0 %vm758_vm1, %v4235_v48 }
 0xf31   : > { %7904 = vmatprep.mubr.msk.f32.mxu1 %vm1125_vm4, %v3823_v27 }
 0xf33   : > { %7945 = vmatmul.mubr.msk.f32.gmra.mrb[52].mxu0 %vm758_vm1, %v4237_v12 }
 0xf34   : > { %7905 = vmatmul.mubr.msk.f32.gmra.mrb[58].mxu1 %vm1125_vm4, %v3825_v31  ;;  %7947 = vmatprep.mubr.msk.f32.mxu0 %vm758_vm1, %v4239_v35 }
 0xf35   : > { %7911 = vmatprep.mubr.msk.f32.mxu1 %vm758_vm1, %v10771_v1 }
 0xf37   : > { %7948 = vmatmul.mubr.msk.f32.gmra.mrb[54].mxu0 %vm758_vm1, %v4241_v10 }
 0xf38   : > { %7912 = vmatmul.mubr.msk.f32.vlgmr.msra.gmra.mrb[60].mxu1 %vm758_vm1, %v10769_v30  ;;  %7950 = vmatprep.mubr.msk.f32.mxu0 %vm758_vm1, %v4243_v15 }
 0xf3b   : > { %7951 = vmatmul.mubr.msk.f32.gmra.mrb[56].mxu0 %vm758_vm1, %v4245_v33 }
 0xfe7   : > { %v10825_v55 = vpop.f32.mrb[50].mxu1 }
 0xfe8   : > { %v10827_v38 = vpop.f32.mrb[51].mxu1 }
 0xffb   : > { %v10829_v11 = vpop.f32.mrb[52].mxu1 }
 0xffc   : > { %11865 = vst [vmem:[#allocation25_spill] sm:$0xff] %v10829_v11  ;;  %v10831_v43 = vpop.f32.mrb[53].mxu1 }
 0xffd   : > { %11866 = vst [vmem:[#allocation26_spill] sm:$0xff] %v10831_v43 }
 0xfff   : > { %v10833_v1 = vpop.f32.mrb[54].mxu1 }
0x1000   : > { %11867 = vst [vmem:[#allocation27_spill] sm:$0xff] %v10833_v1  ;;  %v10835_v2 = vpop.f32.mrb[55].mxu1 }
0x1001   : > { %11868 = vst [vmem:[#allocation28_spill] sm:$0xff] %v10835_v2 }
0x1002   : > { %v7943_v14 = vpop.f32.mrb[50].mxu0 }
0x1003   : > { %v10837_v53 = vpop.f32.mrb[56].mxu1  ;;  %v4360_v30 = vpop.f32.mrb[51].mxu0  ;;  %v4402_v13 = vsel %vm1125_vm4, %v7943_v14, -inf }
0x1004   : > { %11869 = vst [vmem:[#allocation29_spill] sm:$0xff] %v10837_v53  ;;  %v10840_v42 = vpop.f32.mrb[57].mxu1  ;;  %4403 = vmax.xlane.f32.xlu1 %v4402_v13  ;;  %v4399_v52 = vsel %vm1125_vm4, %v4360_v30, -inf }
0x1005   : > { %11870 = vst [vmem:[#allocation30_spill] sm:$0xff] %v10840_v42 }
0x1006   : > { %v7946_v60 = vpop.f32.mrb[52].mxu0 }
0x1007   : > { %v10842_v0 = vpop.f32.mrb[58].mxu1  ;;  %v4370_v63 = vpop.f32.mrb[53].mxu0  ;;  %v4408_v50 = vsel %vm1125_vm4, %v7946_v60, -inf }
0x1008   : > { %11871 = vst [vmem:[#allocation31_spill] sm:$0xff] %v10842_v0  ;;  %v10844_v36 = vpop.f32.mrb[59].mxu1  ;;  %v4405_v3 = vsel %vm1125_vm4, %v4370_v63, -inf }
0x1009   : > { %11872 = vst [vmem:[#allocation32_spill] sm:$0xff] %v10844_v36 }
0x100a   : > { %v7949_v59 = vpop.f32.mrb[54].mxu0 }
0x100b   : > { %v10846_v9 = vpop.f32.mrb[60].mxu1  ;;  %v4380_v62 = vpop.f32.mrb[55].mxu0  ;;  %v4414_v48 = vsel %vm1125_vm4, %v7949_v59, -inf }
0x100c   : > { %v10848_v54 = vpop.f32.mrb[61].mxu1  ;;  %v4113_v56 = vsel %vm844_vm3, %v10846_v9, -inf  ;;  %v4411_v22 = vsel %vm1125_vm4, %v4380_v62, -inf }
0x100d   : > { %4114 = vmax.xlane.f32.xlu0 %v4113_v56  ;;  %v4110_v21 = vsel %vm844_vm3, %v10848_v54, -inf }
0x100e   : > { %4111 = vmax.xlane.f32.xlu1 %v4110_v21  ;;  %v10854_v24 = vpop.f32.mrb[56].mxu0 }
0x100f   : > { %v10856_v39 = vpop.f32.mrb[57].mxu0  ;;  %v4420_v49 = vsel %vm1125_vm4, %v10854_v24, -inf }
0x1010   : > { %v4417_v12 = vsel %vm1125_vm4, %v10856_v39, -inf }
0x1011   : > { %4400 = vmax.xlane.f32.xlu0 %v4399_v52 }
0x1012   : > { %4409 = vmax.xlane.f32.xlu1 %v4408_v50 }
0x1015   : > { %4406 = vmax.xlane.f32.xlu0 %v4405_v3 }
0x1016   : > { %4415 = vmax.xlane.f32.xlu1 %v4414_v48 }
0x1019   : > { %4412 = vmax.xlane.f32.xlu0 %v4411_v22 }
0x101a   : > { %4421 = vmax.xlane.f32.xlu1 %v4420_v49 }
0x101d   : > { %4418 = vmax.xlane.f32.xlu0 %v4417_v12 }
0x1091   : > { %v4404_v45 = vpop.xlane.xlu1 %4403 }
0x1092   : > { %v4424_v16 = vsub.f32 %v7943_v14, %v4404_v45 }
0x1094   : > { %v4433_v27 = vmul.f32 1.442695, %v4424_v16 }
0x1096   : > { %9438 = vpow2.f32 %v4433_v27 }
0x109a   : > { %v4115_v35 = vpop.xlane.xlu0 %4114 }
0x109b   : > { %v4112_v31 = vpop.xlane.xlu1 %4111 }
0x109e   : > { %v4401_v10 = vpop.xlane.xlu0 %4400 }
0x109f   : > { %v4423_v15 = vsub.f32 %v4360_v30, %v4401_v10  ;;  %v4410_v33 = vpop.xlane.xlu1 %4409 }
0x10a0   : > { %v10867_v13 = vpop.eup %9438  ;;  %v4426_v21 = vsub.f32 %v7946_v60, %v4410_v33 }
0x10a1   : > { %v4431_v56 = vmul.f32 1.442695, %v4423_v15  ;;  %v4450_v52 = vsel %vm1125_vm4, %v10867_v13, 0.0 }
0x10a2   : > { %v4407_v50 = vpop.xlane.xlu0 %4406  ;;  %4451 = vadd.xlane.f32.xlu1 %v4450_v52  ;;  %v4437_v48 = vmul.f32 1.442695, %v4426_v21  ;;  %v4116_v52 = vsub.f32 %v10848_v54, %v4112_v31 }
0x10a3   : > { %9440 = vpow2.f32 %v4431_v56  ;;  %v4425_v3 = vsub.f32 %v4370_v63, %v4407_v50  ;;  %v4416_v22 = vpop.xlane.xlu1 %4415 }
0x10a4   : > { %v4428_v30 = vsub.f32 %v7949_v59, %v4416_v22  ;;  %v4117_v22 = vsub.f32 %v10846_v9, %v4115_v35 }
0x10a5   : > { %v4435_v14 = vmul.f32 1.442695, %v4425_v3  ;;  %v4118_v3 = vmul.f32 1.442695, %v4116_v52 }
0x10a6   : > { %v4413_v49 = vpop.xlane.xlu0 %4412  ;;  %v4441_v27 = vmul.f32 1.442695, %v4428_v30  ;;  %v4120_v30 = vmul.f32 1.442695, %v4117_v22 }
0x10a7   : > { %9442 = vpow2.f32 %v4435_v14  ;;  %v4427_v12 = vsub.f32 %v4380_v62, %v4413_v49  ;;  %v4422_v49 = vpop.xlane.xlu1 %4421 }
0x10a8   : > { %9444 = vpow2.f32 %v4437_v48 }
0x10a9   : > { %v4439_v45 = vmul.f32 1.442695, %v4427_v12 }
0x10aa   : > { %v4419_v50 = vpop.xlane.xlu0 %4418 }
0x10ab   : > { %9446 = vpow2.f32 %v4439_v45  ;;  %v4429_v48 = vsub.f32 %v10856_v39, %v4419_v50  ;;  %v4430_v45 = vsub.f32 %v10854_v24, %v4422_v49 }
0x10ac   : > { %9448 = vpow2.f32 %v4441_v27 }
0x10ad   : > { %v10871_v16 = vpop.eup %9440  ;;  %9450 = vpow2.f32 %v4118_v3  ;;  %v4443_v14 = vmul.f32 1.442695, %v4429_v48  ;;  %v4445_v31 = vmul.f32 1.442695, %v4430_v45 }
0x10ae   : > { %v4447_v60 = vsel %vm1125_vm4, %v10871_v16, 0.0 }
0x10af   : > { %4448 = vadd.xlane.f32.xlu0 %v4447_v60  ;;  %9452 = vpow2.f32 %v4443_v14 }
0x10b0   : > { %9454 = vpow2.f32 %v4120_v30 }
0x10b1   : > { %v10875_v10 = vpop.eup %9442  ;;  %9456 = vpow2.f32 %v4445_v31 }
0x10b2   : > { %v4453_v63 = vsel %vm1125_vm4, %v10875_v10, 0.0  ;;  %v10879_v15 = vpop.eup %9444 }
0x10b3   : > { %4454 = vadd.xlane.f32.xlu1 %v4453_v63  ;;  %v4456_v59 = vsel %vm1125_vm4, %v10879_v15, 0.0 }
0x10b5   : > { %v10883_v62 = vpop.eup %9446 }
0x10b6   : > { %v4459_v33 = vsel %vm1125_vm4, %v10883_v62, 0.0  ;;  %v10887_v56 = vpop.eup %9448 }
0x10b7   : > { %4457 = vadd.xlane.f32.xlu1 %v4456_v59  ;;  %v4462_v21 = vsel %vm1125_vm4, %v10887_v56, 0.0  ;;  %v9451_v12 = vpop.eup %9450 }
0x10b8   : > { %v4122_v27 = vsel %vm844_vm3, %v9451_v12, 0.0 }
0x10b9   : > { %v10900_v54 = vpop.eup %9452 }
0x10ba   : > { %v4465_v39 = vsel %vm1125_vm4, %v10900_v54, 0.0  ;;  %v10904_v60 = vpop.eup %9454 }
0x10bb   : > { %4460 = vadd.xlane.f32.xlu1 %v4459_v33  ;;  %v4125_v9 = vsel %vm844_vm3, %v10904_v60, 0.0  ;;  %v10908_v35 = vpop.eup %9456 }
0x10bc   : > { %v4468_v24 = vsel %vm1125_vm4, %v10908_v35, 0.0 }
0x10bf   : > { %4463 = vadd.xlane.f32.xlu1 %v4462_v21 }
0x10c5   : > { %9094 = vrot.lane.b32.xlu0 %v9837_v23, %s9632_s28 }
0x10d0   : > { %9099 = vrot.lane.b32.xlu1 %v9844_v28, %s9632_s28 }
0x10e4   : > { %4123 = vadd.xlane.f32.xlu0 %v4122_v27 }
0x10e8   : > { %4466 = vadd.xlane.f32.xlu0 %v4465_v39 }
0x10f4   : > { %4126 = vadd.xlane.f32.xlu1 %v4125_v9 }
0x10f8   : > { %4469 = vadd.xlane.f32.xlu1 %v4468_v24 }
0x10fe   : > { %9104 = vrot.lane.b32.xlu0 %v9851_v34, %s9632_s28 }
0x1102   : > { %9114 = vrot.lane.b32.xlu0 %v9837_v23, %s9633_s29 }
0x1106   : > { %9119 = vrot.lane.b32.xlu0 %v9857_v40, %s9632_s28 }
0x1109   : > { %9109 = vrot.lane.b32.xlu1 %v9854_v37, %s9632_s28  ;;  %s11793_s28 = scalar_lea.vmem %s11840_s12, %s6777_s24 }
0x110a   : > { %9124 = vrot.lane.b32.xlu0 %v9844_v28, %s9633_s29 }
0x110d   : > { %4680 = vrot.lane.b32.xlu1 %v9839_v26, %s9634_s30 }
0x110e   : > { %9129 = vrot.lane.b32.xlu0 %v9851_v34, %s9633_s29 }
0x1111   : > { %9134 = vrot.lane.b32.xlu1 %v9854_v37, %s9633_s29 }
0x1112   : > { %4682 = vrot.lane.b32.xlu0 %v9876_v57, %s9634_s30 }
0x1115   : > { %4891 = vrot.lane.b32.xlu1 %v9846_v29, %s9634_s30 }
0x1116   : > { %9139 = vrot.lane.b32.xlu0 %v9857_v40, %s9633_s29 }
0x1119   : > { %4895 = vrot.lane.b32.xlu1 %v9896_v32, %s9634_s30 }
0x111a   : > { %4893 = vrot.lane.b32.xlu0 %v9894_v4, %s9634_s30 }
0x111d   : > { %4899 = vrot.lane.b32.xlu1 %v9904_v25, %s9634_s30 }
0x111e   : > { %4897 = vrot.lane.b32.xlu0 %v9902_v5, %s9634_s30 }
0x1121   : > { %4903 = vrot.lane.b32.xlu1 %v9912_v7, %s9634_s30 }
0x1122   : > { %4901 = vrot.lane.b32.xlu0 %v9910_v6, %s9634_s30 }
0x1126   : > { %4905 = vrot.lane.b32.xlu0 %v9918_v8, %s9634_s30 }
0x112f   : > { %v4452_v50 = vpop.xlane.xlu1 %4451 }
0x113c   : > { %v4449_v63 = vpop.xlane.xlu0 %4448 }
0x1140   : > { %v9095_v59 = vpop.permute.xlu0 %9094  ;;  %v4455_v3 = vpop.xlane.xlu1 %4454 }
0x1141   : > { %v9097_v33 = vunpack.i.h.bf16 %v9095_v59  ;;  %v9096_v21 = vunpack.i.l.bf16 %v9095_v59 }
0x1143   : > { %v8548_v52 = vpack.c.bf16 %v9097_v33, %v9096_v21 }
0x1144   : > { %v10933_v48 = vpop.xlane.xlu1 %4457 }
0x1145   : > { %8549 = vmatprep.subr.bf16.mxu1 %v8548_v52 }
0x1146   : > { %8551 = vmatpush3.bf16.msra.mxu1 %v8548_v52 }
0x1147   : > { %8583 = vmatprep.subr.bf16.mxu1 %v8548_v52 }
0x1148   : > { %v10935_v14 = vpop.xlane.xlu1 %4460 }
0x114c   : > { %v10939_v30 = vpop.xlane.xlu1 %4463 }
0x1150   : > { %v9100_v31 = vpop.permute.xlu1 %9099 }
0x1151   : > { %v9102_v42 = vunpack.i.h.bf16 %v9100_v31  ;;  %v9101_v53 = vunpack.i.l.bf16 %v9100_v31 }
0x1153   : > { %v8586_v31 = vpack.c.bf16 %v9102_v42, %v9101_v53 }
0x1171   : > { %v4124_v22 = vpop.xlane.xlu0 %4123 }
0x1172   : > { %9458 = vrcp.f32 %v4124_v22 }
0x1173   : > { %9460 = vrcp.f32 %v4449_v63 }
0x1175   : > { %v10937_v49 = vpop.xlane.xlu0 %4466 }
0x1179   : > { %v9105_v45 = vpop.permute.xlu0 %9104 }
0x117c   : > { %v9459_v27 = vpop.eup %9458 }
0x117d   : > { %v9115_v39 = vpop.permute.xlu0 %9114  ;;  %v4129_v9 = vmul.f32 %v9459_v27, %v9451_v12 }
0x117e   : > { %v9117_v24 = vunpack.i.h.bf16 %v9115_v39  ;;  %v9116_v59 = vunpack.i.l.bf16 %v9115_v39 }
0x117f   : > { %7918 = vmatprep.mubr.msk.f32.mxu1 %vm844_vm3, %v4129_v9 }
0x1180   : > { %v10942_v33 = vpack.c.bf16 %v9117_v24, %v9116_v59 }
0x1181   : > { %v9120_v21 = vpop.permute.xlu0 %9119  ;;  %v4127_v0 = vpop.xlane.xlu1 %4126 }
0x1182   : > { %9462 = vrcp.f32 %v4127_v0  ;;  %8614 = vmatprep.subr.msk.bf16.mxu0 %vm9862_vm2, %v10942_v33  ;;  %v9461_v0 = vpop.eup %9460 }
0x1183   : > { %8617 = vmatpush3.bf16.xpose.msk.msra.mxu0 %vm9862_vm2, %v10942_v33  ;;  %9464 = vrcp.f32 %v4452_v50 }
0x1184   : > { %9466 = vrcp.f32 %v4455_v3 }
0x1185   : > { %v9125_v22 = vpop.permute.xlu0 %9124  ;;  %v4470_v12 = vpop.xlane.xlu1 %4469  ;;  %9468 = vrcp.f32 %v10933_v48 }
0x1186   : > { %v9127_v27 = vunpack.i.h.bf16 %v9125_v22  ;;  %v9126_v39 = vunpack.i.l.bf16 %v9125_v22  ;;  %9470 = vrcp.f32 %v10935_v14 }
0x1187   : > { %9472 = vrcp.f32 %v10939_v30 }
0x1188   : > { %v8618_v36 = vpack.c.bf16 %v9127_v27, %v9126_v39  ;;  %v4472_v27 = vmul.f32 %v9461_v0, %v10871_v16  ;;  %v9107_v39 = vunpack.i.h.bf16 %v9105_v45  ;;  %9474 = vrcp.f32 %v10937_v49 }
0x1189   : > { %v9130_v9 = vpop.permute.xlu0 %9129  ;;  %v9110_v24 = vpop.permute.xlu1 %9109  ;;  %9476 = vrcp.f32 %v4470_v12 }
0x118a   : > { %v9132_v59 = vunpack.i.h.bf16 %v9130_v9  ;;  %v9131_v63 = vunpack.i.l.bf16 %v9130_v9  ;;  %8620 = vmatprep.subr.msk.bf16.mxu0 %vm9862_vm2, %v8618_v36  ;;  %v9106_v9 = vunpack.i.l.bf16 %v9105_v45  ;;  %v9112_v20 = vunpack.i.h.bf16 %v9110_v24 }
0x118b   : > { %8623 = vmatpush3.bf16.xpose.msk.msra.mxu0 %vm9862_vm2, %v8618_v36  ;;  %v9111_v58 = vunpack.i.l.bf16 %v9110_v24  ;;  %v9122_v45 = vunpack.i.h.bf16 %v9120_v21  ;;  %v9121_v24 = vunpack.i.l.bf16 %v9120_v21 }
0x118c   : > { %v9463_v2 = vpop.eup %9462  ;;  %v8624_v1 = vpack.c.bf16 %v9132_v59, %v9131_v63 }
0x118d   : > { %v10954_v11 = vpop.permute.xlu0 %4682  ;;  %v10956_v43 = vpop.permute.xlu1 %4680  ;;  %v4131_v22 = vmul.f32 %v9463_v2, %v10904_v60  ;;  %v8590_v60 = vpack.c.bf16 %v9107_v39, %v9106_v9  ;;  %v8594_v0 = vpack.c.bf16 %v9112_v20, %v9111_v58  ;;  %v8598_v50 = vpack.c.bf16 %v9122_v45, %v9121_v24 }
0x118e   : > { %8626 = vmatprep.subr.msk.bf16.mxu0 %vm9862_vm2, %v8624_v1  ;;  %v9465_v58 = vpop.eup %9464 }
0x118f   : > { %7919 = vmatmul.mubr.msk.f32.vlgmr.msra.gmra.mrb[62].mxu1 %vm844_vm3, %v4131_v22  ;;  %v9467_v20 = vpop.eup %9466  ;;  %v4474_v3 = vmul.f32 %v9465_v58, %v10867_v13 }
0x1190   : > { %8585 = vmatpush3.bf16.msra.mxu1 %v8548_v52  ;;  %7973 = vmatprep.mubr.msk.f32.mxu1 %vm1125_vm4, %v4472_v27  ;;  %v9469_v48 = vpop.eup %9468  ;;  %v4476_v14 = vmul.f32 %v9467_v20, %v10875_v10 }
0x1191   : > { %8587 = vmatprep.subr.bf16.mxu1 %v8586_v31  ;;  %v9135_v36 = vpop.permute.xlu1 %9134  ;;  %v9140_v2 = vpop.permute.xlu0 %9139  ;;  %v4478_v49 = vmul.f32 %v9469_v48, %v10879_v15 }
0x1192   : > { %v9137_v59 = vunpack.i.h.bf16 %v9135_v36  ;;  %v9136_v63 = vunpack.i.l.bf16 %v9135_v36  ;;  %v9142_v42 = vunpack.i.h.bf16 %v9140_v2  ;;  %v9141_v52 = vunpack.i.l.bf16 %v9140_v2  ;;  %v9471_v30 = vpop.eup %9470 }
0x1193   : > { %8629 = vmatpush3.bf16.xpose.msk.msra.mxu0 %vm9862_vm2, %v8624_v1  ;;  %v9473_v12 = vpop.eup %9472  ;;  %v4480_v27 = vmul.f32 %v9471_v30, %v10883_v62 }
0x1194   : > { %v8630_v16 = vpack.c.bf16 %v9137_v59, %v9136_v63  ;;  %8589 = vmatpush3.bf16.msra.mxu1 %v8586_v31  ;;  %v8636_v1 = vpack.c.bf16 %v9142_v42, %v9141_v52  ;;  %v9475_v39 = vpop.eup %9474  ;;  %v4482_v10 = vmul.f32 %v9473_v12, %v10887_v56 }
0x1195   : > { %8591 = vmatprep.subr.bf16.mxu1 %v8590_v60  ;;  %v4892_v53 = vpop.permute.xlu1 %4891  ;;  %v4894_v21 = vpop.permute.xlu0 %4893  ;;  %v4484_v15 = vmul.f32 %v9475_v39, %v10900_v54 }
0x1196   : > { %8632 = vmatprep.subr.msk.bf16.mxu0 %vm9862_vm2, %v8630_v16  ;;  %8019 = vmatprep.mubr.msk.f32.mxu0 %vm758_vm1, %v4892_v53  ;;  %v9477_v9 = vpop.eup %9476 }
0x1197   : > { %v4486_v31 = vmul.f32 %v9477_v9, %v10908_v35 }
0x1198   : > { %8593 = vmatpush3.bf16.msra.mxu1 %v8590_v60 }
0x1199   : > { %8595 = vmatprep.subr.bf16.mxu1 %v8594_v0  ;;  %v4896_v22 = vpop.permute.xlu1 %4895  ;;  %v4898_v13 = vpop.permute.xlu0 %4897 }
0x119b   : > { %8635 = vmatpush3.bf16.xpose.msk.msra.mxu0 %vm9862_vm2, %v8630_v16 }
0x119c   : > { %8597 = vmatpush3.bf16.msra.mxu1 %v8594_v0  ;;  %8638 = vmatprep.subr.msk.bf16.mxu0 %vm9862_vm2, %v8636_v1 }
0x119d   : > { %8599 = vmatprep.subr.bf16.mxu1 %v8598_v50  ;;  %v4900_v62 = vpop.permute.xlu1 %4899  ;;  %v4902_v36 = vpop.permute.xlu0 %4901 }
0x11a0   : > { %8601 = vmatpush3.bf16.msra.mxu1 %v8598_v50 }
0x11a1   : > { %8604 = vmatprep.subr.msk.bf16.mxu1 %vm9862_vm2, %v10942_v33  ;;  %v4904_v56 = vpop.permute.xlu1 %4903  ;;  %v4906_v54 = vpop.permute.xlu0 %4905 }
0x11a3   : > { %7974 = vmatmul.mubr.msk.f32.vlgmr.msra.gmra.mrb[64].mxu1 %vm1125_vm4, %v4474_v3  ;;  %8641 = vmatpush3.bf16.xpose.msk.msra.mxu0 %vm9862_vm2, %v8636_v1 }
0x11a4   : > { %7976 = vmatprep.mubr.msk.f32.mxu1 %vm1125_vm4, %v4476_v14 }
0x11a7   : > { %7977 = vmatmul.mubr.msk.f32.gmra.mrb[66].mxu1 %vm1125_vm4, %v4478_v49 }
0x11a8   : > { %7979 = vmatprep.mubr.msk.f32.mxu1 %vm1125_vm4, %v4480_v27 }
0x11a9   : > { %8607 = vmatpush3.bf16.xpose.msk.msra.mxu1 %vm9862_vm2, %v10942_v33 }
0x11aa   : > { %8020 = vmatmul.mubr.msk.f32.vlgmr.msra.gmra.mrb[58].mxu0 %vm758_vm1, %v4894_v21 }
0x11ab   : > { %7980 = vmatmul.mubr.msk.f32.gmra.mrb[68].mxu1 %vm1125_vm4, %v4482_v10  ;;  %8022 = vmatprep.mubr.msk.f32.mxu0 %vm758_vm1, %v4896_v22 }
0x11ac   : > { %7982 = vmatprep.mubr.msk.f32.mxu1 %vm1125_vm4, %v4484_v15 }
0x11ae   : > { %8023 = vmatmul.mubr.msk.f32.gmra.mrb[60].mxu0 %vm758_vm1, %v4898_v13 }
0x11af   : > { %7983 = vmatmul.mubr.msk.f32.gmra.mrb[70].mxu1 %vm1125_vm4, %v4486_v31  ;;  %8025 = vmatprep.mubr.msk.f32.mxu0 %vm758_vm1, %v4900_v62 }
0x11b0   : > { %7989 = vmatprep.mubr.msk.f32.mxu1 %vm758_vm1, %v10956_v43 }
0x11b2   : > { %8026 = vmatmul.mubr.msk.f32.gmra.mrb[62].mxu0 %vm758_vm1, %v4902_v36 }
0x11b3   : > { %7990 = vmatmul.mubr.msk.f32.vlgmr.msra.gmra.mrb[72].mxu1 %vm758_vm1, %v10954_v11  ;;  %8028 = vmatprep.mubr.msk.f32.mxu0 %vm758_vm1, %v4904_v56 }
0x11b6   : > { %8029 = vmatmul.mubr.msk.f32.gmra.mrb[64].mxu0 %vm758_vm1, %v4906_v54 }
0x1262   : > { %v11010_v35 = vpop.f32.mrb[62].mxu1 }
0x1263   : > { %v11012_v33 = vpop.f32.mrb[63].mxu1 }
0x1276   : > { %v11014_v59 = vpop.f32.mrb[64].mxu1 }
0x1277   : > { %v11016_v63 = vpop.f32.mrb[65].mxu1 }
0x127a   : > { %v11018_v43 = vpop.f32.mrb[66].mxu1 }
0x127b   : > { %v11020_v2 = vpop.f32.mrb[67].mxu1 }
0x127d   : > { %v8021_v60 = vpop.f32.mrb[58].mxu0 }
0x127e   : > { %v11022_v16 = vpop.f32.mrb[68].mxu1  ;;  %v5021_v11 = vpop.f32.mrb[59].mxu0  ;;  %v5063_v53 = vsel %vm1125_vm4, %v8021_v60, -inf }
0x127f   : > { %v11025_v42 = vpop.f32.mrb[69].mxu1  ;;  %5064 = vmax.xlane.f32.xlu1 %v5063_v53  ;;  %v5060_v49 = vsel %vm1125_vm4, %v5021_v11, -inf }
0x1281   : > { %v8024_v52 = vpop.f32.mrb[60].mxu0 }
0x1282   : > { %v11027_v45 = vpop.f32.mrb[70].mxu1  ;;  %v5031_v24 = vpop.f32.mrb[61].mxu0  ;;  %v5069_v0 = vsel %vm1125_vm4, %v8024_v52, -inf }
0x1283   : > { %11873 = vst [vmem:[#allocation33_spill] sm:$0xff] %v11027_v45  ;;  %v11030_v1 = vpop.f32.mrb[71].mxu1  ;;  %5070 = vmax.xlane.f32.xlu1 %v5069_v0  ;;  %v5066_v22 = vsel %vm1125_vm4, %v5031_v24, -inf }
0x1285   : > { %v8027_v50 = vpop.f32.mrb[62].mxu0 }
0x1286   : > { %v11032_v58 = vpop.f32.mrb[72].mxu1  ;;  %v5041_v20 = vpop.f32.mrb[63].mxu0  ;;  %v5075_v12 = vsel %vm1125_vm4, %v8027_v50, -inf }
0x1287   : > { %v11034_v3 = vpop.f32.mrb[73].mxu1  ;;  %v4774_v48 = vsel %vm844_vm3, %v11032_v58, -inf  ;;  %v5072_v39 = vsel %vm1125_vm4, %v5041_v20, -inf }
0x1288   : > { %4775 = vmax.xlane.f32.xlu0 %v4774_v48  ;;  %v4771_v14 = vsel %vm844_vm3, %v11034_v3, -inf }
0x1289   : > { %4772 = vmax.xlane.f32.xlu1 %v4771_v14  ;;  %v11040_v30 = vpop.f32.mrb[64].mxu0 }
0x128a   : > { %v11042_v21 = vpop.f32.mrb[65].mxu0  ;;  %v5081_v27 = vsel %vm1125_vm4, %v11040_v30, -inf }
0x128b   : > { %v5078_v13 = vsel %vm1125_vm4, %v11042_v21, -inf }
0x128c   : > { %5061 = vmax.xlane.f32.xlu0 %v5060_v49 }
0x128d   : > { %5076 = vmax.xlane.f32.xlu1 %v5075_v12 }
0x1290   : > { %5067 = vmax.xlane.f32.xlu0 %v5066_v22 }
0x1291   : > { %5082 = vmax.xlane.f32.xlu1 %v5081_v27 }
0x1294   : > { %5073 = vmax.xlane.f32.xlu0 %v5072_v39 }
0x1298   : > { %5079 = vmax.xlane.f32.xlu0 %v5078_v13 }
0x130c   : > { %v5065_v10 = vpop.xlane.xlu1 %5064 }
0x130d   : > { %v5085_v9 = vsub.f32 %v8021_v60, %v5065_v10 }
0x130f   : > { %v5094_v15 = vmul.f32 1.442695, %v5085_v9 }
0x1310   : > { %v5071_v62 = vpop.xlane.xlu1 %5070 }
0x1311   : > { %9478 = vpow2.f32 %v5094_v15  ;;  %v5087_v0 = vsub.f32 %v8024_v52, %v5071_v62 }
0x1313   : > { %v5098_v22 = vmul.f32 1.442695, %v5087_v0 }
0x1315   : > { %v4776_v31 = vpop.xlane.xlu0 %4775 }
0x1316   : > { %v4773_v53 = vpop.xlane.xlu1 %4772 }
0x1319   : > { %v5062_v36 = vpop.xlane.xlu0 %5061 }
0x131a   : > { %v5084_v56 = vsub.f32 %v5021_v11, %v5062_v36  ;;  %v5077_v27 = vpop.xlane.xlu1 %5076 }
0x131b   : > { %v11052_v54 = vpop.eup %9478  ;;  %v5089_v11 = vsub.f32 %v8027_v50, %v5077_v27 }
0x131c   : > { %v5092_v48 = vmul.f32 1.442695, %v5084_v56  ;;  %v5111_v14 = vsel %vm1125_vm4, %v11052_v54, 0.0 }
0x131d   : > { %v5068_v49 = vpop.xlane.xlu0 %5067  ;;  %5112 = vadd.xlane.f32.xlu1 %v5111_v14  ;;  %v5102_v52 = vmul.f32 1.442695, %v5089_v11  ;;  %v4778_v11 = vsub.f32 %v11032_v58, %v4776_v31 }
0x131e   : > { %9480 = vpow2.f32 %v5092_v48  ;;  %v5086_v12 = vsub.f32 %v5031_v24, %v5068_v49  ;;  %v5083_v27 = vpop.xlane.xlu1 %5082 }
0x1320   : > { %v5096_v60 = vmul.f32 1.442695, %v5086_v12  ;;  %v4777_v12 = vsub.f32 %v11034_v3, %v4773_v53 }
0x1321   : > { %v5074_v39 = vpop.xlane.xlu0 %5073 }
0x1322   : > { %9482 = vpow2.f32 %v5096_v60  ;;  %v5088_v13 = vsub.f32 %v5041_v20, %v5074_v39  ;;  %v4779_v60 = vmul.f32 1.442695, %v4777_v12  ;;  %v5091_v39 = vsub.f32 %v11040_v30, %v5083_v27 }
0x1323   : > { %9484 = vpow2.f32 %v5098_v22 }
0x1324   : > { %v5100_v10 = vmul.f32 1.442695, %v5088_v13 }
0x1325   : > { %v5080_v14 = vpop.xlane.xlu0 %5079 }
0x1326   : > { %9486 = vpow2.f32 %v5100_v10  ;;  %v5090_v49 = vsub.f32 %v11042_v21, %v5080_v14  ;;  %v5106_v10 = vmul.f32 1.442695, %v5091_v39 }
0x1327   : > { %9488 = vpow2.f32 %v5102_v52 }
0x1328   : > { %v11056_v9 = vpop.eup %9480  ;;  %v5104_v22 = vmul.f32 1.442695, %v5090_v49 }
0x1329   : > { %v5108_v15 = vsel %vm1125_vm4, %v11056_v9, 0.0 }
0x132a   : > { %5109 = vadd.xlane.f32.xlu0 %v5108_v15  ;;  %9490 = vpow2.f32 %v5104_v22  ;;  %v4781_v15 = vmul.f32 1.442695, %v4778_v11 }
0x132b   : > { %9492 = vpow2.f32 %v4779_v60 }
0x132c   : > { %v11060_v62 = vpop.eup %9482  ;;  %9494 = vpow2.f32 %v5106_v10 }
0x132d   : > { %v5114_v24 = vsel %vm1125_vm4, %v11060_v62, 0.0  ;;  %v11064_v36 = vpop.eup %9484  ;;  %9496 = vpow2.f32 %v4781_v15 }
0x132e   : > { %5115 = vadd.xlane.f32.xlu1 %v5114_v24  ;;  %v5117_v50 = vsel %vm1125_vm4, %v11064_v36, 0.0 }
0x1330   : > { %v11068_v20 = vpop.eup %9486 }
0x1331   : > { %v5120_v56 = vsel %vm1125_vm4, %v11068_v20, 0.0  ;;  %v11072_v0 = vpop.eup %9488 }
0x1332   : > { %5118 = vadd.xlane.f32.xlu1 %v5117_v50  ;;  %v5123_v48 = vsel %vm1125_vm4, %v11072_v0, 0.0 }
0x1334   : > { %v11083_v13 = vpop.eup %9490 }
0x1335   : > { %v5126_v21 = vsel %vm1125_vm4, %v11083_v13, 0.0  ;;  %v9493_v52 = vpop.eup %9492 }
0x1336   : > { %5121 = vadd.xlane.f32.xlu1 %v5120_v56  ;;  %v4783_v3 = vsel %vm844_vm3, %v9493_v52, 0.0  ;;  %v11089_v53 = vpop.eup %9494 }
0x1337   : > { %v5129_v30 = vsel %vm1125_vm4, %v11089_v53, 0.0  ;;  %v11093_v24 = vpop.eup %9496 }
0x1338   : > { %v4786_v58 = vsel %vm844_vm3, %v11093_v24, 0.0 }
0x133a   : > { %5124 = vadd.xlane.f32.xlu1 %v5123_v48 }
0x1340   : > { %9144 = vrot.lane.b32.xlu0 %v9837_v23, %s9635_s13 }
0x134b   : > { %9149 = vrot.lane.b32.xlu1 %v9844_v28, %s9635_s13 }
0x135f   : > { %5127 = vadd.xlane.f32.xlu0 %v5126_v21 }
0x1363   : > { %4784 = vadd.xlane.f32.xlu0 %v4783_v3 }
0x136f   : > { %5130 = vadd.xlane.f32.xlu1 %v5129_v30 }
0x1373   : > { %4787 = vadd.xlane.f32.xlu1 %v4786_v58 }
0x1379   : > { %9154 = vrot.lane.b32.xlu0 %v9837_v23, %s9636_s14 }
0x137d   : > { %9164 = vrot.lane.b32.xlu0 %v9854_v37, %s9635_s13 }
0x1381   : > { %9169 = vrot.lane.b32.xlu0 %v9844_v28, %s9636_s14 }
0x1384   : > { %9159 = vrot.lane.b32.xlu1 %v9851_v34, %s9635_s13 }
0x1385   : > { %9174 = vrot.lane.b32.xlu0 %v9857_v40, %s9635_s13 }
0x1388   : > { %9184 = vrot.lane.b32.xlu1 %v9854_v37, %s9636_s14 }
0x1389   : > { %9179 = vrot.lane.b32.xlu0 %v9851_v34, %s9636_s14 }
0x138c   : > { %5343 = vrot.lane.b32.xlu1 %v9876_v57, %s9637_s15 }
0x138d   : > { %5341 = vrot.lane.b32.xlu0 %v9839_v26, %s9637_s15 }
0x1390   : > { %5552 = vrot.lane.b32.xlu1 %v9846_v29, %s9637_s15 }
0x1391   : > { %9189 = vrot.lane.b32.xlu0 %v9857_v40, %s9636_s14 }
0x1394   : > { %5556 = vrot.lane.b32.xlu1 %v9896_v32, %s9637_s15 }
0x1395   : > { %5554 = vrot.lane.b32.xlu0 %v9894_v4, %s9637_s15 }
0x1398   : > { %5560 = vrot.lane.b32.xlu1 %v9904_v25, %s9637_s15 }
0x1399   : > { %5558 = vrot.lane.b32.xlu0 %v9902_v5, %s9637_s15 }
0x139c   : > { %5564 = vrot.lane.b32.xlu1 %v9912_v7, %s9637_s15 }
0x139d   : > { %5562 = vrot.lane.b32.xlu0 %v9910_v6, %s9637_s15 }
0x13a1   : > { %5566 = vrot.lane.b32.xlu0 %v9918_v8, %s9637_s15 }
0x13aa   : > { %v11118_v32 = vpop.xlane.xlu1 %5112 }
0x13b7   : > { %v5110_v57 = vpop.xlane.xlu0 %5109 }
0x13bb   : > { %v9145_v26 = vpop.permute.xlu0 %9144  ;;  %v11120_v4 = vpop.xlane.xlu1 %5115 }
0x13bc   : > { %v9147_v31 = vunpack.i.h.bf16 %v9145_v26  ;;  %v9146_v29 = vunpack.i.l.bf16 %v9145_v26 }
0x13be   : > { %v8608_v50 = vpack.c.bf16 %v9147_v31, %v9146_v29 }
0x13bf   : > { %v11122_v25 = vpop.xlane.xlu1 %5118 }
0x13c0   : > { %8609 = vmatprep.subr.bf16.mxu1 %v8608_v50 }
0x13c1   : > { %8611 = vmatpush3.bf16.msra.mxu1 %v8608_v50 }
0x13c2   : > { %8643 = vmatprep.subr.bf16.mxu1 %v8608_v50 }
0x13c3   : > { %v11124_v5 = vpop.xlane.xlu1 %5121 }
0x13c7   : > { %v11128_v8 = vpop.xlane.xlu1 %5124 }
0x13cb   : > { %v9150_v12 = vpop.permute.xlu1 %9149 }
0x13ec   : > { %v11126_v7 = vpop.xlane.xlu0 %5127 }
0x13f0   : > { %v4785_v6 = vpop.xlane.xlu0 %4784 }
0x13f1   : > { %9498 = vrcp.f32 %v4785_v6 }
0x13f2   : > { %9500 = vrcp.f32 %v5110_v57 }
0x13f4   : > { %v9155_v56 = vpop.permute.xlu0 %9154 }
0x13f5   : > { %v9157_v48 = vunpack.i.h.bf16 %v9155_v56  ;;  %v9156_v14 = vunpack.i.l.bf16 %v9155_v56 }
0x13f7   : > { %v11130_v49 = vpack.c.bf16 %v9157_v48, %v9156_v14 }
0x13f8   : > { %v9165_v22 = vpop.permute.xlu0 %9164 }
0x13f9   : > { %8674 = vmatprep.subr.msk.bf16.mxu0 %vm9862_vm2, %v11130_v49 }
0x13fa   : > { %8677 = vmatpush3.bf16.xpose.msk.msra.mxu0 %vm9862_vm2, %v11130_v49 }
0x13fb   : > { %v9499_v60 = vpop.eup %9498 }
0x13fc   : > { %v9170_v27 = vpop.permute.xlu0 %9169  ;;  %v11138_v39 = vpop.xlane.xlu1 %5130  ;;  %v4790_v11 = vmul.f32 %v9499_v60, %v9493_v52  ;;  %v9152_v60 = vunpack.i.h.bf16 %v9150_v12 }
0x13fd   : > { %v9172_v10 = vunpack.i.h.bf16 %v9170_v27  ;;  %v9171_v21 = vunpack.i.l.bf16 %v9170_v27  ;;  %v9501_v57 = vpop.eup %9500  ;;  %v9151_v27 = vunpack.i.l.bf16 %v9150_v12 }
0x13fe   : > { %7996 = vmatprep.mubr.msk.f32.mxu1 %vm844_vm3, %v4790_v11 }
0x13ff   : > { %v8678_v15 = vpack.c.bf16 %v9172_v10, %v9171_v21  ;;  %v8646_v12 = vpack.c.bf16 %v9152_v60, %v9151_v27 }
0x1400   : > { %v9175_v3 = vpop.permute.xlu0 %9174  ;;  %v4788_v30 = vpop.xlane.xlu1 %4787 }
0x1401   : > { %9502 = vrcp.f32 %v4788_v30  ;;  %8680 = vmatprep.subr.msk.bf16.mxu0 %vm9862_vm2, %v8678_v15 }
0x1402   : > { %8683 = vmatpush3.bf16.xpose.msk.msra.mxu0 %vm9862_vm2, %v8678_v15  ;;  %9504 = vrcp.f32 %v11118_v32 }
0x1403   : > { %9506 = vrcp.f32 %v11120_v4 }
0x1404   : > { %v9180_v58 = vpop.permute.xlu0 %9179  ;;  %v9160_v26 = vpop.permute.xlu1 %9159  ;;  %9508 = vrcp.f32 %v11122_v25 }
0x1405   : > { %v9182_v31 = vunpack.i.h.bf16 %v9180_v58  ;;  %v9181_v29 = vunpack.i.l.bf16 %v9180_v58  ;;  %v9161_v45 = vunpack.i.l.bf16 %v9160_v26  ;;  %9510 = vrcp.f32 %v11124_v5 }
0x1406   : > { %9512 = vrcp.f32 %v11128_v8 }
0x1407   : > { %v8684_v52 = vpack.c.bf16 %v9182_v31, %v9181_v29  ;;  %v5133_v29 = vmul.f32 %v9501_v57, %v11056_v9  ;;  %v9177_v9 = vunpack.i.h.bf16 %v9175_v3  ;;  %9514 = vrcp.f32 %v11126_v7 }
0x1408   : > { %v11145_v6 = vpop.permute.xlu0 %5341  ;;  %v9185_v56 = vpop.permute.xlu1 %9184  ;;  %9516 = vrcp.f32 %v11138_v39 }
0x1409   : > { %v9187_v48 = vunpack.i.h.bf16 %v9185_v56  ;;  %v9186_v14 = vunpack.i.l.bf16 %v9185_v56  ;;  %8686 = vmatprep.subr.msk.bf16.mxu0 %vm9862_vm2, %v8684_v52  ;;  %v9162_v56 = vunpack.i.h.bf16 %v9160_v26 }
0x140a   : > { %8689 = vmatpush3.bf16.xpose.msk.msra.mxu0 %vm9862_vm2, %v8684_v52 }
0x140b   : > { %v9503_v11 = vpop.eup %9502  ;;  %v8690_v10 = vpack.c.bf16 %v9187_v48, %v9186_v14  ;;  %v9166_v14 = vunpack.i.l.bf16 %v9165_v22 }
0x140c   : > { %v9190_v21 = vpop.permute.xlu0 %9189  ;;  %v11151_v15 = vpop.permute.xlu1 %5343  ;;  %v4792_v30 = vmul.f32 %v9503_v11, %v11093_v24  ;;  %v9167_v24 = vunpack.i.h.bf16 %v9165_v22  ;;  %v8650_v11 = vpack.c.bf16 %v9162_v56, %v9161_v45 }
0x140d   : > { %v9192_v58 = vunpack.i.h.bf16 %v9190_v21  ;;  %v9191_v31 = vunpack.i.l.bf16 %v9190_v21  ;;  %8692 = vmatprep.subr.msk.bf16.mxu0 %vm9862_vm2, %v8690_v10  ;;  %v9505_v32 = vpop.eup %9504 }
0x140e   : > { %7997 = vmatmul.mubr.msk.f32.vlgmr.msra.gmra.mrb[74].mxu1 %vm844_vm3, %v4792_v30  ;;  %v8654_v26 = vpack.c.bf16 %v9167_v24, %v9166_v14  ;;  %v5135_v5 = vmul.f32 %v9505_v32, %v11052_v54 }
0x140f   : > { %8645 = vmatpush3.bf16.msra.mxu1 %v8608_v50  ;;  %8051 = vmatprep.mubr.msk.f32.mxu1 %vm1125_vm4, %v5133_v29  ;;  %v8696_v48 = vpack.c.bf16 %v9192_v58, %v9191_v31  ;;  %v9176_v50 = vunpack.i.l.bf16 %v9175_v3  ;;  %v9507_v3 = vpop.eup %9506 }
0x1410   : > { %8647 = vmatprep.subr.bf16.mxu1 %v8646_v12  ;;  %v5553_v52 = vpop.permute.xlu1 %5552  ;;  %v5555_v22 = vpop.permute.xlu0 %5554  ;;  %v5137_v8 = vmul.f32 %v9507_v3, %v11060_v62 }
0x1411   : > { %8097 = vmatprep.mubr.msk.f32.mxu0 %vm758_vm1, %v5553_v52  ;;  %v8658_v45 = vpack.c.bf16 %v9177_v9, %v9176_v50  ;;  %v9509_v57 = vpop.eup %9508 }
0x1412   : > { %8695 = vmatpush3.bf16.xpose.msk.msra.mxu0 %vm9862_vm2, %v8690_v10  ;;  %v9511_v7 = vpop.eup %9510  ;;  %v5139_v39 = vmul.f32 %v9509_v57, %v11064_v36 }
0x1413   : > { %8649 = vmatpush3.bf16.msra.mxu1 %v8646_v12  ;;  %8698 = vmatprep.subr.msk.bf16.mxu0 %vm9862_vm2, %v8696_v48  ;;  %v9513_v27 = vpop.eup %9512  ;;  %v5141_v54 = vmul.f32 %v9511_v7, %v11068_v20 }
0x1414   : > { %8651 = vmatprep.subr.bf16.mxu1 %v8650_v11  ;;  %v5557_v4 = vpop.permute.xlu1 %5556  ;;  %v5559_v25 = vpop.permute.xlu0 %5558  ;;  %v5143_v62 = vmul.f32 %v9513_v27, %v11072_v0 }
0x1415   : > { %v9515_v10 = vpop.eup %9514 }
0x1416   : > { %v9517_v36 = vpop.eup %9516  ;;  %v5145_v20 = vmul.f32 %v9515_v10, %v11083_v13 }
0x1417   : > { %8653 = vmatpush3.bf16.msra.mxu1 %v8650_v11  ;;  %v5147_v31 = vmul.f32 %v9517_v36, %v11089_v53 }
0x1418   : > { %8655 = vmatprep.subr.bf16.mxu1 %v8654_v26  ;;  %v5561_v60 = vpop.permute.xlu1 %5560  ;;  %v5563_v21 = vpop.permute.xlu0 %5562 }
0x141a   : > { %8701 = vmatpush3.bf16.xpose.msk.msra.mxu0 %vm9862_vm2, %v8696_v48 }
0x141b   : > { %8657 = vmatpush3.bf16.msra.mxu1 %v8654_v26 }
0x141c   : > { %8659 = vmatprep.subr.bf16.mxu1 %v8658_v45  ;;  %v5565_v30 = vpop.permute.xlu1 %5564  ;;  %v5567_v58 = vpop.permute.xlu0 %5566 }
0x141f   : > { %8661 = vmatpush3.bf16.msra.mxu1 %v8658_v45 }
0x1420   : > { %8664 = vmatprep.subr.msk.bf16.mxu1 %vm9862_vm2, %v11130_v49 }
0x1421   : > { %8098 = vmatmul.mubr.msk.f32.vlgmr.msra.gmra.mrb[66].mxu0 %vm758_vm1, %v5555_v22 }
0x1422   : > { %8052 = vmatmul.mubr.msk.f32.vlgmr.msra.gmra.mrb[76].mxu1 %vm1125_vm4, %v5135_v5  ;;  %8100 = vmatprep.mubr.msk.f32.mxu0 %vm758_vm1, %v5557_v4 }
0x1423   : > { %8054 = vmatprep.mubr.msk.f32.mxu1 %vm1125_vm4, %v5137_v8 }
0x1425   : > { %8101 = vmatmul.mubr.msk.f32.gmra.mrb[68].mxu0 %vm758_vm1, %v5559_v25 }
0x1426   : > { %8055 = vmatmul.mubr.msk.f32.gmra.mrb[78].mxu1 %vm1125_vm4, %v5139_v39  ;;  %8103 = vmatprep.mubr.msk.f32.mxu0 %vm758_vm1, %v5561_v60 }
0x1427   : > { %8057 = vmatprep.mubr.msk.f32.mxu1 %vm1125_vm4, %v5141_v54 }
0x1428   : > { %8667 = vmatpush3.bf16.xpose.msk.msra.mxu1 %vm9862_vm2, %v11130_v49 }
0x1429   : > { %8104 = vmatmul.mubr.msk.f32.gmra.mrb[70].mxu0 %vm758_vm1, %v5563_v21 }
0x142a   : > { %8058 = vmatmul.mubr.msk.f32.gmra.mrb[80].mxu1 %vm1125_vm4, %v5143_v62  ;;  %8106 = vmatprep.mubr.msk.f32.mxu0 %vm758_vm1, %v5565_v30 }
0x142b   : > { %8060 = vmatprep.mubr.msk.f32.mxu1 %vm1125_vm4, %v5145_v20 }
0x142d   : > { %8107 = vmatmul.mubr.msk.f32.gmra.mrb[72].mxu0 %vm758_vm1, %v5567_v58 }
0x142e   : > { %8061 = vmatmul.mubr.msk.f32.gmra.mrb[82].mxu1 %vm1125_vm4, %v5147_v31 }
0x142f   : > { %8067 = vmatprep.mubr.msk.f32.mxu1 %vm758_vm1, %v11145_v6 }
0x1432   : > { %8068 = vmatmul.mubr.msk.f32.vlgmr.msra.gmra.mrb[84].mxu1 %vm758_vm1, %v11151_v15 }
0x14e1   : > { %v11204_v46 = vpop.f32.mrb[74].mxu1 }
0x14e2   : > { %v11206_v0 = vpop.f32.mrb[75].mxu1 }
0x14f4   : > { %v8099_v13 = vpop.f32.mrb[66].mxu0 }
0x14f5   : > { %v11208_v49 = vpop.f32.mrb[76].mxu1  ;;  %v5682_v29 = vpop.f32.mrb[67].mxu0  ;;  %v5724_v53 = vsel %vm1125_vm4, %v8099_v13, -inf }
0x14f6   : > { %v11211_v56 = vpop.f32.mrb[77].mxu1  ;;  %5725 = vmax.xlane.f32.xlu1 %v5724_v53  ;;  %v5721_v5 = vsel %vm1125_vm4, %v5682_v29, -inf }
0x14f8   : > { %v8102_v12 = vpop.f32.mrb[68].mxu0 }
0x14f9   : > { %v11213_v52 = vpop.f32.mrb[78].mxu1  ;;  %v5692_v6 = vpop.f32.mrb[69].mxu0  ;;  %v5730_v48 = vsel %vm1125_vm4, %v8102_v12, -inf }
0x14fa   : > { %v11216_v15 = vpop.f32.mrb[79].mxu1  ;;  %5731 = vmax.xlane.f32.xlu1 %v5730_v48  ;;  %v5727_v8 = vsel %vm1125_vm4, %v5692_v6, -inf }
0x14fc   : > { %v8105_v24 = vpop.f32.mrb[70].mxu0 }
0x14fd   : > { %v11218_v14 = vpop.f32.mrb[80].mxu1  ;;  %v5702_v11 = vpop.f32.mrb[71].mxu0  ;;  %v5736_v57 = vsel %vm1125_vm4, %v8105_v24, -inf }
0x14fe   : > { %v11220_v9 = vpop.f32.mrb[81].mxu1  ;;  %v5733_v60 = vsel %vm1125_vm4, %v5702_v11, -inf }
0x1500   : > { %v11222_v50 = vpop.f32.mrb[72].mxu0 }
0x1501   : > { %v11224_v26 = vpop.f32.mrb[82].mxu1  ;;  %v11226_v22 = vpop.f32.mrb[73].mxu0  ;;  %v5742_v7 = vsel %vm1125_vm4, %v11222_v50, -inf }
0x1502   : > { %v11228_v45 = vpop.f32.mrb[83].mxu1  ;;  %v5739_v39 = vsel %vm1125_vm4, %v11226_v22, -inf }
0x1505   : > { %v11230_v32 = vpop.f32.mrb[84].mxu1 }
0x1506   : > { %v11232_v4 = vpop.f32.mrb[85].mxu1  ;;  %v5435_v3 = vsel %vm844_vm3, %v11230_v32, -inf }
0x1507   : > { %5436 = vmax.xlane.f32.xlu0 %v5435_v3  ;;  %v5432_v25 = vsel %vm844_vm3, %v11232_v4, -inf }
0x1508   : > { %5433 = vmax.xlane.f32.xlu1 %v5432_v25 }
0x150b   : > { %5722 = vmax.xlane.f32.xlu0 %v5721_v5 }
0x150c   : > { %5737 = vmax.xlane.f32.xlu1 %v5736_v57 }
0x150f   : > { %5728 = vmax.xlane.f32.xlu0 %v5727_v8 }
0x1510   : > { %5743 = vmax.xlane.f32.xlu1 %v5742_v7 }
0x1513   : > { %5734 = vmax.xlane.f32.xlu0 %v5733_v60 }
0x1517   : > { %5740 = vmax.xlane.f32.xlu0 %v5739_v39 }
0x1583   : > { %v5726_v27 = vpop.xlane.xlu1 %5725 }
0x1584   : > { %v5746_v54 = vsub.f32 %v8099_v13, %v5726_v27 }
0x1586   : > { %v5755_v10 = vmul.f32 1.442695, %v5746_v54 }
0x1587   : > { %v5732_v21 = vpop.xlane.xlu1 %5731 }
0x1588   : > { %9518 = vpow2.f32 %v5755_v10  ;;  %v5748_v62 = vsub.f32 %v8102_v12, %v5732_v21 }
0x158a   : > { %v5759_v36 = vmul.f32 1.442695, %v5748_v62 }
0x158c   : > { %9520 = vpow2.f32 %v5759_v36 }
0x1592   : > { %v11246_v30 = vpop.eup %9518 }
0x1593   : > { %v5772_v20 = vsel %vm1125_vm4, %v11246_v30, 0.0 }
0x1594   : > { %v5437_v58 = vpop.xlane.xlu0 %5436  ;;  %5773 = vadd.xlane.f32.xlu1 %v5772_v20 }
0x1595   : > { %v5434_v53 = vpop.xlane.xlu1 %5433 }
0x1596   : > { %v11250_v31 = vpop.eup %9520 }
0x1597   : > { %v5778_v48 = vsel %vm1125_vm4, %v11250_v31, 0.0 }
0x1598   : > { %v5723_v13 = vpop.xlane.xlu0 %5722  ;;  %5779 = vadd.xlane.f32.xlu1 %v5778_v48 }
0x1599   : > { %v5745_v3 = vsub.f32 %v5682_v29, %v5723_v13  ;;  %v5738_v12 = vpop.xlane.xlu1 %5737  ;;  %v5438_v13 = vsub.f32 %v11232_v4, %v5434_v53 }
0x159a   : > { %v5750_v8 = vsub.f32 %v8105_v24, %v5738_v12 }
0x159b   : > { %v5753_v25 = vmul.f32 1.442695, %v5745_v3  ;;  %v5440_v12 = vmul.f32 1.442695, %v5438_v13 }
0x159c   : > { %v5729_v5 = vpop.xlane.xlu0 %5728  ;;  %v5763_v27 = vmul.f32 1.442695, %v5750_v8 }
0x159d   : > { %9522 = vpow2.f32 %v5753_v25  ;;  %v5747_v57 = vsub.f32 %v5692_v6, %v5729_v5  ;;  %v5744_v25 = vpop.xlane.xlu1 %5743 }
0x159e   : > { %v5752_v5 = vsub.f32 %v11222_v50, %v5744_v25 }
0x159f   : > { %v5757_v7 = vmul.f32 1.442695, %v5747_v57  ;;  %v5439_v57 = vsub.f32 %v11230_v32, %v5437_v58 }
0x15a0   : > { %v5735_v60 = vpop.xlane.xlu0 %5734  ;;  %v5767_v8 = vmul.f32 1.442695, %v5752_v5 }
0x15a1   : > { %9524 = vpow2.f32 %v5757_v7  ;;  %v5749_v39 = vsub.f32 %v5702_v11, %v5735_v60  ;;  %v5442_v7 = vmul.f32 1.442695, %v5439_v57  ;;  %v11885_v60 = vld [vmem:[#allocation19_spill] sm:$0xff] }
0x15a3   : > { %v5761_v54 = vmul.f32 1.442695, %v5749_v39 }
0x15a4   : > { %v5741_v20 = vpop.xlane.xlu0 %5740 }
0x15a5   : > { %9526 = vpow2.f32 %v5761_v54  ;;  %v5751_v48 = vsub.f32 %v11226_v22, %v5741_v20 }
0x15a6   : > { %9528 = vpow2.f32 %v5763_v27 }
0x15a7   : > { %v11254_v10 = vpop.eup %9522  ;;  %v5765_v3 = vmul.f32 1.442695, %v5751_v48 }
0x15a8   : > { %v5769_v21 = vsel %vm1125_vm4, %v11254_v10, 0.0 }
0x15a9   : > { %5770 = vadd.xlane.f32.xlu0 %v5769_v21  ;;  %9530 = vpow2.f32 %v5765_v3 }
0x15aa   : > { %9532 = vpow2.f32 %v5440_v12 }
0x15ab   : > { %v11258_v29 = vpop.eup %9524  ;;  %9534 = vpow2.f32 %v5767_v8 }
0x15ac   : > { %v5775_v6 = vsel %vm1125_vm4, %v11258_v29, 0.0  ;;  %9536 = vpow2.f32 %v5442_v7 }
0x15ad   : > { %5776 = vadd.xlane.f32.xlu0 %v5775_v6 }
0x15af   : > { %v11262_v24 = vpop.eup %9526 }
0x15b0   : > { %v5781_v11 = vsel %vm1125_vm4, %v11262_v24, 0.0  ;;  %v11266_v62 = vpop.eup %9528 }
0x15b1   : > { %5782 = vadd.xlane.f32.xlu1 %v5781_v11  ;;  %v5784_v36 = vsel %vm1125_vm4, %v11266_v62, 0.0 }
0x15b5   : > { %5785 = vadd.xlane.f32.xlu1 %v5784_v36 }
0x15c3   : > { %9194 = vrot.lane.b32.xlu0 %v9837_v23, %s9638_s16  ;;  %v11278_v23 = vpop.eup %9530 }
0x15c4   : > { %v11282_v22 = vpop.eup %9532 }
0x15c5   : > { %v5444_v4 = vsel %vm844_vm3, %v11282_v22, 0.0  ;;  %v11286_v50 = vpop.eup %9534 }
0x15c6   : > { %9199 = vrot.lane.b32.xlu1 %v9844_v28, %s9638_s16  ;;  %v5787_v28 = vsel %vm1125_vm4, %v11278_v23, 0.0  ;;  %v5790_v32 = vsel %vm1125_vm4, %v11286_v50, 0.0  ;;  %v11290_v58 = vpop.eup %9536 }
0x15c7   : > { %v5447_v53 = vsel %vm844_vm3, %v11290_v58, 0.0 }
0x15e2   : > { %5788 = vadd.xlane.f32.xlu0 %v5787_v28 }
0x15e6   : > { %5445 = vadd.xlane.f32.xlu0 %v5444_v4 }
0x15ea   : > { %5791 = vadd.xlane.f32.xlu1 %v5790_v32 }
0x15ee   : > { %5448 = vadd.xlane.f32.xlu1 %v5447_v53 }
0x15fc   : > { %9204 = vrot.lane.b32.xlu0 %v9851_v34, %s9638_s16  ;;  %v11874_v34 = vld [vmem:[#allocation3_spill] sm:$0xff] }
0x15ff   : > { %9209 = vrot.lane.b32.xlu1 %v9854_v37, %s9638_s16  ;;  %v11875_v37 = vld [vmem:[#allocation18_spill] sm:$0xff] }
0x1600   : > { %9214 = vrot.lane.b32.xlu0 %v9857_v40, %s9638_s16  ;;  %v11876_v40 = vld [vmem:[#allocation10_spill] sm:$0xff] }
0x1603   : > { %1579 = vrot.lane.b32.xlu1 %v10270_v61, %s9639_s17  ;;  %v11877_v61 = vld [vmem:[#allocation26_spill] sm:$0xff] }
0x1604   : > { %1577 = vrot.lane.b32.xlu0 %v10272_v17, %s9639_s17  ;;  %v11878_v17 = vld [vmem:[#allocation5_spill] sm:$0xff] }
0x1607   : > { %2240 = vrot.lane.b32.xlu1 %v10455_v51, %s9640_s18  ;;  %v11880_v51 = vld [vmem:[#allocation25_spill] sm:$0xff] }
0x1608   : > { %2238 = vrot.lane.b32.xlu0 %v10457_v47, %s9640_s18  ;;  %v11881_v47 = vld [vmem:[#allocation12_spill] sm:$0xff] }
0x160b   : > { %2901 = vrot.lane.b32.xlu1 %v10640_v19, %s9641_s19 }
0x160c   : > { %2899 = vrot.lane.b32.xlu0 %v10642_v18, %s9641_s19 }
0x160f   : > { %2004 = vrot.lane.b32.xlu1 %v10276_v41, %s9639_s17  ;;  %v11879_v41 = vld [vmem:[#allocation17_spill] sm:$0xff] }
0x1610   : > { %3560 = vrot.lane.b32.xlu0 %v10827_v38, %s9642_s20  ;;  %v11884_v38 = vld [vmem:[#allocation11_spill] sm:$0xff] }
0x1613   : > { %4221 = vrot.lane.b32.xlu1 %v11012_v33, %s9643_s22 }
0x1614   : > { %3562 = vrot.lane.b32.xlu0 %v10825_v55, %s9642_s20  ;;  %v11883_v55 = vld [vmem:[#allocation20_spill] sm:$0xff] }
0x1617   : > { %2665 = vrot.lane.b32.xlu1 %v10461_v44, %s9640_s18  ;;  %v11882_v44 = vld [vmem:[#allocation4_spill] sm:$0xff] }
0x1618   : > { %2006 = vrot.lane.b32.xlu0 %v11874_v34, %s9639_s17 }
0x161b   : > { %4882 = vrot.lane.b32.xlu1 %v11206_v0, %s9644_s25 }
0x161c   : > { %4223 = vrot.lane.b32.xlu0 %v11010_v35, %s9643_s22 }
0x161f   : > { %3326 = vrot.lane.b32.xlu1 %v11875_v37, %s9641_s19 }
0x1620   : > { %2667 = vrot.lane.b32.xlu0 %v11876_v40, %s9640_s18 }
0x1621   : > { %v5774_v19 = vpop.xlane.xlu1 %5773 }
0x1623   : > { %3987 = vrot.lane.b32.xlu1 %v11877_v61, %s9642_s20 }
0x1624   : > { %4884 = vrot.lane.b32.xlu0 %v11204_v46, %s9644_s25 }
0x1625   : > { %v5780_v35 = vpop.xlane.xlu1 %5779 }
0x1627   : > { %2008 = vrot.lane.b32.xlu1 %v11878_v17, %s9639_s17 }
0x1628   : > { %3328 = vrot.lane.b32.xlu0 %v11879_v41, %s9641_s19 }
0x162b   : > { %4648 = vrot.lane.b32.xlu1 %v11016_v63, %s9643_s22 }
0x162c   : > { %3989 = vrot.lane.b32.xlu0 %v11880_v51, %s9642_s20 }
0x162f   : > { %2669 = vrot.lane.b32.xlu1 %v11881_v47, %s9640_s18 }
0x1630   : > { %2010 = vrot.lane.b32.xlu0 %v11882_v44, %s9639_s17 }
0x1633   : > { %5309 = vrot.lane.b32.xlu1 %v11211_v56, %s9644_s25 }
0x1634   : > { %4650 = vrot.lane.b32.xlu0 %v11014_v59, %s9643_s22 }
0x1636   : > { %v5771_v18 = vpop.xlane.xlu0 %5770 }
0x1637   : > { %9538 = vrcp.f32 %v5771_v18  ;;  %3330 = vrot.lane.b32.xlu1 %v11883_v55, %s9641_s19 }
0x1638   : > { %2671 = vrot.lane.b32.xlu0 %v11884_v38, %s9640_s18 }
0x163a   : > { %v5777_v33 = vpop.xlane.xlu0 %5776 }
0x163c   : > { %5311 = vrot.lane.b32.xlu0 %v11208_v49, %s9644_s25 }
0x163e   : > { %v9195_v63 = vpop.permute.xlu0 %9194  ;;  %v5783_v46 = vpop.xlane.xlu1 %5782 }
0x163f   : > { %v9197_v0 = vunpack.i.h.bf16 %v9195_v63  ;;  %v9196_v56 = vunpack.i.l.bf16 %v9195_v63 }
0x1640   : > { %3332 = vrot.lane.b32.xlu0 %v11885_v60, %s9641_s19 }
0x1641   : > { %v9539_v59 = vpop.eup %9538  ;;  %v11360_v39 = vpack.c.bf16 %v9197_v0, %v9196_v56 }
0x1642   : > { %v11362_v27 = vpop.xlane.xlu1 %5785  ;;  %v5794_v54 = vmul.f32 %v9539_v59, %v11254_v10 }
0x1643   : > { %8669 = vmatprep.subr.bf16.mxu1 %v11360_v39  ;;  %8703 = vmatprep.subr.bf16.mxu0 %v11360_v39 }
0x1644   : > { %8671 = vmatpush3.bf16.msra.mxu1 %v11360_v39  ;;  %8705 = vmatpush3.bf16.msra.mxu0 %v11360_v39 }
0x1645   : > { %8129 = vmatprep.mubr.msk.f32.mxu0 %vm1125_vm4, %v5794_v54  ;;  %8770 = vmatprep.subr.bf16.mxu1 %v11360_v39 }
0x1646   : > { %v9200_v49 = vpop.permute.xlu1 %9199 }
0x1647   : > { %v9202_v21 = vunpack.i.h.bf16 %v9200_v49  ;;  %v9201_v6 = vunpack.i.l.bf16 %v9200_v49 }
0x1649   : > { %v11371_v11 = vpack.c.bf16 %v9202_v21, %v9201_v6 }
0x164b   : > { %8707 = vmatprep.subr.bf16.mxu0 %v11371_v11 }
0x164c   : > { %8709 = vmatpush3.bf16.msra.mxu0 %v11371_v11 }
0x166f   : > { %v11375_v10 = vpop.xlane.xlu0 %5788 }
0x1673   : > { %v5446_v36 = vpop.xlane.xlu0 %5445 }
0x1674   : > { %9540 = vrcp.f32 %v5446_v36 }
0x1675   : > { %9542 = vrcp.f32 %v5783_v46 }
0x1677   : > { %v9205_v20 = vpop.permute.xlu0 %9204  ;;  %v11377_v48 = vpop.xlane.xlu1 %5791 }
0x1678   : > { %v9207_v13 = vunpack.i.h.bf16 %v9205_v20  ;;  %v9206_v3 = vunpack.i.l.bf16 %v9205_v20 }
0x167a   : > { %v11379_v25 = vpack.c.bf16 %v9207_v13, %v9206_v3 }
0x167b   : > { %v9215_v12 = vpop.permute.xlu0 %9214  ;;  %v5449_v5 = vpop.xlane.xlu1 %5448 }
0x167c   : > { %9544 = vrcp.f32 %v5449_v5  ;;  %8711 = vmatprep.subr.bf16.mxu0 %v11379_v25  ;;  %v9217_v4 = vunpack.i.h.bf16 %v9215_v12  ;;  %v9216_v32 = vunpack.i.l.bf16 %v9215_v12 }
0x167d   : > { %9546 = vrcp.f32 %v5774_v19  ;;  %8713 = vmatpush3.bf16.msra.mxu0 %v11379_v25 }
0x167e   : > { %v9541_v57 = vpop.eup %9540  ;;  %9548 = vrcp.f32 %v5777_v33  ;;  %v8718_v17 = vpack.c.bf16 %v9217_v4, %v9216_v32 }
0x167f   : > { %v1578_v8 = vpop.permute.xlu0 %1577  ;;  %v9210_v7 = vpop.permute.xlu1 %9209  ;;  %v5451_v28 = vmul.f32 %v9541_v57, %v11282_v22  ;;  %9550 = vrcp.f32 %v5780_v35 }
0x1680   : > { %1584 = vst.msk [vmem:[#allocation2] sm:$0xff] %vm1583_vm5, %v1578_v8  ;;  %v9212_v53 = vunpack.i.h.bf16 %v9210_v7  ;;  %v9211_v34 = vunpack.i.l.bf16 %v9210_v7  ;;  %v9543_v22 = vpop.eup %9542  ;;  %9552 = vrcp.f32 %v11362_v27 }
0x1681   : > { %8074 = vmatprep.mubr.msk.f32.mxu1 %vm844_vm3, %v5451_v28  ;;  %v5802_v55 = vmul.f32 %v9543_v22, %v11262_v24  ;;  %9554 = vrcp.f32 %v11375_v10 }
0x1682   : > { %v8714_v37 = vpack.c.bf16 %v9212_v53, %v9211_v34  ;;  %9556 = vrcp.f32 %v11377_v48  ;;  %v11886_v34 = vld [vmem:[#allocation27_spill] sm:$0xff] }
0x1683   : > { %v2239_v40 = vpop.permute.xlu0 %2238  ;;  %v1580_v61 = vpop.permute.xlu1 %1579 }
0x1684   : > { %2245 = vst.msk [vmem:[#allocation2] sm:$0xff] %vm2244_vm6, %v2239_v40  ;;  %8715 = vmatprep.subr.bf16.mxu0 %v8714_v37  ;;  %v11887_v40 = vld [vmem:[#allocation28_spill] sm:$0xff] }
0x1685   : > { %1585 = vst.msk [vmem:[#allocation2 + $0x8] sm:$0xff] %vm1583_vm5, %v1580_v61  ;;  %8717 = vmatpush3.bf16.msra.mxu0 %v8714_v37  ;;  %v11888_v61 = vld [vmem:[#allocation6_spill] sm:$0xff] }
0x1686   : > { %v9545_v41 = vpop.eup %9544  ;;  %8719 = vmatprep.subr.bf16.mxu0 %v8718_v17 }
0x1687   : > { %v9547_v51 = vpop.eup %9546  ;;  %v5453_v47 = vmul.f32 %v9545_v41, %v11290_v58  ;;  %v2900_v44 = vpop.permute.xlu0 %2899  ;;  %v11890_v41 = vld [vmem:[#allocation13_spill] sm:$0xff] }
0x1688   : > { %v2241_v19 = vpop.permute.xlu1 %2240  ;;  %v9549_v18 = vpop.eup %9548  ;;  %2906 = vst.msk [vmem:[#allocation2] sm:$0xff] %vm2905_vm7, %v2900_v44  ;;  %v5796_v38 = vmul.f32 %v9547_v51, %v11246_v30 }
0x1689   : > { %2246 = vst.msk [vmem:[#allocation2 + $0x8] sm:$0xff] %vm2244_vm6, %v2241_v19  ;;  %8075 = vmatmul.mubr.msk.f32.vlgmr.msra.gmra.mrb[86].mxu1 %vm844_vm3, %v5453_v47  ;;  %8721 = vmatpush3.bf16.msra.mxu0 %v8718_v17  ;;  %v9551_v58 = vpop.eup %9550  ;;  %v5798_v63 = vmul.f32 %v9549_v18, %v11258_v29  ;;  %v11891_v47 = vld [vmem:[#allocation14_spill] sm:$0xff]  ;;  %v11894_v18 = vld [vmem:[#allocation29_spill] sm:$0xff] }
0x168a   : > { %8775 = vmatpush3.bf16.msra.mxu1 %v11360_v39  ;;  %8135 = vmatprep.mubr.msk.f32.mxu1 %vm1125_vm4, %v5802_v55  ;;  %v5800_v30 = vmul.f32 %v9551_v58, %v11250_v31  ;;  %v9553_v60 = vpop.eup %9552  ;;  %v11895_v55 = vld [vmem:[#allocation30_spill] sm:$0xff]  ;;  %v11899_v58 = vld [vmem:[#allocation16_spill] sm:$0xff] }
0x168b   : > { %8771 = vmatprep.subr.bf16.mxu1 %v11371_v11  ;;  %v3561_v35 = vpop.permute.xlu0 %3560  ;;  %v9555_v59 = vpop.eup %9554  ;;  %v5804_v39 = vmul.f32 %v9553_v60, %v11266_v62 }
0x168c   : > { %v2902_v33 = vpop.permute.xlu1 %2901  ;;  %3567 = vst.msk [vmem:[#allocation2] sm:$0xff] %vm3566_vm8, %v3561_v35  ;;  %8130 = vmatmul.mubr.msk.f32.vlgmr.msra.gmra.mrb[74].mxu0 %vm1125_vm4, %v5796_v38  ;;  %v9557_v49 = vpop.eup %9556  ;;  %v5806_v21 = vmul.f32 %v9555_v59, %v11278_v23  ;;  %v11898_v38 = vld [vmem:[#allocation15_spill] sm:$0xff]  ;;  %v6012_v35 = vld [vmem:[%s11832_s4] sm:$0xff] }
0x168d   : > { %2907 = vst.msk [vmem:[#allocation2 + $0x8] sm:$0xff] %vm2905_vm7, %v2902_v33  ;;  %8132 = vmatprep.mubr.msk.f32.mxu0 %vm1125_vm4, %v5798_v63  ;;  %v5808_v10 = vmul.f32 %v9557_v49, %v11286_v50  ;;  %v11900_v33 = vld [vmem:[#allocation23_spill] sm:$0xff]  ;;  %v6015_v63 = vld [vmem:[%s11832_s4 + $0x18] sm:$0xff] }
0x168e   : > { %8776 = vmatpush3.bf16.msra.mxu1 %v11371_v11 }
0x168f   : > { %8772 = vmatprep.subr.bf16.mxu1 %v11379_v25  ;;  %v3563_v24 = vpop.permute.xlu0 %3562 }
0x1690   : > { %v2005_v29 = vpop.permute.xlu1 %2004  ;;  %3568 = vst.msk [vmem:[#allocation2 + $0x8] sm:$0xff] %vm3566_vm8, %v3563_v24  ;;  %8133 = vmatmul.mubr.msk.f32.gmra.mrb[76].mxu0 %vm1125_vm4, %v5800_v30  ;;  %v11901_v30 = vld [vmem:[#allocation24_spill] sm:$0xff] }
0x1691   : > { %2028 = vst.msk [vmem:[#allocation2 + $0x10] sm:$0xff] %vm1583_vm5, %v2005_v29  ;;  %v11903_v29 = vld [vmem:[#allocation31_spill] sm:$0xff] }
0x1692   : > { %8777 = vmatpush3.bf16.msra.mxu1 %v11379_v25 }
0x1693   : > { %8773 = vmatprep.subr.bf16.mxu1 %v8714_v37  ;;  %v2007_v46 = vpop.permute.xlu0 %2006 }
0x1694   : > { %v4222_v31 = vpop.permute.xlu1 %4221  ;;  %2029 = vst.msk [vmem:[#allocation2 + $0x18] sm:$0xff] %vm1583_vm5, %v2007_v46  ;;  %v11904_v46 = vld [vmem:[#allocation33_spill] sm:$0xff] }
0x1695   : > { %4228 = vst.msk [vmem:[#allocation2] sm:$0xff] %vm4227_vm9, %v4222_v31 }
0x1696   : > { %8778 = vmatpush3.bf16.msra.mxu1 %v8714_v37 }
0x1697   : > { %8774 = vmatprep.subr.bf16.mxu1 %v8718_v17  ;;  %v4224_v0 = vpop.permute.xlu0 %4223 }
0x1698   : > { %v2666_v56 = vpop.permute.xlu1 %2665  ;;  %4229 = vst.msk [vmem:[#allocation2 + $0x8] sm:$0xff] %vm4227_vm9, %v4224_v0 }
0x1699   : > { %2689 = vst.msk [vmem:[#allocation2 + $0x10] sm:$0xff] %vm2244_vm6, %v2666_v56 }
0x169a   : > { %8779 = vmatpush3.bf16.msra.mxu1 %v8718_v17  ;;  %v11889_v17 = vld [vmem:[#allocation7_spill] sm:$0xff] }
0x169b   : > { %v2668_v27 = vpop.permute.xlu0 %2667 }
0x169c   : > { %v4883_v54 = vpop.permute.xlu1 %4882  ;;  %2690 = vst.msk [vmem:[#allocation2 + $0x18] sm:$0xff] %vm2244_vm6, %v2668_v27 }
0x169d   : > { %4889 = vst.msk [vmem:[#allocation2] sm:$0xff] %vm4888_vm10, %v4883_v54  ;;  %8136 = vmatmul.mubr.msk.f32.vlgmr.msra.gmra.mrb[88].mxu1 %vm1125_vm4, %v5804_v39 }
0x169e   : > { %8138 = vmatprep.mubr.msk.f32.mxu1 %vm1125_vm4, %v5806_v21 }
0x169f   : > { %v4885_v6 = vpop.permute.xlu0 %4884 }
0x16a0   : > { %v3327_v11 = vpop.permute.xlu1 %3326  ;;  %4890 = vst.msk [vmem:[#allocation2 + $0x8] sm:$0xff] %vm4888_vm10, %v4885_v6 }
0x16a1   : > { %3350 = vst.msk [vmem:[#allocation2 + $0x10] sm:$0xff] %vm2905_vm7, %v3327_v11  ;;  %8139 = vmatmul.mubr.msk.f32.gmra.mrb[90].mxu1 %vm1125_vm4, %v5808_v10 }
0x16a3   : > { %v3329_v62 = vpop.permute.xlu0 %3328 }
0x16a4   : > { %v3988_v36 = vpop.permute.xlu1 %3987  ;;  %3351 = vst.msk [vmem:[#allocation2 + $0x18] sm:$0xff] %vm2905_vm7, %v3329_v62 }
0x16a5   : > { %4011 = vst.msk [vmem:[#allocation2 + $0x10] sm:$0xff] %vm3566_vm8, %v3988_v36 }
0x16a7   : > { %v3990_v23 = vpop.permute.xlu0 %3989 }
0x16a8   : > { %v2009_v20 = vpop.permute.xlu1 %2008  ;;  %4012 = vst.msk [vmem:[#allocation2 + $0x18] sm:$0xff] %vm3566_vm8, %v3990_v23 }
0x16a9   : > { %2030 = vst.msk [vmem:[#allocation2 + $0x20] sm:$0xff] %vm1583_vm5, %v2009_v20 }
0x16ab   : > { %v2011_v48 = vpop.permute.xlu0 %2010 }
0x16ac   : > { %v4649_v50 = vpop.permute.xlu1 %4648  ;;  %2031 = vst.msk [vmem:[#allocation2 + $0x28] sm:$0xff] %vm1583_vm5, %v2011_v48 }
0x16ad   : > { %4672 = vst.msk [vmem:[#allocation2 + $0x10] sm:$0xff] %vm4227_vm9, %v4649_v50 }
0x16af   : > { %v4651_v13 = vpop.permute.xlu0 %4650 }
0x16b0   : > { %v2670_v3 = vpop.permute.xlu1 %2669  ;;  %4673 = vst.msk [vmem:[#allocation2 + $0x18] sm:$0xff] %vm4227_vm9, %v4651_v13 }
0x16b1   : > { %2691 = vst.msk [vmem:[#allocation2 + $0x20] sm:$0xff] %vm2244_vm6, %v2670_v3 }
0x16b3   : > { %v2672_v25 = vpop.permute.xlu0 %2671 }
0x16b4   : > { %v5310_v12 = vpop.permute.xlu1 %5309  ;;  %2692 = vst.msk [vmem:[#allocation2 + $0x28] sm:$0xff] %vm2244_vm6, %v2672_v25 }
0x16b5   : > { %5333 = vst.msk [vmem:[#allocation2 + $0x10] sm:$0xff] %vm4888_vm10, %v5310_v12 }
0x16b7   : > { %v5312_v5 = vpop.permute.xlu0 %5311 }
0x16b8   : > { %v3331_v57 = vpop.permute.xlu1 %3330  ;;  %5334 = vst.msk [vmem:[#allocation2 + $0x18] sm:$0xff] %vm4888_vm10, %v5312_v5 }
0x16b9   : > { %3352 = vst.msk [vmem:[#allocation2 + $0x20] sm:$0xff] %vm2905_vm7, %v3331_v57 }
0x16bb   : > { %v3333_v8 = vpop.permute.xlu0 %3332 }
0x16bc   : > { %3353 = vst.msk [vmem:[#allocation2 + $0x28] sm:$0xff] %vm2905_vm7, %v3333_v8 }
0x175c   : > { %v8076_v7 = vpop.f32.mrb[86].mxu1 }
0x175d   : > { %v5532_v28 = vpop.f32.mrb[87].mxu1 }
0x175f   : > { %v8131_v4 = vpop.f32.mrb[74].mxu0 }
0x1760   : > { %5972 = vrot.lane.b32.xlu0 %v8131_v4, %s9645_s26  ;;  %v5923_v32 = vpop.f32.mrb[75].mxu0 }
0x1761   : > { %5970 = vrot.lane.b32.xlu1 %v5923_v32, %s9645_s26 }
0x1763   : > { %v8134_v53 = vpop.f32.mrb[76].mxu0 }
0x1764   : > { %3993 = vrot.lane.b32.xlu0 %v11886_v34, %s9642_s20  ;;  %v5933_v37 = vpop.f32.mrb[77].mxu0 }
0x1765   : > { %3991 = vrot.lane.b32.xlu1 %v11887_v40, %s9642_s20 }
0x1768   : > { %2014 = vrot.lane.b32.xlu0 %v11888_v61, %s9639_s17 }
0x1769   : > { %2012 = vrot.lane.b32.xlu1 %v11889_v17, %s9639_s17 }
0x176c   : > { %4654 = vrot.lane.b32.xlu0 %v11018_v43, %s9643_s22  ;;  %v11892_v43 = vld [vmem:[#allocation21_spill] sm:$0xff] }
0x176d   : > { %4652 = vrot.lane.b32.xlu1 %v11020_v2, %s9643_s22  ;;  %v11893_v2 = vld [vmem:[#allocation22_spill] sm:$0xff] }
0x1770   : > { %v8137_v22 = vpop.f32.mrb[88].mxu1  ;;  %2675 = vrot.lane.b32.xlu0 %v11890_v41, %s9640_s18 }
0x1771   : > { %v5943_v51 = vpop.f32.mrb[89].mxu1  ;;  %2673 = vrot.lane.b32.xlu1 %v11891_v47, %s9640_s18 }
0x1774   : > { %v8140_v44 = vpop.f32.mrb[90].mxu1  ;;  %5315 = vrot.lane.b32.xlu0 %v11213_v52, %s9644_s25  ;;  %v11896_v52 = vld [vmem:[#allocation8_spill] sm:$0xff] }
0x1775   : > { %v5953_v19 = vpop.f32.mrb[91].mxu1  ;;  %5313 = vrot.lane.b32.xlu1 %v11216_v15, %s9644_s25  ;;  %v11897_v15 = vld [vmem:[#allocation9_spill] sm:$0xff] }
0x1778   : > { %3336 = vrot.lane.b32.xlu0 %v11892_v43, %s9641_s19 }
0x1779   : > { %3334 = vrot.lane.b32.xlu1 %v11893_v2, %s9641_s19 }
0x177c   : > { %5976 = vrot.lane.b32.xlu0 %v8134_v53, %s9645_s26 }
0x177d   : > { %5974 = vrot.lane.b32.xlu1 %v5933_v37, %s9645_s26 }
0x1780   : > { %3997 = vrot.lane.b32.xlu0 %v11894_v18, %s9642_s20 }
0x1781   : > { %3995 = vrot.lane.b32.xlu1 %v11895_v55, %s9642_s20 }
0x1784   : > { %2018 = vrot.lane.b32.xlu0 %v11896_v52, %s9639_s17 }
0x1785   : > { %2016 = vrot.lane.b32.xlu1 %v11897_v15, %s9639_s17 }
0x1788   : > { %4658 = vrot.lane.b32.xlu0 %v11022_v16, %s9643_s22  ;;  %v6013_v16 = vld [vmem:[%s11832_s4 + $0x8] sm:$0xff] }
0x1789   : > { %4656 = vrot.lane.b32.xlu1 %v11025_v42, %s9643_s22  ;;  %v8722_v42 = vpack.c.bf16 %v6013_v16, %v6012_v35 }
0x178b   : > { %8723 = vmatprep.subr.bf16.mxu1 %v8722_v42 }
0x178c   : > { %2679 = vrot.lane.b32.xlu0 %v11898_v38, %s9640_s18  ;;  %8725 = vmatpush3.bf16.msra.mxu1 %v8722_v42  ;;  %v7057_v38 = vld [vmem:[%s11833_s5] ss:$0 sm:$0xff] }
0x178d   : > { %2677 = vrot.lane.b32.xlu1 %v11899_v58, %s9640_s18  ;;  %v9598_v58 = vld [vmem:[%s9727_s27 + $0x8] sm:$0xff]  ;;  %v9599_v42 = vld [vmem:[%s9727_s27] sm:$0xff] }
0x1790   : > { %5319 = vrot.lane.b32.xlu0 %v11218_v14, %s9644_s25  ;;  %v6014_v14 = vld [vmem:[%s11832_s4 + $0x10] sm:$0xff] }
0x1791   : > { %5317 = vrot.lane.b32.xlu1 %v11220_v9, %s9644_s25  ;;  %v8726_v24 = vpack.c.bf16 %v6015_v63, %v6014_v14  ;;  %v11902_v9 = vld [vmem:[#allocation32_spill] sm:$0xff] }
0x1793   : > { %8727 = vmatprep.subr.bf16.mxu1 %v8726_v24 }
0x1794   : > { %3340 = vrot.lane.b32.xlu0 %v11900_v33, %s9641_s19  ;;  %8729 = vmatpush3.bf16.msra.mxu1 %v8726_v24  ;;  %v9600_v24 = vld [vmem:[%s9727_s27 + $0x18] sm:$0xff] }
0x1795   : > { %3338 = vrot.lane.b32.xlu1 %v11901_v30, %s9641_s19 }
0x1798   : > { %5545 = vrot.lane.b32.xlu0 %v8076_v7, %s9645_s26 }
0x1799   : > { %3999 = vrot.lane.b32.xlu1 %v11902_v9, %s9642_s20 }
0x179c   : > { %4660 = vrot.lane.b32.xlu0 %v11030_v1, %s9643_s22 }
0x179d   : > { %5543 = vrot.lane.b32.xlu1 %v5532_v28, %s9645_s26 }
0x17a0   : > { %5321 = vrot.lane.b32.xlu0 %v11228_v45, %s9644_s25 }
0x17a1   : > { %4001 = vrot.lane.b32.xlu1 %v11903_v29, %s9642_s20 }
0x17a4   : > { %5980 = vrot.lane.b32.xlu0 %v8137_v22, %s9645_s26 }
0x17a5   : > { %4662 = vrot.lane.b32.xlu1 %v11904_v46, %s9643_s22 }
0x17a8   : > { %5982 = vrot.lane.b32.xlu0 %v5953_v19, %s9645_s26 }
0x17a9   : > { %5978 = vrot.lane.b32.xlu1 %v5943_v51, %s9645_s26 }
0x17ad   : > { %5323 = vrot.lane.b32.xlu1 %v11224_v26, %s9644_s25 }
0x17b1   : > { %5984 = vrot.lane.b32.xlu1 %v8140_v44, %s9645_s26 }
0x17d2   : > { %v5973_v1 = vpop.permute.xlu0 %5972 }
0x17d3   : > { %5995 = vst.msk [vmem:[#allocation2 + $0x18] sm:$0xff] %vm5549_vm11, %v5973_v1  ;;  %v5971_v45 = vpop.permute.xlu1 %5970  ;;  %v9601_v1 = vld [vmem:[%s9727_s27 + $0x10] sm:$0xff] }
0x17d4   : > { %5994 = vst.msk [vmem:[#allocation2 + $0x10] sm:$0xff] %vm5549_vm11, %v5971_v45 }
0x17d6   : > { %v3994_v31 = vpop.permute.xlu0 %3993 }
0x17d7   : > { %4014 = vst.msk [vmem:[#allocation2 + $0x28] sm:$0xff] %vm3566_vm8, %v3994_v31  ;;  %v3992_v0 = vpop.permute.xlu1 %3991 }
0x17d8   : > { %4013 = vst.msk [vmem:[#allocation2 + $0x20] sm:$0xff] %vm3566_vm8, %v3992_v0 }
0x17da   : > { %v2015_v56 = vpop.permute.xlu0 %2014  ;;  %v6005_v51 = vld [vmem:[#allocation2 + $0x18] sm:$0xff] }
0x17db   : > { %2033 = vst.msk [vmem:[#allocation2 + $0x38] sm:$0xff] %vm1583_vm5, %v2015_v56  ;;  %v2013_v60 = vpop.permute.xlu1 %2012  ;;  %v6004_v17 = vld [vmem:[#allocation2 + $0x10] sm:$0xff] }
0x17dc   : > { %2032 = vst.msk [vmem:[#allocation2 + $0x30] sm:$0xff] %vm1583_vm5, %v2013_v60 }
0x17de   : > { %v4655_v26 = vpop.permute.xlu0 %4654 }
0x17df   : > { %4675 = vst.msk [vmem:[#allocation2 + $0x28] sm:$0xff] %vm4227_vm9, %v4655_v26  ;;  %v4653_v59 = vpop.permute.xlu1 %4652 }
0x17e0   : > { %4674 = vst.msk [vmem:[#allocation2 + $0x20] sm:$0xff] %vm4227_vm9, %v4653_v59  ;;  %v9602_v59 = vld [vmem:[%s9727_s27 + $0x28] sm:$0xff] }
0x17e2   : > { %v2676_v39 = vpop.permute.xlu0 %2675 }
0x17e3   : > { %2694 = vst.msk [vmem:[#allocation2 + $0x38] sm:$0xff] %vm2244_vm6, %v2676_v39  ;;  %v2674_v27 = vpop.permute.xlu1 %2673 }
0x17e4   : > { %2693 = vst.msk [vmem:[#allocation2 + $0x30] sm:$0xff] %vm2244_vm6, %v2674_v27  ;;  %v9603_v27 = vld [vmem:[%s9727_s27 + $0x20] sm:$0xff] }
0x17e6   : > { %v5316_v54 = vpop.permute.xlu0 %5315 }
0x17e7   : > { %5336 = vst.msk [vmem:[#allocation2 + $0x28] sm:$0xff] %vm4888_vm10, %v5316_v54  ;;  %v5314_v49 = vpop.permute.xlu1 %5313 }
0x17e8   : > { %5335 = vst.msk [vmem:[#allocation2 + $0x20] sm:$0xff] %vm4888_vm10, %v5314_v49 }
0x17ea   : > { %v3337_v21 = vpop.permute.xlu0 %3336 }
0x17eb   : > { %3355 = vst.msk [vmem:[#allocation2 + $0x38] sm:$0xff] %vm2905_vm7, %v3337_v21  ;;  %v3335_v6 = vpop.permute.xlu1 %3334 }
0x17ec   : > { %3354 = vst.msk [vmem:[#allocation2 + $0x30] sm:$0xff] %vm2905_vm7, %v3335_v6 }
0x17ee   : > { %v5977_v11 = vpop.permute.xlu0 %5976 }
0x17ef   : > { %5997 = vst.msk [vmem:[#allocation2 + $0x28] sm:$0xff] %vm5549_vm11, %v5977_v11  ;;  %v5975_v10 = vpop.permute.xlu1 %5974 }
0x17f0   : > { %5996 = vst.msk [vmem:[#allocation2 + $0x20] sm:$0xff] %vm5549_vm11, %v5975_v10 }
0x17f2   : > { %v3998_v62 = vpop.permute.xlu0 %3997 }
0x17f3   : > { %4016 = vst.msk [vmem:[#allocation2 + $0x38] sm:$0xff] %vm3566_vm8, %v3998_v62  ;;  %v3996_v36 = vpop.permute.xlu1 %3995 }
0x17f4   : > { %4015 = vst.msk [vmem:[#allocation2 + $0x30] sm:$0xff] %vm3566_vm8, %v3996_v36  ;;  %v9604_v36 = vld [vmem:[%s9727_s27 + $0x38] sm:$0xff] }
0x17f6   : > { %v2019_v23 = vpop.permute.xlu0 %2018  ;;  %v6007_v19 = vld [vmem:[#allocation2 + $0x28] sm:$0xff] }
0x17f7   : > { %2035 = vst.msk [vmem:[#allocation2 + $0x48] sm:$0xff] %vm1583_vm5, %v2019_v23  ;;  %v2017_v20 = vpop.permute.xlu1 %2016  ;;  %v6006_v47 = vld [vmem:[#allocation2 + $0x20] sm:$0xff] }
0x17f8   : > { %2034 = vst.msk [vmem:[#allocation2 + $0x40] sm:$0xff] %vm1583_vm5, %v2017_v20  ;;  %v9605_v20 = vld [vmem:[%s9727_s27 + $0x30] sm:$0xff] }
0x17fa   : > { %v4659_v48 = vpop.permute.xlu0 %4658 }
0x17fb   : > { %4677 = vst.msk [vmem:[#allocation2 + $0x38] sm:$0xff] %vm4227_vm9, %v4659_v48  ;;  %v4657_v50 = vpop.permute.xlu1 %4656 }
0x17fc   : > { %4676 = vst.msk [vmem:[#allocation2 + $0x30] sm:$0xff] %vm4227_vm9, %v4657_v50 }
0x17fe   : > { %v2680_v13 = vpop.permute.xlu0 %2679 }
0x17ff   : > { %2696 = vst.msk [vmem:[#allocation2 + $0x48] sm:$0xff] %vm2244_vm6, %v2680_v13  ;;  %v2678_v3 = vpop.permute.xlu1 %2677 }
0x1800   : > { %2695 = vst.msk [vmem:[#allocation2 + $0x40] sm:$0xff] %vm2244_vm6, %v2678_v3 }
0x1802   : > { %v5320_v25 = vpop.permute.xlu0 %5319 }
0x1803   : > { %5338 = vst.msk [vmem:[#allocation2 + $0x38] sm:$0xff] %vm4888_vm10, %v5320_v25  ;;  %v5318_v12 = vpop.permute.xlu1 %5317 }
0x1804   : > { %5337 = vst.msk [vmem:[#allocation2 + $0x30] sm:$0xff] %vm4888_vm10, %v5318_v12 }
0x1806   : > { %v3341_v5 = vpop.permute.xlu0 %3340 }
0x1807   : > { %3357 = vst.msk [vmem:[#allocation2 + $0x48] sm:$0xff] %vm2905_vm7, %v3341_v5  ;;  %v3339_v57 = vpop.permute.xlu1 %3338 }
0x1808   : > { %3356 = vst.msk [vmem:[#allocation2 + $0x40] sm:$0xff] %vm2905_vm7, %v3339_v57  ;;  %v9606_v57 = vld [vmem:[%s9727_s27 + $0x48] sm:$0xff] }
0x180a   : > { %v5546_v8 = vpop.permute.xlu0 %5545 }
0x180b   : > { %5551 = vst.msk [vmem:[#allocation2 + $0x8] sm:$0xff] %vm5549_vm11, %v5546_v8  ;;  %v4000_v7 = vpop.permute.xlu1 %3999 }
0x180c   : > { %4017 = vst.msk [vmem:[#allocation2 + $0x40] sm:$0xff] %vm3566_vm8, %v4000_v7 }
0x180e   : > { %v4661_v28 = vpop.permute.xlu0 %4660 }
0x180f   : > { %4678 = vst.msk [vmem:[#allocation2 + $0x40] sm:$0xff] %vm4227_vm9, %v4661_v28  ;;  %v5544_v4 = vpop.permute.xlu1 %5543  ;;  %v9607_v28 = vld [vmem:[%s9727_s27 + $0x40] sm:$0xff] }
0x1810   : > { %5550 = vst.msk [vmem:[#allocation2] sm:$0xff] %vm5549_vm11, %v5544_v4 }
0x1812   : > { %v5322_v32 = vpop.permute.xlu0 %5321  ;;  %v6003_v61 = vld [vmem:[#allocation2 + $0x8] sm:$0xff] }
0x1813   : > { %5339 = vst.msk [vmem:[#allocation2 + $0x40] sm:$0xff] %vm4888_vm10, %v5322_v32  ;;  %v4002_v53 = vpop.permute.xlu1 %4001 }
0x1814   : > { %4018 = vst.msk [vmem:[#allocation2 + $0x48] sm:$0xff] %vm3566_vm8, %v4002_v53 }
0x1816   : > { %v5981_v34 = vpop.permute.xlu0 %5980 }
0x1817   : > { %5999 = vst.msk [vmem:[#allocation2 + $0x38] sm:$0xff] %vm5549_vm11, %v5981_v34  ;;  %v4663_v37 = vpop.permute.xlu1 %4662  ;;  %v6002_v40 = vld [vmem:[#allocation2] sm:$0xff] }
0x1818   : > { %4679 = vst.msk [vmem:[#allocation2 + $0x48] sm:$0xff] %vm4227_vm9, %v4663_v37  ;;  %8149 = vmatprep.mubr.msk.f32.mxu1 %vm429_vm0, %v6002_v40 }
0x1819   : > { %8150 = vmatmul.mubr.msk.f32.vlgmr.msra.gmra.mrb[92].mxu1 %vm429_vm0, %v6003_v61 }
0x181a   : > { %v5983_v22 = vpop.permute.xlu0 %5982  ;;  %8152 = vmatprep.mubr.msk.f32.mxu1 %vm429_vm0, %v6004_v17 }
0x181b   : > { %6000 = vst.msk [vmem:[#allocation2 + $0x40] sm:$0xff] %vm5549_vm11, %v5983_v22  ;;  %v5979_v41 = vpop.permute.xlu1 %5978 }
0x181c   : > { %5998 = vst.msk [vmem:[#allocation2 + $0x30] sm:$0xff] %vm5549_vm11, %v5979_v41 }
0x181d   : > { %8153 = vmatmul.mubr.msk.f32.gmra.mrb[94].mxu1 %vm429_vm0, %v6005_v51 }
0x181e   : > { %8155 = vmatprep.mubr.msk.f32.mxu1 %vm429_vm0, %v6006_v47  ;;  %v6009_v18 = vld [vmem:[#allocation2 + $0x38] sm:$0xff] }
0x181f   : > { %v5324_v44 = vpop.permute.xlu1 %5323 }
0x1820   : > { %5340 = vst.msk [vmem:[#allocation2 + $0x48] sm:$0xff] %vm4888_vm10, %v5324_v44 }
0x1821   : > { %8156 = vmatmul.mubr.msk.f32.gmra.mrb[96].mxu1 %vm429_vm0, %v6007_v19 }
0x1822   : > { %v6010_v55 = vld [vmem:[#allocation2 + $0x40] sm:$0xff] }
0x1823   : > { %v5985_v43 = vpop.permute.xlu1 %5984  ;;  %v6008_v2 = vld [vmem:[#allocation2 + $0x30] sm:$0xff] }
0x1824   : > { %6001 = vst.msk [vmem:[#allocation2 + $0x48] sm:$0xff] %vm5549_vm11, %v5985_v43  ;;  %8158 = vmatprep.mubr.msk.f32.mxu1 %vm429_vm0, %v6008_v2 }
0x1825   : > { %8159 = vmatmul.mubr.msk.f32.gmra.mrb[98].mxu1 %vm429_vm0, %v6009_v18 }
0x1826   : > { %8161 = vmatprep.mubr.msk.f32.mxu1 %vm429_vm0, %v6010_v55 }
0x182b   : > { %v6011_v52 = vld [vmem:[#allocation2 + $0x48] sm:$0xff] }
0x182c   : > { %8162 = vmatmul.mubr.msk.f32.gmra.mrb[100].mxu1 %vm429_vm0, %v6011_v52 }
0x18ec   : > { %v8151_v15 = vpop.f32.mrb[92].mxu1 }
0x18ed   : > { %v6162_v35 = vadd.f32 %v9598_v58, %v8151_v15  ;;  %v6112_v16 = vpop.f32.mrb[93].mxu1 }
0x18ee   : > { %v6161_v33 = vadd.f32 %v9599_v42, %v6112_v16 }
0x18ef   : > { %v11576_v14 = vadd.f32 %v7057_v38, %v6162_v35 }
0x18f0   : > { %v11578_v63 = vadd.f32 %v7057_v38, %v6161_v33  ;;  %v8154_v30 = vpop.f32.mrb[94].mxu1 }
0x18f1   : > { %v6164_v9 = vadd.f32 %v9600_v24, %v8154_v30  ;;  %v6122_v29 = vpop.f32.mrb[95].mxu1  ;;  %v6193_v46 = vsel %vm429_vm0, %v11576_v14, 0.0 }
0x18f2   : > { %v6163_v45 = vadd.f32 %v9601_v1, %v6122_v29  ;;  %6194 = vadd.xlane.f32.xlu1 %v6193_v46  ;;  %v6190_v31 = vsel %vm429_vm0, %v11578_v63, 0.0 }
0x18f3   : > { %6191 = vadd.xlane.f32.xlu0 %v6190_v31  ;;  %v11588_v60 = vadd.f32 %v7057_v38, %v6164_v9 }
0x18f4   : > { %v11586_v0 = vadd.f32 %v7057_v38, %v6163_v45  ;;  %v8157_v56 = vpop.f32.mrb[96].mxu1 }
0x18f5   : > { %v6132_v26 = vpop.f32.mrb[97].mxu1  ;;  %v6166_v39 = vadd.f32 %v9602_v59, %v8157_v56  ;;  %v6199_v10 = vsel %vm429_vm0, %v11588_v60, 0.0 }
0x18f6   : > { %v6165_v54 = vadd.f32 %v9603_v27, %v6132_v26  ;;  %v6196_v49 = vsel %vm429_vm0, %v11586_v0, 0.0 }
0x18f7   : > { %6197 = vadd.xlane.f32.xlu0 %v6196_v49  ;;  %v11598_v62 = vadd.f32 %v7057_v38, %v6166_v39 }
0x18f8   : > { %v11594_v21 = vadd.f32 %v7057_v38, %v6165_v54  ;;  %v8160_v6 = vpop.f32.mrb[98].mxu1 }
0x18f9   : > { %v6142_v11 = vpop.f32.mrb[99].mxu1  ;;  %v6168_v23 = vadd.f32 %v9604_v36, %v8160_v6  ;;  %v6205_v25 = vsel %vm429_vm0, %v11598_v62, 0.0 }
0x18fa   : > { %v6167_v48 = vadd.f32 %v9605_v20, %v6142_v11  ;;  %v6202_v50 = vsel %vm429_vm0, %v11594_v21, 0.0 }
0x18fb   : > { %6200 = vadd.xlane.f32.xlu0 %v6199_v10  ;;  %6203 = vadd.xlane.f32.xlu1 %v6202_v50  ;;  %v11606_v3 = vadd.f32 %v7057_v38, %v6168_v23 }
0x18fc   : > { %v11604_v13 = vadd.f32 %v7057_v38, %v6167_v48 }
0x18fd   : > { %v6211_v53 = vsel %vm429_vm0, %v11606_v3, 0.0 }
0x18fe   : > { %v6208_v12 = vsel %vm429_vm0, %v11604_v13, 0.0 }
0x18ff   : > { %6206 = vadd.xlane.f32.xlu0 %v6205_v25  ;;  %6209 = vadd.xlane.f32.xlu1 %v6208_v12  ;;  %v8163_v5 = vpop.f32.mrb[100].mxu1 }
0x1900   : > { %v6170_v8 = vadd.f32 %v9606_v57, %v8163_v5  ;;  %v6152_v7 = vpop.f32.mrb[101].mxu1 }
0x1901   : > { %v6169_v4 = vadd.f32 %v9607_v28, %v6152_v7 }
0x1902   : > { %v11614_v32 = vadd.f32 %v7057_v38, %v6170_v8 }
0x1903   : > { %v11618_v34 = vadd.f32 %v7057_v38, %v6169_v4  ;;  %6212 = vadd.xlane.f32.xlu0 %v6211_v53  ;;  %v6352_v4 = vld [vmem:[%s11836_s8] sm:$0xff]  ;;  %v6353_v53 = vld [vmem:[%s11836_s8 + $0x8] sm:$0xff] }
0x1904   : > { %v6217_v40 = vsel %vm429_vm0, %v11614_v32, 0.0 }
0x1905   : > { %v6214_v37 = vsel %vm429_vm0, %v11618_v34, 0.0 }
0x1906   : > { %6215 = vadd.xlane.f32.xlu1 %v6214_v37  ;;  %v8730_v37 = vpack.c.bf16 %v6353_v53, %v6352_v4 }
0x1907   : > { %6218 = vadd.xlane.f32.xlu0 %v6217_v40  ;;  %v6354_v40 = vld [vmem:[%s11836_s8 + $0x10] sm:$0xff] }
0x1908   : > { %8731 = vmatprep.subr.bf16.mxu0 %v8730_v37 }
0x1909   : > { %8733 = vmatpush3.bf16.msra.mxu0 %v8730_v37 }
0x197f   : > { %v6195_v61 = vpop.xlane.xlu1 %6194 }
0x1980   : > { %v6221_v17 = vmul.f32 0.03125, %v6195_v61  ;;  %v6192_v22 = vpop.xlane.xlu0 %6191  ;;  %v6355_v61 = vld [vmem:[%s11836_s8 + $0x18] sm:$0xff] }
0x1981   : > { %v6220_v41 = vmul.f32 0.03125, %v6192_v22  ;;  %v6558_v22 = vld [vmem:[%s11838_s10] sm:$0xff] }
0x1982   : > { %v11625_v51 = vsub.f32 %v11576_v14, %v6221_v17  ;;  %v8734_v17 = vpack.c.bf16 %v6355_v61, %v6354_v40 }
0x1983   : > { %v11628_v47 = vsub.f32 %v11578_v63, %v6220_v41  ;;  %v6559_v41 = vld [vmem:[%s11838_s10 + $0x8] sm:$0xff] }
0x1984   : > { %v6198_v44 = vpop.xlane.xlu0 %6197  ;;  %v6241_v19 = vmul.f32 %v11625_v51, %v11625_v51  ;;  %8735 = vmatprep.subr.bf16.mxu0 %v8734_v17 }
0x1985   : > { %v6222_v43 = vmul.f32 0.03125, %v6198_v44  ;;  %v6240_v2 = vmul.f32 %v11628_v47, %v11628_v47  ;;  %8737 = vmatpush3.bf16.msra.mxu0 %v8734_v17  ;;  %v6560_v44 = vld [vmem:[%s11838_s10 + $0x10] sm:$0xff] }
0x1986   : > { %v6253_v18 = vsel %vm429_vm0, %v6241_v19, 0.0  ;;  %v8738_v19 = vpack.c.bf16 %v6559_v41, %v6558_v22 }
0x1987   : > { %v11636_v55 = vsub.f32 %v11586_v0, %v6222_v43  ;;  %6254 = vadd.xlane.f32.xlu0 %v6253_v18  ;;  %v6250_v52 = vsel %vm429_vm0, %v6240_v2, 0.0  ;;  %v6561_v43 = vld [vmem:[%s11838_s10 + $0x18] sm:$0xff]  ;;  %v6562_v18 = vld [vmem:[%s11838_s10 + $0x20] sm:$0xff] }
0x1988   : > { %v6201_v15 = vpop.xlane.xlu0 %6200  ;;  %v6204_v38 = vpop.xlane.xlu1 %6203  ;;  %6251 = vadd.xlane.f32.xlu1 %v6250_v52  ;;  %v8742_v2 = vpack.c.bf16 %v6561_v43, %v6560_v44  ;;  %v6563_v52 = vld [vmem:[%s11838_s10 + $0x28] sm:$0xff]  ;;  %8739 = vmatprep.subr.bf16.mxu1 %v8738_v19 }
0x1989   : > { %v6223_v58 = vmul.f32 0.03125, %v6201_v15  ;;  %v6224_v35 = vmul.f32 0.03125, %v6204_v38  ;;  %v6242_v16 = vmul.f32 %v11636_v55, %v11636_v55  ;;  %8741 = vmatpush3.bf16.msra.mxu1 %v8738_v19  ;;  %v8746_v15 = vpack.c.bf16 %v6563_v52, %v6562_v18 }
0x198a   : > { %8743 = vmatprep.subr.bf16.mxu1 %v8742_v2 }
0x198b   : > { %v11642_v42 = vsub.f32 %v11588_v60, %v6223_v58  ;;  %v11645_v33 = vsub.f32 %v11594_v21, %v6224_v35  ;;  %v6256_v30 = vsel %vm429_vm0, %v6242_v16, 0.0 }
0x198c   : > { %v6207_v24 = vpop.xlane.xlu0 %6206  ;;  %v6210_v9 = vpop.xlane.xlu1 %6209  ;;  %6257 = vadd.xlane.f32.xlu1 %v6256_v30 }
0x198d   : > { %v6225_v29 = vmul.f32 0.03125, %v6207_v24  ;;  %v6226_v46 = vmul.f32 0.03125, %v6210_v9  ;;  %v6243_v1 = vmul.f32 %v11642_v42, %v11642_v42  ;;  %v6244_v45 = vmul.f32 %v11645_v33, %v11645_v33  ;;  %8745 = vmatpush3.bf16.msra.mxu1 %v8742_v2 }
0x198e   : > { %8747 = vmatprep.subr.bf16.mxu1 %v8746_v15 }
0x198f   : > { %v11653_v31 = vsub.f32 %v11598_v62, %v6225_v29  ;;  %v11656_v56 = vsub.f32 %v11604_v13, %v6226_v46  ;;  %v6259_v26 = vsel %vm429_vm0, %v6243_v1, 0.0  ;;  %v6262_v59 = vsel %vm429_vm0, %v6244_v45, 0.0 }
0x1990   : > { %v6213_v39 = vpop.xlane.xlu0 %6212  ;;  %6260 = vadd.xlane.f32.xlu0 %v6259_v26  ;;  %6263 = vadd.xlane.f32.xlu1 %v6262_v59 }
0x1991   : > { %v6227_v27 = vmul.f32 0.03125, %v6213_v39  ;;  %v6245_v54 = vmul.f32 %v11653_v31, %v11653_v31  ;;  %v6246_v49 = vmul.f32 %v11656_v56, %v11656_v56  ;;  %8749 = vmatpush3.bf16.msra.mxu1 %v8746_v15 }
0x1993   : > { %v11665_v6 = vsub.f32 %v11606_v3, %v6227_v27  ;;  %v6216_v11 = vpop.xlane.xlu1 %6215  ;;  %v6265_v10 = vsel %vm429_vm0, %v6245_v54, 0.0  ;;  %v6268_v36 = vsel %vm429_vm0, %v6246_v49, 0.0 }
0x1994   : > { %v6228_v23 = vmul.f32 0.03125, %v6216_v11  ;;  %6266 = vadd.xlane.f32.xlu0 %v6265_v10  ;;  %v6219_v20 = vpop.xlane.xlu0 %6218  ;;  %6269 = vadd.xlane.f32.xlu1 %v6268_v36 }
0x1995   : > { %v6229_v48 = vmul.f32 0.03125, %v6219_v20  ;;  %v6247_v50 = vmul.f32 %v11665_v6, %v11665_v6 }
0x1996   : > { %v11672_v25 = vsub.f32 %v11618_v34, %v6228_v23  ;;  %v11717_v23 = vld [vmem:[%s11834_s6] ss:$0 sm:$0xff] }
0x1997   : > { %v11675_v12 = vsub.f32 %v11614_v32, %v6229_v48  ;;  %v6271_v5 = vsel %vm429_vm0, %v6247_v50, 0.0 }
0x1998   : > { %6272 = vadd.xlane.f32.xlu0 %v6271_v5  ;;  %v6248_v57 = vmul.f32 %v11672_v25, %v11672_v25 }
0x1999   : > { %v6249_v8 = vmul.f32 %v11675_v12, %v11675_v12 }
0x199a   : > { %v6274_v7 = vsel %vm429_vm0, %v6248_v57, 0.0 }
0x199b   : > { %6275 = vadd.xlane.f32.xlu1 %v6274_v7  ;;  %v6277_v28 = vsel %vm429_vm0, %v6249_v8, 0.0  ;;  %v7059_v7 = vld [vmem:[%s11835_s7] ss:$0 sm:$0xff] }
0x199c   : > { %6278 = vadd.xlane.f32.xlu0 %v6277_v28 }
0x1a14   : > { %v6255_v38 = vpop.xlane.xlu0 %6254 }
0x1a15   : > { %v6281_v58 = vmul.f32 0.03125, %v6255_v38  ;;  %v6252_v35 = vpop.xlane.xlu1 %6251 }
0x1a16   : > { %v6280_v16 = vmul.f32 0.03125, %v6252_v35 }
0x1a17   : > { %v6291_v30 = vadd.f32 1e-05, %v6281_v58 }
0x1a18   : > { %v6290_v24 = vadd.f32 1e-05, %v6280_v16 }
0x1a19   : > { %9558 = vrsqrt.f32 %v6291_v30  ;;  %v6258_v9 = vpop.xlane.xlu1 %6257 }
0x1a1a   : > { %9560 = vrsqrt.f32 %v6290_v24  ;;  %v6282_v29 = vmul.f32 0.03125, %v6258_v9 }
0x1a1c   : > { %v6292_v46 = vadd.f32 1e-05, %v6282_v29 }
0x1a1d   : > { %v6261_v1 = vpop.xlane.xlu0 %6260  ;;  %v6264_v45 = vpop.xlane.xlu1 %6263 }
0x1a1e   : > { %9562 = vrsqrt.f32 %v6292_v46  ;;  %v6283_v26 = vmul.f32 0.03125, %v6261_v1  ;;  %v6284_v59 = vmul.f32 0.03125, %v6264_v45 }
0x1a20   : > { %v6293_v39 = vadd.f32 1e-05, %v6283_v26  ;;  %v6294_v27 = vadd.f32 1e-05, %v6284_v59 }
0x1a21   : > { %v6267_v54 = vpop.xlane.xlu0 %6266  ;;  %v6270_v49 = vpop.xlane.xlu1 %6269 }
0x1a22   : > { %9564 = vrsqrt.f32 %v6293_v39  ;;  %v6285_v11 = vmul.f32 0.03125, %v6267_v54  ;;  %v6286_v10 = vmul.f32 0.03125, %v6270_v49 }
0x1a23   : > { %v9559_v36 = vpop.eup %9558  ;;  %9566 = vrsqrt.f32 %v6294_v27 }
0x1a24   : > { %v9561_v20 = vpop.eup %9560  ;;  %v6311_v48 = vmul.f32 %v9559_v36, %v11625_v51  ;;  %v6295_v50 = vadd.f32 1e-05, %v6285_v11  ;;  %v6296_v5 = vadd.f32 1e-05, %v6286_v10 }
0x1a25   : > { %v6273_v57 = vpop.xlane.xlu0 %6272  ;;  %v6310_v8 = vmul.f32 %v9561_v20, %v11628_v47  ;;  %v6564_v20 = vld [vmem:[%s11838_s10 + $0x30] sm:$0xff] }
0x1a26   : > { %v6327_v28 = vmul.f32 %v11717_v23, %v6311_v48  ;;  %9568 = vrsqrt.f32 %v6295_v50  ;;  %v6287_v4 = vmul.f32 0.03125, %v6273_v57  ;;  %v6567_v48 = vld [vmem:[%s11838_s10 + $0x48] sm:$0xff]  ;;  %v6569_v57 = vld [vmem:[%s11838_s10 + $0x58] sm:$0xff] }
0x1a27   : > { %9570 = vrsqrt.f32 %v6296_v5  ;;  %v6326_v53 = vmul.f32 %v11717_v23, %v6310_v8  ;;  %v6568_v5 = vld [vmem:[%s11838_s10 + $0x50] sm:$0xff] }
0x1a28   : > { %v9563_v37 = vpop.eup %9562  ;;  %v6297_v40 = vadd.f32 1e-05, %v6287_v4  ;;  %v6276_v61 = vpop.xlane.xlu1 %6275  ;;  %v6343_v47 = vadd.f32 %v7059_v7, %v6327_v28  ;;  %v8758_v8 = vpack.c.bf16 %v6569_v57, %v6568_v5  ;;  %v6571_v28 = vld [vmem:[%s11838_s10 + $0x68] sm:$0xff] }
0x1a29   : > { %v6288_v51 = vmul.f32 0.03125, %v6276_v61  ;;  %v6279_v17 = vpop.xlane.xlu0 %6278  ;;  %v6342_v22 = vadd.f32 %v7059_v7, %v6326_v53  ;;  %v6312_v41 = vmul.f32 %v9563_v37, %v11636_v55  ;;  %v6572_v53 = vld [vmem:[%s11838_s10 + $0x70] sm:$0xff]  ;;  %v6573_v37 = vld [vmem:[%s11838_s10 + $0x78] sm:$0xff]  ;;  %v7060_v61 = vld [vmem:[%s11837_s9] ss:$0 sm:$0xff] }
0x1a2a   : > { %9572 = vrsqrt.f32 %v6297_v40  ;;  %v6289_v44 = vmul.f32 0.03125, %v6279_v17  ;;  %v8766_v40 = vpack.c.bf16 %v6573_v37, %v6572_v53 }
0x1a2b   : > { %v6298_v19 = vadd.f32 1e-05, %v6288_v51  ;;  %8172 = vmatprep.mubr.msk.f32.mxu0 %vm429_vm0, %v6342_v22  ;;  %v6328_v43 = vmul.f32 %v11717_v23, %v6312_v41 }
0x1a2c   : > { %v9565_v2 = vpop.eup %9564  ;;  %v6299_v18 = vadd.f32 1e-05, %v6289_v44  ;;  %8173 = vmatmul.mubr.msk.f32.vlgmr.msra.gmra.mrb[78].mxu0 %vm429_vm0, %v6343_v47 }
0x1a2d   : > { %v9567_v52 = vpop.eup %9566  ;;  %9574 = vrsqrt.f32 %v6298_v19  ;;  %v6344_v15 = vadd.f32 %v7059_v7, %v6328_v43  ;;  %v6313_v38 = vmul.f32 %v9565_v2, %v11642_v42 }
0x1a2e   : > { %9576 = vrsqrt.f32 %v6299_v18  ;;  %v6314_v55 = vmul.f32 %v9567_v52, %v11645_v33 }
0x1a2f   : > { %8175 = vmatprep.mubr.msk.f32.mxu0 %vm429_vm0, %v6344_v15  ;;  %v6329_v58 = vmul.f32 %v11717_v23, %v6313_v38 }
0x1a30   : > { %v9569_v35 = vpop.eup %9568  ;;  %v6330_v16 = vmul.f32 %v11717_v23, %v6314_v55 }
0x1a31   : > { %v9571_v30 = vpop.eup %9570  ;;  %v6345_v24 = vadd.f32 %v7059_v7, %v6329_v58  ;;  %v6315_v9 = vmul.f32 %v9569_v35, %v11653_v31 }
0x1a32   : > { %v6346_v29 = vadd.f32 %v7059_v7, %v6330_v16  ;;  %v6316_v46 = vmul.f32 %v9571_v30, %v11656_v56 }
0x1a33   : > { %8176 = vmatmul.mubr.msk.f32.gmra.mrb[80].mxu0 %vm429_vm0, %v6345_v24  ;;  %v6331_v42 = vmul.f32 %v11717_v23, %v6315_v9 }
0x1a34   : > { %v9573_v1 = vpop.eup %9572  ;;  %8178 = vmatprep.mubr.msk.f32.mxu0 %vm429_vm0, %v6346_v29  ;;  %v6332_v33 = vmul.f32 %v11717_v23, %v6316_v46 }
0x1a35   : > { %v6347_v45 = vadd.f32 %v7059_v7, %v6331_v42  ;;  %v6317_v26 = vmul.f32 %v9573_v1, %v11665_v6 }
0x1a36   : > { %v6348_v59 = vadd.f32 %v7059_v7, %v6332_v33 }
0x1a37   : > { %v9575_v39 = vpop.eup %9574  ;;  %8179 = vmatmul.mubr.msk.f32.gmra.mrb[82].mxu0 %vm429_vm0, %v6347_v45  ;;  %v6333_v31 = vmul.f32 %v11717_v23, %v6317_v26 }
0x1a38   : > { %v9577_v27 = vpop.eup %9576  ;;  %8181 = vmatprep.mubr.msk.f32.mxu0 %vm429_vm0, %v6348_v59  ;;  %v6318_v56 = vmul.f32 %v9575_v39, %v11672_v25  ;;  %v6565_v25 = vld [vmem:[%s11838_s10 + $0x38] sm:$0xff] }
0x1a39   : > { %v6349_v54 = vadd.f32 %v7059_v7, %v6333_v31  ;;  %v6319_v49 = vmul.f32 %v9577_v27, %v11675_v12  ;;  %v8750_v12 = vpack.c.bf16 %v6565_v25, %v6564_v20 }
0x1a3a   : > { %v6334_v11 = vmul.f32 %v11717_v23, %v6318_v56 }
0x1a3b   : > { %8182 = vmatmul.mubr.msk.f32.gmra.mrb[84].mxu0 %vm429_vm0, %v6349_v54  ;;  %v6335_v6 = vmul.f32 %v11717_v23, %v6319_v49  ;;  %8751 = vmatprep.subr.bf16.mxu1 %v8750_v12  ;;  %v6566_v23 = vld [vmem:[%s11838_s10 + $0x40] sm:$0xff] }
0x1a3c   : > { %v6350_v10 = vadd.f32 %v7059_v7, %v6334_v11  ;;  %8753 = vmatpush3.bf16.msra.mxu1 %v8750_v12  ;;  %v8754_v50 = vpack.c.bf16 %v6567_v48, %v6566_v23 }
0x1a3d   : > { %v6351_v36 = vadd.f32 %v7059_v7, %v6335_v6  ;;  %v6570_v7 = vld [vmem:[%s11838_s10 + $0x60] sm:$0xff] }
0x1a3e   : > { %8184 = vmatprep.mubr.msk.f32.mxu0 %vm429_vm0, %v6350_v10  ;;  %8755 = vmatprep.subr.bf16.mxu1 %v8754_v50  ;;  %v8762_v4 = vpack.c.bf16 %v6571_v28, %v6570_v7 }
0x1a3f   : > { %8185 = vmatmul.mubr.msk.f32.gmra.mrb[86].mxu0 %vm429_vm0, %v6351_v36 }
0x1a40   : > { %8757 = vmatpush3.bf16.msra.mxu1 %v8754_v50 }
0x1a41   : > { %8759 = vmatprep.subr.bf16.mxu1 %v8758_v8 }
0x1a44   : > { %8761 = vmatpush3.bf16.msra.mxu1 %v8758_v8 }
0x1a45   : > { %8763 = vmatprep.subr.bf16.mxu1 %v8762_v4 }
0x1a48   : > { %8765 = vmatpush3.bf16.msra.mxu1 %v8762_v4 }
0x1a49   : > { %8767 = vmatprep.subr.bf16.mxu1 %v8766_v40 }
0x1a4c   : > { %8769 = vmatpush3.bf16.msra.mxu1 %v8766_v40 }
0x1aff   : > { %v8174_v51 = vpop.f32.mrb[78].mxu0 }
0x1b00   : > { %v6465_v17 = vadd.f32 %v8174_v51, %v7060_v61  ;;  %v6459_v22 = vpop.f32.mrb[79].mxu0 }
0x1b01   : > { %v6460_v41 = vadd.f32 %v7060_v61, %v6459_v22 }
0x1b02   : > { %v6519_v47 = vmul.f32 0.70710677, %v6465_v17  ;;  %v6509_v59 = vmul.f32 0.5, %v6465_v17 }
0x1b03   : > { %v6518_v44 = vmul.f32 0.70710677, %v6460_v41  ;;  %v6508_v33 = vmul.f32 0.5, %v6460_v41 }
0x1b04   : > { %9578 = verf.f32 %v6519_v47 }
0x1b05   : > { %9580 = verf.f32 %v6518_v44 }
0x1b06   : > { %v8177_v19 = vpop.f32.mrb[80].mxu0 }
0x1b07   : > { %v6475_v43 = vadd.f32 %v8177_v19, %v7060_v61  ;;  %v6469_v2 = vpop.f32.mrb[81].mxu0 }
0x1b08   : > { %v6470_v18 = vadd.f32 %v7060_v61, %v6469_v2 }
0x1b09   : > { %v6521_v52 = vmul.f32 0.70710677, %v6475_v43  ;;  %v6511_v50 = vmul.f32 0.5, %v6475_v43 }
0x1b0a   : > { %v6520_v15 = vmul.f32 0.70710677, %v6470_v18  ;;  %v8180_v38 = vpop.f32.mrb[82].mxu0  ;;  %v6510_v23 = vmul.f32 0.5, %v6470_v18 }
0x1b0b   : > { %9582 = verf.f32 %v6521_v52  ;;  %v6485_v55 = vadd.f32 %v8180_v38, %v7060_v61  ;;  %v6479_v58 = vpop.f32.mrb[83].mxu0 }
0x1b0c   : > { %9584 = verf.f32 %v6520_v15  ;;  %v6480_v35 = vadd.f32 %v7060_v61, %v6479_v58 }
0x1b0d   : > { %v6523_v16 = vmul.f32 0.70710677, %v6485_v55  ;;  %v6513_v37 = vmul.f32 0.5, %v6485_v55 }
0x1b0e   : > { %v9579_v30 = vpop.eup %9578  ;;  %v6522_v24 = vmul.f32 0.70710677, %v6480_v35  ;;  %v8183_v9 = vpop.f32.mrb[84].mxu0  ;;  %v6512_v4 = vmul.f32 0.5, %v6480_v35 }
0x1b0f   : > { %v9581_v29 = vpop.eup %9580  ;;  %v6539_v46 = vadd.f32 1.0, %v9579_v30  ;;  %9586 = verf.f32 %v6523_v16  ;;  %v6495_v42 = vadd.f32 %v8183_v9, %v7060_v61  ;;  %v6489_v1 = vpop.f32.mrb[85].mxu0  ;;  %v7071_v16 = vld [vmem:[%s11839_s11] ss:$0 sm:$0xff] }
0x1b10   : > { %v6538_v45 = vadd.f32 1.0, %v9581_v29  ;;  %9588 = verf.f32 %v6522_v24  ;;  %v6490_v26 = vadd.f32 %v7060_v61, %v6489_v1 }
0x1b11   : > { %v6525_v39 = vmul.f32 0.70710677, %v6495_v42  ;;  %v6549_v54 = vmul.f32 %v6539_v46, %v6509_v59  ;;  %v6515_v44 = vmul.f32 0.5, %v6495_v42 }
0x1b12   : > { %v6524_v31 = vmul.f32 0.70710677, %v6490_v26  ;;  %v8186_v27 = vpop.f32.mrb[86].mxu0  ;;  %v6548_v56 = vmul.f32 %v6538_v45, %v6508_v33  ;;  %v6514_v41 = vmul.f32 0.5, %v6490_v26 }
0x1b13   : > { %9590 = verf.f32 %v6525_v39  ;;  %v6505_v49 = vadd.f32 %v8186_v27, %v7060_v61  ;;  %v6499_v11 = vpop.f32.mrb[87].mxu0 }
0x1b14   : > { %9592 = verf.f32 %v6524_v31  ;;  %v6500_v6 = vadd.f32 %v7060_v61, %v6499_v11  ;;  %8219 = vmatprep.mubr.f32.mxu1 %v6548_v56 }
0x1b15   : > { %v9583_v10 = vpop.eup %9582  ;;  %v6527_v36 = vmul.f32 0.70710677, %v6505_v49  ;;  %8220 = vmatmul.mubr.f32.vlgmr.msra.gmra.mrb[102].mxu1 %v6549_v54  ;;  %v6517_v55 = vmul.f32 0.5, %v6505_v49 }
0x1b16   : > { %v9585_v20 = vpop.eup %9584  ;;  %v6541_v25 = vadd.f32 1.0, %v9583_v10  ;;  %v6526_v12 = vmul.f32 0.70710677, %v6500_v6  ;;  %v6516_v15 = vmul.f32 0.5, %v6500_v6 }
0x1b17   : > { %v6540_v48 = vadd.f32 1.0, %v9585_v20  ;;  %9594 = verf.f32 %v6527_v36 }
0x1b18   : > { %9596 = verf.f32 %v6526_v12  ;;  %v6551_v28 = vmul.f32 %v6541_v25, %v6511_v50 }
0x1b19   : > { %v9587_v5 = vpop.eup %9586  ;;  %v6550_v57 = vmul.f32 %v6540_v48, %v6510_v23 }
0x1b1a   : > { %v9589_v8 = vpop.eup %9588  ;;  %v6543_v7 = vadd.f32 1.0, %v9587_v5 }
0x1b1b   : > { %v6542_v53 = vadd.f32 1.0, %v9589_v8  ;;  %8222 = vmatprep.mubr.f32.mxu1 %v6550_v57 }
0x1b1c   : > { %8223 = vmatmul.mubr.f32.gmra.mrb[104].mxu1 %v6551_v28  ;;  %v6553_v22 = vmul.f32 %v6543_v7, %v6513_v37 }
0x1b1d   : > { %v9591_v40 = vpop.eup %9590  ;;  %v6552_v61 = vmul.f32 %v6542_v53, %v6512_v4 }
0x1b1e   : > { %v9593_v51 = vpop.eup %9592  ;;  %v6545_v17 = vadd.f32 1.0, %v9591_v40 }
0x1b1f   : > { %v6544_v47 = vadd.f32 1.0, %v9593_v51  ;;  %8225 = vmatprep.mubr.f32.mxu1 %v6552_v61 }
0x1b20   : > { %8226 = vmatmul.mubr.f32.gmra.mrb[106].mxu1 %v6553_v22  ;;  %v6555_v52 = vmul.f32 %v6545_v17, %v6515_v44 }
0x1b21   : > { %v9595_v19 = vpop.eup %9594  ;;  %v6554_v43 = vmul.f32 %v6544_v47, %v6514_v41 }
0x1b22   : > { %v9597_v2 = vpop.eup %9596  ;;  %v6547_v18 = vadd.f32 1.0, %v9595_v19 }
0x1b23   : > { %v6546_v38 = vadd.f32 1.0, %v9597_v2  ;;  %8228 = vmatprep.mubr.f32.mxu1 %v6554_v43 }
0x1b24   : > { %8229 = vmatmul.mubr.f32.gmra.mrb[108].mxu1 %v6555_v52  ;;  %v6557_v35 = vmul.f32 %v6547_v18, %v6517_v55 }
0x1b25   : > { %v6556_v58 = vmul.f32 %v6546_v38, %v6516_v15 }
0x1b27   : > { %8231 = vmatprep.mubr.f32.mxu1 %v6556_v58 }
0x1b28   : > { %8232 = vmatmul.mubr.f32.gmra.mrb[110].mxu1 %v6557_v35 }
0x1be8   : > { %v8221_v30 = vpop.f32.mrb[102].mxu1 }
0x1be9   : > { %v6653_v24 = vadd.f32 %v8221_v30, %v7071_v16  ;;  %v6647_v9 = vpop.f32.mrb[103].mxu1 }
0x1bea   : > { %v6648_v29 = vadd.f32 %v7071_v16, %v6647_v9 }
0x1beb   : > { %v6697_v46 = vadd.f32 %v6653_v24, %v11576_v14 }
0x1bec   : > { %v6696_v42 = vadd.f32 %v6648_v29, %v11578_v63 }
0x1bed   : > { %6707 = vst.msk [vmem:[%s11793_s28 + $0x8] sm:$0xff] %vm429_vm0, %v6697_v46 }
0x1bee   : > { %6706 = vst.msk [vmem:[%s11793_s28] sm:$0xff] %vm429_vm0, %v6696_v42 }
0x1bef   : > { %v8224_v1 = vpop.f32.mrb[104].mxu1 }
0x1bf0   : > { %v6663_v33 = vadd.f32 %v8224_v1, %v7071_v16  ;;  %v6657_v45 = vpop.f32.mrb[105].mxu1 }
0x1bf1   : > { %v6658_v26 = vadd.f32 %v7071_v16, %v6657_v45 }
0x1bf2   : > { %v6699_v59 = vadd.f32 %v6663_v33, %v11588_v60 }
0x1bf3   : > { %v6698_v39 = vadd.f32 %v6658_v26, %v11586_v0  ;;  %v8227_v31 = vpop.f32.mrb[106].mxu1 }
0x1bf4   : > { %6709 = vst.msk [vmem:[%s11793_s28 + $0x18] sm:$0xff] %vm429_vm0, %v6699_v59  ;;  %v6673_v14 = vadd.f32 %v8227_v31, %v7071_v16  ;;  %v6667_v63 = vpop.f32.mrb[107].mxu1 }
0x1bf5   : > { %6708 = vst.msk [vmem:[%s11793_s28 + $0x10] sm:$0xff] %vm429_vm0, %v6698_v39  ;;  %v6668_v27 = vadd.f32 %v7071_v16, %v6667_v63 }
0x1bf6   : > { %v6701_v56 = vadd.f32 %v6673_v14, %v11598_v62 }
0x1bf7   : > { %v6700_v54 = vadd.f32 %v6668_v27, %v11594_v21  ;;  %v8230_v49 = vpop.f32.mrb[108].mxu1 }
0x1bf8   : > { %6711 = vst.msk [vmem:[%s11793_s28 + $0x28] sm:$0xff] %vm429_vm0, %v6701_v56  ;;  %v6683_v0 = vadd.f32 %v8230_v49, %v7071_v16  ;;  %v6677_v60 = vpop.f32.mrb[109].mxu1 }
0x1bf9   : > { %6710 = vst.msk [vmem:[%s11793_s28 + $0x20] sm:$0xff] %vm429_vm0, %v6700_v54  ;;  %v6678_v11 = vadd.f32 %v7071_v16, %v6677_v60 }
0x1bfa   : > { %v6703_v6 = vadd.f32 %v6683_v0, %v11606_v3 }
0x1bfb   : > { %v6702_v10 = vadd.f32 %v6678_v11, %v11604_v13  ;;  %v8233_v36 = vpop.f32.mrb[110].mxu1 }
0x1bfc   : > { %6713 = vst.msk [vmem:[%s11793_s28 + $0x38] sm:$0xff] %vm429_vm0, %v6703_v6  ;;  %v6693_v62 = vadd.f32 %v8233_v36, %v7071_v16  ;;  %v6687_v20 = vpop.f32.mrb[111].mxu1 }
0x1bfd   : > { %6712 = vst.msk [vmem:[%s11793_s28 + $0x30] sm:$0xff] %vm429_vm0, %v6702_v10  ;;  %v6688_v21 = vadd.f32 %v7071_v16, %v6687_v20 }
0x1bfe   : > { %v6705_v25 = vadd.f32 %v6693_v62, %v11614_v32 }
0x1bff   : > { %v6704_v12 = vadd.f32 %v6688_v21, %v11618_v34 }
0x1c00   : > { %6715 = vst.msk [vmem:[%s11793_s28 + $0x48] sm:$0xff] %vm429_vm0, %v6705_v25 }
0x1c01   : > { %6714 = vst.msk [vmem:[%s11793_s28 + $0x40] sm:$0xff] %vm429_vm0, %v6704_v12 }
0x1c02 PF: > { %s22_s21 = sadd.s32 1, %s9614_s21  }
0x1c03   : > { %p19_p4 = scmp.ge.s32.totalorder %s22_s21, 4  }
0x1c05   :  { %21 = sbr.rel (!%p19_p4) target bundleno = 1 (0x1), region = 98 }

</bundles_post_ra>
